<compile_context>
chip_gen: v7x
topology: tpu7x:2x2x1
jax: 0.10.0
libtpu: 0.0.40
codegen_flags: <defaults>
</compile_context>

<pallas_src>
import functools

import jax
import jax.numpy as jnp
from jax.experimental import pallas as pl
from jax.experimental.pallas import tpu as pltpu


def _round_up(x, m):
    return ((x + m - 1) // m) * m


def _maybe_pad2(x, rows, cols):
    pr, pc = rows - x.shape[0], cols - x.shape[1]
    if pr == 0 and pc == 0:
        return x
    return jnp.pad(x, ((0, pr), (0, pc)))


def _maybe_pad1(x, n):
    p = n - x.shape[0]
    return x if p == 0 else jnp.pad(x, (0, p))


def _vmem_budget_bytes():
    """Generation-aware VMEM ceiling (128 MiB v5e/v6e, 64 MiB per-TC on v7x)."""
    try:
        cap = int(pltpu.get_tpu_info().vmem_capacity_bytes)
    except Exception:
        cap = 64 << 20            # conservative default: v7x per-TensorCore
    return cap * 3 // 4           # leave headroom for Mosaic internal scratch


# -----------------------------------------------------------------------------
# Fused GCN kernels:  out = epilogue( (A_rowblock @ X) @ W_colblock )
# -----------------------------------------------------------------------------
def _gcn_kernel_fused(a_ref, x_ref, w_ref, scale_ref, shift_ref, o_ref, *, relu):
    """Single output-column block: both matmuls back to back, no scratch."""
    ax = jnp.dot(a_ref[...], x_ref[...], preferred_element_type=jnp.float32)
    out = jnp.dot(ax.astype(w_ref.dtype), w_ref[...],
                  preferred_element_type=jnp.float32)
    out = out * scale_ref[...] + shift_ref[...]      # fused bias / BatchNorm(eval)
    if relu:
        out = jnp.maximum(out, 0.0)
    o_ref[...] = out.astype(o_ref.dtype)


def _gcn_kernel_scratch(a_ref, x_ref, w_ref, scale_ref, shift_ref, o_ref, ax_ref,
                        *, relu):
    """Multiple output-column blocks: A[i] @ X computed once per row block
    (j == 0) into a compute-dtype VMEM scratch and reused for every j."""
    @pl.when(pl.program_id(1) == 0)
    def _():
        ax_ref[...] = jnp.dot(a_ref[...], x_ref[...],
                              preferred_element_type=jnp.float32
                              ).astype(ax_ref.dtype)

    out = jnp.dot(ax_ref[...], w_ref[...], preferred_element_type=jnp.float32)
    out = out * scale_ref[...] + shift_ref[...]
    if relu:
        out = jnp.maximum(out, 0.0)
    o_ref[...] = out.astype(o_ref.dtype)


def _fused_gcn(adjacency, x, weight, scale, shift, *, relu,
               compute_dtype=jnp.bfloat16, out_dtype=jnp.float32):
    """relu?( ((A @ X) @ W) * scale + shift ),  A:[N,N]  X:[N,Fin]  W:[Fin,Fout]."""
    N = adjacency.shape[0]
    f_in, f_out = weight.shape
    assert adjacency.shape == (N, N) and x.shape == (N, f_in)

    cd, od = jnp.dtype(compute_dtype), jnp.dtype(out_dtype)
    csz, osz = cd.itemsize, od.itemsize

    # --- tiling ---------------------------------------------------------------
    # Lane-dense intermediate: pad the input-feature axis to a multiple of 128 so
    # A@X has a full-lane minor dim and the second matmul's contraction is
    # MXU-width (zero padding => exact).
    f_in_pad = _round_up(f_in, 128)
    f_out_pad = _round_up(f_out, 128)

    # Collapse the j axis whenever the whole (padded) output width fits in one
    # lane-dense block; otherwise use 1024-wide column blocks + AX scratch.
    if f_out_pad <= 2048:
        tn = f_out_pad
    else:
        tn = 1024
        f_out_pad = _round_up(f_out, tn)
    num_j = f_out_pad // tn

    # Single row block at small N (the kernel is grid-overhead bound there on
    # every generation; splitting for v7x megacore saves <0.05 us of MXU work).
    if N <= 512:
        n_pad = _round_up(N, 16)         # bf16 sublane tile
        tm = n_pad
    else:
        n_pad = _round_up(N, 256)
        tm = 256

    # --- generation-aware VMEM budget ------------------------------------------
    budget = _vmem_budget_bytes()

    def est_vmem(tm_):
        return (2 * tm_ * n_pad * csz            # A row slab (double buffered)
                + 2 * n_pad * f_in_pad * csz     # full X (double buffered)
                + 2 * f_in_pad * tn * csz        # W column block
                + 2 * 2 * tn * 4                 # scale / shift
                + 2 * tm_ * tn * osz             # output tile
                + (tm_ * f_in_pad * csz if num_j > 1 else 0))   # AX scratch

    while N > 512 and est_vmem(tm) > budget and tm > 64:
        tm //= 2                                  # 256 -> 128 -> 64 (still 16-aligned)
    # TODO(synk): K-tile the N contraction instead of asserting for huge graphs.
    assert est_vmem(tm) <= budget, (
        "per-step VMEM footprint exceeds this chip's budget; "
        "K-tile the N contraction")
    num_i = n_pad // tm
    vmem_limit = int(min(max(2 * est_vmem(tm), 16 << 20), budget))

    # --- operands (cast + pad only when actually needed) ------------------------
    a_p = _maybe_pad2(adjacency.astype(cd), n_pad, n_pad)
    x_p = _maybe_pad2(x.astype(cd), n_pad, f_in_pad)
    w_p = _maybe_pad2(weight.astype(cd), f_in_pad, f_out_pad)
    scale_p = _maybe_pad1(scale.astype(jnp.float32), f_out_pad).reshape(1, f_out_pad)
    shift_p = _maybe_pad1(shift.astype(jnp.float32), f_out_pad).reshape(1, f_out_pad)

    # --- cost hint (counts the per-row-block W re-reads) ------------------------
    flops = 2 * n_pad * n_pad * f_in_pad + 2 * n_pad * f_in_pad * f_out_pad
    bytes_accessed = (n_pad * n_pad * csz                      # A (once per row blk)
                      + n_pad * f_in_pad * csz                 # X (grid invariant)
                      + num_i * f_in_pad * f_out_pad * csz     # W re-read per i
                      + num_i * 2 * f_out_pad * 4              # scale/shift per i
                      + n_pad * f_out_pad * osz)               # output writeback

    if num_j == 1:
        kernel = functools.partial(_gcn_kernel_fused, relu=relu)
        scratch = []
    else:
        kernel = functools.partial(_gcn_kernel_scratch, relu=relu)
        scratch = [pltpu.VMEM((tm, f_in_pad), cd)]             # AX in compute dtype

    out = pl.pallas_call(
        kernel,
        out_shape=jax.ShapeDtypeStruct((n_pad, f_out_pad), od),
        grid_spec=pltpu.PrefetchScalarGridSpec(
            num_scalar_prefetch=0,
            grid=(num_i, num_j),                                   # i outer, j inner
            in_specs=[
                pl.BlockSpec((tm, n_pad), lambda i, j: (i, 0)),    # A row slab
                pl.BlockSpec((n_pad, f_in_pad), lambda i, j: (0, 0)),  # full X
                pl.BlockSpec((f_in_pad, tn), lambda i, j: (0, j)),     # W column block
                pl.BlockSpec((1, tn), lambda i, j: (0, j)),        # fused scale
                pl.BlockSpec((1, tn), lambda i, j: (0, j)),        # fused shift
            ],
            out_specs=pl.BlockSpec((tm, tn), lambda i, j: (i, j)),
            scratch_shapes=scratch,
        ),
        compiler_params=pltpu.CompilerParams(
            dimension_semantics=("parallel", "arbitrary"),
            vmem_limit_bytes=vmem_limit,
        ),
        cost_estimate=pl.CostEstimate(flops=int(flops), transcendentals=0,
                                      bytes_accessed=int(bytes_accessed)),
    )(a_p, x_p, w_p, scale_p, shift_p)

    if n_pad == N and f_out_pad == f_out:
        return out
    return out[:N, :f_out]


# -----------------------------------------------------------------------------
# Module-level wrappers
# -----------------------------------------------------------------------------
def graph_convolution(adjacency, input_feature, weight, bias=None, *,
                      compute_dtype=jnp.bfloat16, out_dtype=jnp.float32):
    """GraphConvolution.forward:  A @ (X @ W) + b   (computed as (A @ X) @ W)."""
    f_out = weight.shape[1]
    scale = jnp.ones((f_out,), jnp.float32)
    shift = (bias.astype(jnp.float32) if bias is not None
             else jnp.zeros((f_out,), jnp.float32))
    return _fused_gcn(adjacency, input_feature, weight, scale, shift,
                      relu=False, compute_dtype=compute_dtype, out_dtype=out_dtype)


def multi_adjacency_compute(features, n_way, out_dtype=None):
    """ProtoGCN.MultiAdjacencyCompute in plain JAX.
    # TODO(synk): per-row top-k + scatter (torch.topk) has no clean Pallas TPU
    # equivalent; kept as regular XLA ops (tiny N x N work).
    If out_dtype is given, the adjacency is emitted directly in that dtype (the
    cast fuses into the D^-1/2 scaling pass, avoiding an extra N^2 HBM pass)."""
    N = features.shape[0]
    f32 = features.astype(jnp.float32)
    sq = jnp.sum(f32 * f32, axis=1)
    d2 = jnp.maximum(sq[:, None] + sq[None, :] - 2.0 * (f32 @ f32.T), 0.0)
    adjacency_e = jnp.exp(-d2 / 9.0)
    k = int(round(N / n_way))
    _, pos = jax.lax.top_k(adjacency_e, k)                       # (N, k)
    rows = jnp.arange(N)[:, None]
    adjacency0 = jnp.zeros((N, N), jnp.float32).at[rows, pos].set(1.0)
    adjacency0 = adjacency0 * (1.0 - jnp.eye(N, dtype=jnp.float32))  # no self loop
    adjacency = jnp.eye(N, dtype=jnp.float32) + adjacency0 * adjacency_e
    d = jnp.sum(adjacency, axis=1) + 1.0
    inv_sqrt_d = jax.lax.rsqrt(d)
    adjacency = adjacency * inv_sqrt_d[:, None] * inv_sqrt_d[None, :]
    if out_dtype is not None:
        adjacency = adjacency.astype(out_dtype)
    return adjacency


def proto_gcn_forward(features, weight, bias, bn_gamma, bn_beta, bn_mean, bn_var,
                      *, n_way, eps=1e-5, compute_dtype=jnp.bfloat16,
                      out_dtype=jnp.float32):
    """ProtoGCN.forward (eval mode): relu(BN_eval(A @ features @ W + b)).
    Bias + BatchNorm are folded into a per-column scale/shift epilogue fused into
    the GCN Pallas kernel; dropout(p=0.6) is identity in eval.  Set
    out_dtype=jnp.bfloat16 to halve the HBM writeback if the consumer tolerates
    bf16 activations (biggest relative win on v5e)."""
    adjacency = multi_adjacency_compute(features, n_way, out_dtype=compute_dtype)
    s = bn_gamma / jnp.sqrt(bn_var + eps)
    shift = (bias - bn_mean) * s + bn_beta
    return _fused_gcn(adjacency, features, weight, s, shift, relu=True,
                      compute_dtype=compute_dtype, out_dtype=out_dtype)


if __name__ == "__main__":
    # Small shapes consistent with the module: N=256 nodes, input_dim=64 features,
    # output_dim=1000 (hard-coded in ProtoGCN), N_way=5.
    N, input_dim, output_dim, n_way = 256, 64, 1000, 5

    key = jax.random.PRNGKey(0)
    k_f, k_w, k_b, k_g, k_be, k_m, k_v = jax.random.split(key, 7)

    # Scaled features so the RBF adjacency exp(-d^2/9) is non-trivial.
    features = 0.25 * jax.random.normal(k_f, (N, input_dim), dtype=jnp.float32)

    # GraphConvolution.reset_parameters(): kaiming_uniform_ weight, zero bias.
    bound = (6.0 / output_dim) ** 0.5          # torch fan_in = weight.size(1)
    weight = jax.random.uniform(k_w, (input_dim, output_dim), jnp.float32,
                                -bound, bound)
    bias = jnp.zeros((output_dim,), jnp.float32)

    # bn2 running statistics / affine (eval mode) — non-trivial values so the
    # fused scale/shift epilogue is actually exercised.
    bn_gamma = jax.random.uniform(k_g, (output_dim,), jnp.float32, 0.5, 1.5)
    bn_beta = 0.1 * jax.random.normal(k_be, (output_dim,), jnp.float32)
    bn_mean = 0.1 * jax.random.normal(k_m, (output_dim,), jnp.float32)
    bn_var = jax.random.uniform(k_v, (output_dim,), jnp.float32, 0.5, 1.5)

    hp = jax.lax.Precision.HIGHEST
    adjacency = multi_adjacency_compute(features, n_way)        # f32 reference A

    # --- 1. bare GraphConvolution kernel, f32 operands, tight check -----------
    rnd_bias = 0.05 * jax.random.normal(k_b, (output_dim,), jnp.float32)
    gcn_out = graph_convolution(adjacency, features, weight, rnd_bias,
                                compute_dtype=jnp.float32)
    gcn_out = jax.block_until_ready(gcn_out)
    gcn_ref = jnp.dot(adjacency, jnp.dot(features, weight, precision=hp),
                      precision=hp) + rnd_bias
    assert gcn_out.shape == (N, output_dim)
    assert jnp.allclose(gcn_out, gcn_ref, atol=5e-3, rtol=5e-3), (
        float(jnp.max(jnp.abs(gcn_out - gcn_ref))))

    # --- 2. full ProtoGCN forward (eval), bf16 MXU operands, f32 accumulate ----
    out = proto_gcn_forward(features, weight, bias, bn_gamma, bn_beta,
                            bn_mean, bn_var, n_way=n_way)
    out = jax.block_until_ready(out)

    ref = jnp.dot(adjacency, jnp.dot(features, weight, precision=hp),
                  precision=hp) + bias
    ref = (ref - bn_mean) / jnp.sqrt(bn_var + 1e-5) * bn_gamma + bn_beta
    ref = jnp.maximum(ref, 0.0)
    assert out.shape == (N, output_dim)
    assert jnp.allclose(out, ref, atol=2e-2, rtol=2e-2), (
        float(jnp.max(jnp.abs(out - ref))))

    print("KERNEL_OK")
</pallas_src>

<mosaic_0001>
module attributes {stable_mosaic.version = 11 : i64} {
  func.func @_gcn_kernel_fused(%arg0: i32, %arg1: i32, %arg2: memref<256x256xf32, #tpu.memory_space<vmem>>, %arg3: memref<256x128xf32, #tpu.memory_space<vmem>>, %arg4: memref<128x1024xf32, #tpu.memory_space<vmem>>, %arg5: memref<1x1024xf32, #tpu.memory_space<vmem>>, %arg6: memref<1x1024xf32, #tpu.memory_space<vmem>>, %arg7: memref<256x1024xf32, #tpu.memory_space<vmem>>) attributes {dimension_semantics = [#tpu.dimension_semantics<parallel>, #tpu.dimension_semantics<arbitrary>], iteration_bounds = array<i64: 1, 1>, scalar_prefetch = 0 : i64, scratch_operands = 0 : i64, tpu.core_type = #tpu.core_type<tc>, window_params = [{transform_indices = @transform_0, window_bounds = array<i64: 256, 256>}, {pipeline_mode = #tpu.pipeline_mode<synchronous>, transform_indices = @transform_1, window_bounds = array<i64: 256, 128>}, {transform_indices = @transform_2, window_bounds = array<i64: 128, 1024>}, {transform_indices = @transform_3, window_bounds = array<i64: 1, 1024>}, {transform_indices = @transform_4, window_bounds = array<i64: 1, 1024>}, {transform_indices = @transform_5, window_bounds = array<i64: 256, 1024>}]} {
    %c0 = arith.constant 0 : index
    %c0_0 = arith.constant 0 : index
    %0 = vector.load %arg2[%c0, %c0_0] : memref<256x256xf32, #tpu.memory_space<vmem>>, vector<256x256xf32>
    %c0_1 = arith.constant 0 : index
    %c0_2 = arith.constant 0 : index
    %1 = vector.load %arg3[%c0_1, %c0_2] : memref<256x128xf32, #tpu.memory_space<vmem>>, vector<256x128xf32>
    %cst = arith.constant dense<0.000000e+00> : vector<256x128xf32>
    %2 = tpu.matmul %0, %1, %cst {dimension_numbers = #tpu.dot_dimension_numbers<[1], [0], [0], [1], [0, 0, 1, 1], [], []>} : vector<256x256xf32>, vector<256x128xf32>, vector<256x128xf32> -> vector<256x128xf32>
    %c0_3 = arith.constant 0 : index
    %c0_4 = arith.constant 0 : index
    %3 = vector.load %arg4[%c0_3, %c0_4] : memref<128x1024xf32, #tpu.memory_space<vmem>>, vector<128x1024xf32>
    %cst_5 = arith.constant dense<0.000000e+00> : vector<256x1024xf32>
    %4 = tpu.matmul %2, %3, %cst_5 {dimension_numbers = #tpu.dot_dimension_numbers<[1], [0], [0], [1], [0, 0, 1, 1], [], []>} : vector<256x128xf32>, vector<128x1024xf32>, vector<256x1024xf32> -> vector<256x1024xf32>
    %c0_6 = arith.constant 0 : index
    %c0_7 = arith.constant 0 : index
    %5 = vector.load %arg5[%c0_6, %c0_7] : memref<1x1024xf32, #tpu.memory_space<vmem>>, vector<1x1024xf32>
    %6 = vector.broadcast %5 : vector<1x1024xf32> to vector<256x1024xf32>
    %7 = arith.mulf %4, %6 : vector<256x1024xf32>
    %c0_8 = arith.constant 0 : index
    %c0_9 = arith.constant 0 : index
    %8 = vector.load %arg6[%c0_8, %c0_9] : memref<1x1024xf32, #tpu.memory_space<vmem>>, vector<1x1024xf32>
    %9 = vector.broadcast %8 : vector<1x1024xf32> to vector<256x1024xf32>
    %10 = arith.addf %7, %9 : vector<256x1024xf32>
    %c0_10 = arith.constant 0 : index
    %c0_11 = arith.constant 0 : index
    %11 = vector.load %arg7[%c0_10, %c0_11] : memref<256x1024xf32, #tpu.memory_space<vmem>>, vector<256x1024xf32>
    tpu.vector_store %arg7[%c0_10, %c0_11], %10 {strides = array<i32>} : memref<256x1024xf32, #tpu.memory_space<vmem>>, vector<256x1024xf32>,
    return
  }
  func.func @transform_0(%arg0: i32, %arg1: i32) -> (i32, i32) {
    %c0_i32 = arith.constant 0 : i32
    %c0_i32_0 = arith.constant 0 : i32
    return %arg0, %c0_i32 : i32, i32
  }
  func.func @transform_1(%arg0: i32, %arg1: i32) -> (i32, i32) {
    %c0_i32 = arith.constant 0 : i32
    %c0_i32_0 = arith.constant 0 : i32
    %c0_i32_1 = arith.constant 0 : i32
    return %c0_i32, %c0_i32_0 : i32, i32
  }
  func.func @transform_2(%arg0: i32, %arg1: i32) -> (i32, i32) {
    %c0_i32 = arith.constant 0 : i32
    %c0_i32_0 = arith.constant 0 : i32
    return %c0_i32, %arg1 : i32, i32
  }
  func.func @transform_3(%arg0: i32, %arg1: i32) -> (i32, i32) {
    %c0_i32 = arith.constant 0 : i32
    %c0_i32_0 = arith.constant 0 : i32
    return %c0_i32, %arg1 : i32, i32
  }
  func.func @transform_4(%arg0: i32, %arg1: i32) -> (i32, i32) {
    %c0_i32 = arith.constant 0 : i32
    %c0_i32_0 = arith.constant 0 : i32
    return %c0_i32, %arg1 : i32, i32
  }
  func.func @transform_5(%arg0: i32, %arg1: i32) -> (i32, i32) {
    %c0_i32 = arith.constant 0 : i32
    return %arg0, %arg1 : i32, i32
  }
}

</mosaic_0001>

<bundles_post_ra>
// kernel: tpu_custom_call.1
= control target key start
LH: loop header
LB: loop body
LE: loop exit
PB: predicated region body
PF: predicated region fallthrough
CT: control target
= control target key end

     0   :  { %10 = vsyncpa [#allocation3], 0  ;;  %s3768_s0 = inlined_call_operand.hbm [shape: f32[256,256], index: 0, kind: input, shape index: {}]   ;;  %s3769_s1 = inlined_call_operand.hbm [shape: f32[256,128], index: 1, kind: input, shape index: {}]   ;;  %s3770_s2 = inlined_call_operand.hbm [shape: f32[128,1024], index: 2, kind: input, shape index: {}]   ;;  %s3771_s3 = inlined_call_operand.vmem [shape: f32[1,1024], index: 3, kind: input, shape index: {}]   ;;  %s3772_s4 = inlined_call_operand.hbm [shape: f32[1,1024], index: 4, kind: input, shape index: {}]   ;;  %s3773_s5 = inlined_call_operand.hbm [shape: f32[256,1024], index: 5, kind: output, shape index: {}]  }
   0x1   :  { %11 = vsyncpa [#allocation6], 0 }
   0x2   :  { %12 = vsyncpa [#allocation9], 0 }
   0x3   :  { %13 = vsyncpa [#allocation4], 0  ;;  %s2747_s18 = smov [#allocation5]   ;;  %s2629_s22 = scalar_lea.hbm %s3769_s1, 4096 }
   0x4   :  { %s31_s19 = sshll.u32 %s2747_s18, 4  ;;  %p2630_p0 = scmp.ne.s32.totalorder %s3769_s1, %s2629_s22  ;;  %s32_s19 = int_to_ptr.vmem [resolvable:$true] %s31_s19 }
   0x5   :  { %p2633_p1 = scmp.lt.u32.totalorder %s2629_s22, %s3769_s1 }
   0x7   :  { %p2635_p2 = pnand %p2633_p1, %p2630_p0 }
   0x9   :  { %2638 = shalt.err (!%p2635_p2)
}
   0xa   :  { %s2639_s27 = scalar_lea.vmem %s32_s19, 4096  ;;  %p2644_p4 = scmp.lt.s32.totalorder %s32_s19, %s32_s19 }
   0xb   :  { %p2640_p3 = scmp.ne.s32.totalorder %s32_s19, %s2639_s27  ;;  %p2645_p5 = scmp.lt.s32.totalorder %s2639_s27, %s2639_s27 }
   0xd   :  { %p2646_p6 = por %p2645_p5, %p2644_p4 }
   0xf   :  { %p2647_p7 = pnand %p2646_p6, %p2640_p3 }
  0x11   :  { %2650 = shalt.err (!%p2647_p7)
}
  0x12   :  { %s2748_s28 = smov 128   ;;  %s2749_s29 = smov 8  }
  0x13   :  { %37 = dma.hbm_to_vmem [thread:$0]  %s3769_s1, 4096, %s32_s19, [#allocation6], %s2748_s28, %s2748_s28, %s2749_s29  }
  0x14   :  { %s2750_s7 = smov [#allocation2]   ;;  %s2651_s11 = scalar_lea.hbm %s3768_s0, 8192 }
  0x15   :  { %s19_s8 = sshll.u32 %s2750_s7, 4  ;;  %p2652_p8 = scmp.ne.s32.totalorder %s3768_s0, %s2651_s11  ;;  %s20_s8 = int_to_ptr.vmem [resolvable:$true] %s19_s8 }
  0x16   :  { %p2655_p9 = scmp.lt.u32.totalorder %s2651_s11, %s3768_s0 }
  0x18   :  { %p2657_p10 = pnand %p2655_p9, %p2652_p8 }
  0x1a   :  { %2660 = shalt.err (!%p2657_p10)
}
  0x1b   :  { %s2661_s16 = scalar_lea.vmem %s20_s8, 8192  ;;  %p2666_p12 = scmp.lt.s32.totalorder %s20_s8, %s20_s8 }
  0x1c   :  { %p2662_p11 = scmp.ne.s32.totalorder %s20_s8, %s2661_s16  ;;  %p2667_p13 = scmp.lt.s32.totalorder %s2661_s16, %s2661_s16 }
  0x1e   :  { %p2668_p0 = por %p2667_p13, %p2666_p12 }
  0x20   :  { %p2669_p1 = pnand %p2668_p0, %p2662_p11 }
  0x22   :  { %2672 = shalt.err (!%p2669_p1)
}
  0x23   :  { %s2751_s1 = smov 256   ;;  %s2752_s17 = smov 16  }
  0x24   :  { %25 = dma.hbm_to_vmem [thread:$0]  %s3768_s0, 8192, %s20_s8, [#allocation3], %s2751_s1, %s2751_s1, %s2752_s17  }
  0x25   :  { %s2753_s20 = smov [#allocation7]   ;;  %s2673_s24 = scalar_lea.hbm %s3770_s2, 16384 }
  0x26   :  { %s43_s21 = sshll.u32 %s2753_s20, 4  ;;  %p2674_p2 = scmp.ne.s32.totalorder %s3770_s2, %s2673_s24  ;;  %s44_s21 = int_to_ptr.vmem [resolvable:$true] %s43_s21 }
  0x27   :  { %p2677_p3 = scmp.lt.u32.totalorder %s2673_s24, %s3770_s2 }
  0x29   :  { %p2679_p4 = pnand %p2677_p3, %p2674_p2 }
  0x2b   :  { %2682 = shalt.err (!%p2679_p4)
}
  0x2c   :  { %s2683_s29 = scalar_lea.vmem %s44_s21, 16384  ;;  %p2688_p6 = scmp.lt.s32.totalorder %s44_s21, %s44_s21 }
  0x2d   :  { %p2684_p5 = scmp.ne.s32.totalorder %s44_s21, %s2683_s29  ;;  %p2689_p7 = scmp.lt.s32.totalorder %s2683_s29, %s2683_s29 }
  0x2f   :  { %p2690_p8 = por %p2689_p7, %p2688_p6 }
  0x31   :  { %p2691_p9 = pnand %p2690_p8, %p2684_p5 }
  0x33   :  { %2694 = shalt.err (!%p2691_p9)
}
  0x34   :  { %s2754_s0 = smov 1024   ;;  %s2755_s30 = smov 64  }
  0x35   :  { %49 = dma.hbm_to_vmem [thread:$0]  %s3770_s2, 16384, %s44_s21, [#allocation6], %s2754_s0, %s2754_s0, %s2755_s30  }
  0x36   :  { %s2756_s8 = smov [#allocation8]   ;;  %s2695_s12 = scalar_lea.hbm %s3772_s4, 128 }
  0x37   :  { %s58_s9 = sshll.u32 %s2756_s8, 4  ;;  %p2696_p10 = scmp.ne.s32.totalorder %s3772_s4, %s2695_s12  ;;  %s59_s9 = int_to_ptr.vmem [resolvable:$true] %s58_s9 }
  0x38   :  { %p2699_p11 = scmp.lt.u32.totalorder %s2695_s12, %s3772_s4 }
  0x3a   :  { %p2701_p12 = pnand %p2699_p11, %p2696_p10 }
  0x3c   :  { %2704 = shalt.err (!%p2701_p12)
}
  0x3d   :  { %s2705_s1 = scalar_lea.vmem %s59_s9, 128  ;;  %p2710_p0 = scmp.lt.s32.totalorder %s59_s9, %s59_s9 }
  0x3e   :  { %p2706_p13 = scmp.ne.s32.totalorder %s59_s9, %s2705_s1  ;;  %p2711_p1 = scmp.lt.s32.totalorder %s2705_s1, %s2705_s1 }
  0x40   :  { %p2712_p2 = por %p2711_p1, %p2710_p0 }
  0x42   :  { %p2713_p3 = pnand %p2712_p2, %p2706_p13 }
  0x44   :  { %2716 = shalt.err (!%p2713_p3)
}
  0x45   :  { %61 = dma.hbm_to_vmem [thread:$0]  %s3772_s4, 128, %s59_s9, [#allocation9]  }
  0x46   :  { %2739 = dma.done.wait [#allocation3], 8192  }
  0x47   :  { %2740 = vsyncadd [#allocation3], 4294959104 }
  0x48   :  { %2741 = dma.done.wait [#allocation6], 20480  }
  0x49   :  { %2742 = vsyncadd [#allocation6], 4294946816 }
  0x4a   :  { %2743 = dma.done.wait [#allocation9], 128  }
  0x4b   :  { %2744 = vsyncadd [#allocation9], 4294967168  ;;  %v2757_v0 = vmov 0.0|0.0   ;;  %v138_v1 = vld [vmem:[#allocation5] sm:$0xff]  ;;  %v139_v2 = vld [vmem:[#allocation5 + $0x8] sm:$0xff] }
  0x4c   :  { %2422 = vmatprep.subr.bf16.mxu0 %v2757_v0  ;;  %v140_v3 = vld [vmem:[#allocation5 + $0x10] sm:$0xff]  ;;  %v2423_v4 = vpack.c.bf16 %v139_v2, %v138_v1  ;;  %v141_v5 = vld [vmem:[#allocation5 + $0x18] sm:$0xff]  ;;  %v142_v7 = vld [vmem:[#allocation5 + $0x20] sm:$0xff] }
  0x4d   :  { %v2426_v6 = vpack.c.bf16 %v141_v5, %v140_v3  ;;  %v143_v8 = vld [vmem:[#allocation5 + $0x28] sm:$0xff]  ;;  %v144_v10 = vld [vmem:[#allocation5 + $0x30] sm:$0xff]  ;;  %v145_v11 = vld [vmem:[#allocation5 + $0x38] sm:$0xff] }
  0x4e   :  { %2424 = vmatpush1.bf16.msra.mxu0 %v2423_v4  ;;  %v2429_v9 = vpack.c.bf16 %v143_v8, %v142_v7  ;;  %v75_v12 = vld [vmem:[#allocation2 + $0x8] sm:$0xff]  ;;  %v2432_v13 = vpack.c.bf16 %v145_v11, %v144_v10  ;;  %v146_v14 = vld [vmem:[#allocation5 + $0x40] sm:$0xff]  ;;  %v148_v17 = vld [vmem:[#allocation5 + $0x50] sm:$0xff] }
  0x4f   :  { %2425 = vmatprep.subr.bf16.mxu0 %v2757_v0  ;;  %234 = vmatprep.mubr.f32.mxu0 %v75_v12  ;;  %v147_v15 = vld [vmem:[#allocation5 + $0x48] sm:$0xff]  ;;  %v149_v18 = vld [vmem:[#allocation5 + $0x58] sm:$0xff]  ;;  %v150_v20 = vld [vmem:[#allocation5 + $0x60] sm:$0xff] }
  0x50   :  { %v2435_v16 = vpack.c.bf16 %v147_v15, %v146_v14  ;;  %v2438_v19 = vpack.c.bf16 %v149_v18, %v148_v17  ;;  %v151_v21 = vld [vmem:[#allocation5 + $0x68] sm:$0xff]  ;;  %v152_v23 = vld [vmem:[#allocation5 + $0x70] sm:$0xff]  ;;  %v153_v24 = vld [vmem:[#allocation5 + $0x78] sm:$0xff] }
  0x51   :  { %v2441_v22 = vpack.c.bf16 %v151_v21, %v150_v20  ;;  %v2444_v25 = vpack.c.bf16 %v153_v24, %v152_v23  ;;  %v154_v26 = vld [vmem:[#allocation5 + $0x80] sm:$0xff]  ;;  %v155_v27 = vld [vmem:[#allocation5 + $0x88] sm:$0xff]  ;;  %v156_v29 = vld [vmem:[#allocation5 + $0x90] sm:$0xff] }
  0x52   :  { %2427 = vmatpush1.bf16.msra.mxu0 %v2426_v6  ;;  %v2447_v28 = vpack.c.bf16 %v155_v27, %v154_v26  ;;  %v157_v30 = vld [vmem:[#allocation5 + $0x98] sm:$0xff]  ;;  %v158_v32 = vld [vmem:[#allocation5 + $0xa0] sm:$0xff]  ;;  %v159_v33 = vld [vmem:[#allocation5 + $0xa8] sm:$0xff] }
  0x53   :  { %2428 = vmatprep.subr.bf16.mxu0 %v2757_v0  ;;  %v2450_v31 = vpack.c.bf16 %v157_v30, %v156_v29  ;;  %v2453_v34 = vpack.c.bf16 %v159_v33, %v158_v32  ;;  %v160_v35 = vld [vmem:[#allocation5 + $0xb0] sm:$0xff]  ;;  %v161_v36 = vld [vmem:[#allocation5 + $0xb8] sm:$0xff]  ;;  %v162_v38 = vld [vmem:[#allocation5 + $0xc0] sm:$0xff] }
  0x54   :  { %v2456_v37 = vpack.c.bf16 %v161_v36, %v160_v35  ;;  %v163_v39 = vld [vmem:[#allocation5 + $0xc8] sm:$0xff]  ;;  %v164_v41 = vld [vmem:[#allocation5 + $0xd0] sm:$0xff]  ;;  %v165_v42 = vld [vmem:[#allocation5 + $0xd8] sm:$0xff] }
  0x55   :  { %v2459_v40 = vpack.c.bf16 %v163_v39, %v162_v38  ;;  %v2462_v43 = vpack.c.bf16 %v165_v42, %v164_v41  ;;  %v166_v44 = vld [vmem:[#allocation5 + $0xe0] sm:$0xff]  ;;  %v167_v45 = vld [vmem:[#allocation5 + $0xe8] sm:$0xff]  ;;  %v168_v47 = vld [vmem:[#allocation5 + $0xf0] sm:$0xff] }
  0x56   :  { %2430 = vmatpush1.bf16.msra.mxu0 %v2429_v9  ;;  %v2465_v46 = vpack.c.bf16 %v167_v45, %v166_v44  ;;  %v169_v48 = vld [vmem:[#allocation5 + $0xf8] sm:$0xff]  ;;  %v74_v50 = vld [vmem:[#allocation2] sm:$0xff]  ;;  %v396_v51 = vld [vmem:[#allocation7 + $0x8] sm:$0xff] }
  0x57   :  { %2431 = vmatprep.subr.bf16.mxu0 %v2757_v0  ;;  %v2468_v49 = vpack.c.bf16 %v169_v48, %v168_v47  ;;  %v404_v52 = vld [vmem:[#allocation7 + $0x48] sm:$0xff]  ;;  %v395_v53 = vld [vmem:[#allocation7] sm:$0xff]  ;;  %v77_v58 = vld [vmem:[#allocation2 + $0x18] sm:$0xff] }
  0x58   :  { %v2470_v54 = vpack.c.bf16 %v404_v52, %v396_v51  ;;  %v403_v55 = vld [vmem:[#allocation7 + $0x40] sm:$0xff]  ;;  %v412_v56 = vld [vmem:[#allocation7 + $0x88] sm:$0xff]  ;;  %v81_v11 = vld [vmem:[#allocation2 + $0x38] sm:$0xff] }
  0x59   :  { %v420_v57 = vld [vmem:[#allocation7 + $0xc8] sm:$0xff]  ;;  %v2472_v59 = vpack.c.bf16 %v403_v55, %v395_v53  ;;  %v411_v61 = vld [vmem:[#allocation7 + $0x80] sm:$0xff]  ;;  %v80_v17 = vld [vmem:[#allocation2 + $0x30] sm:$0xff] }
  0x5a   :  { %2433 = vmatpush1.bf16.msra.mxu0 %v2432_v13  ;;  %v2474_v60 = vpack.c.bf16 %v420_v57, %v412_v56  ;;  %v419_v62 = vld [vmem:[#allocation7 + $0xc0] sm:$0xff]  ;;  %v428_v63 = vld [vmem:[#allocation7 + $0x108] sm:$0xff]  ;;  %2598 = vmatprep.subr.bf16.mxu1 %v2470_v54  ;;  %v85_v27 = vld [vmem:[#allocation2 + $0x58] sm:$0xff] }
  0x5b   :  { %2434 = vmatprep.subr.bf16.mxu0 %v2757_v0  ;;  %v436_v1 = vld [vmem:[#allocation7 + $0x148] sm:$0xff]  ;;  %2606 = vmatpush1.bf16.msra.mxu1 %v2472_v59  ;;  %v2476_v2 = vpack.c.bf16 %v419_v62, %v411_v61  ;;  %v427_v5 = vld [vmem:[#allocation7 + $0x100] sm:$0xff]  ;;  %v84_v33 = vld [vmem:[#allocation2 + $0x50] sm:$0xff] }
  0x5c   :  { %v79_v3 = vld [vmem:[#allocation2 + $0x28] sm:$0xff]  ;;  %v2478_v4 = vpack.c.bf16 %v436_v1, %v428_v63  ;;  %v435_v6 = vld [vmem:[#allocation7 + $0x140] sm:$0xff]  ;;  %2599 = vmatprep.subr.bf16.mxu1 %v2474_v60  ;;  %v88_v47 = vld [vmem:[#allocation2 + $0x70] sm:$0xff] }
  0x5d   :  { %v444_v7 = vld [vmem:[#allocation7 + $0x188] sm:$0xff]  ;;  %v78_v9 = vld [vmem:[#allocation2 + $0x20] sm:$0xff]  ;;  %v2480_v10 = vpack.c.bf16 %v435_v6, %v427_v5  ;;  %v93_v51 = vld [vmem:[#allocation2 + $0x98] sm:$0xff] }
  0x5e   :  { %2436 = vmatpush1.bf16.msra.mxu0 %v2435_v16  ;;  %v452_v8 = vld [vmem:[#allocation7 + $0x1c8] sm:$0xff]  ;;  %v443_v13 = vld [vmem:[#allocation7 + $0x180] sm:$0xff]  ;;  %v92_v52 = vld [vmem:[#allocation2 + $0x90] sm:$0xff] }
  0x5f   :  { %2437 = vmatprep.subr.bf16.mxu0 %v2757_v0  ;;  %2607 = vmatpush1.bf16.msra.mxu1 %v2476_v2  ;;  %v2482_v12 = vpack.c.bf16 %v452_v8, %v444_v7  ;;  %v451_v14 = vld [vmem:[#allocation7 + $0x1c0] sm:$0xff]  ;;  %v460_v15 = vld [vmem:[#allocation7 + $0x208] sm:$0xff]  ;;  %v97_v55 = vld [vmem:[#allocation2 + $0xb8] sm:$0xff] }
  0x60   :  { %2600 = vmatprep.subr.bf16.mxu1 %v2478_v4  ;;  %v468_v16 = vld [vmem:[#allocation7 + $0x248] sm:$0xff]  ;;  %v2484_v18 = vpack.c.bf16 %v451_v14, %v443_v13  ;;  %v459_v21 = vld [vmem:[#allocation7 + $0x200] sm:$0xff]  ;;  %v96_v56 = vld [vmem:[#allocation2 + $0xb0] sm:$0xff]  ;;  %v2758_v14 = vmov 0.0  }
  0x61   :  { %v2486_v20 = vpack.c.bf16 %v468_v16, %v460_v15  ;;  %v476_v23 = vld [vmem:[#allocation7 + $0x288] sm:$0xff]  ;;  %v475_v29 = vld [vmem:[#allocation7 + $0x280] sm:$0xff]  ;;  %v105_v63 = vld [vmem:[#allocation2 + $0xf8] sm:$0xff]  ;;  %659 = vmatprep.mubr.f32.mxu1 %v2758_v14 }
  0x62   :  { %2439 = vmatpush1.bf16.msra.mxu0 %v2438_v19  ;;  %v83_v19 = vld [vmem:[#allocation2 + $0x48] sm:$0xff]  ;;  %v483_v30 = vld [vmem:[#allocation7 + $0x2c0] sm:$0xff]  ;;  %v104_v1 = vld [vmem:[#allocation2 + $0xf0] sm:$0xff] }
  0x63   :  { %2440 = vmatprep.subr.bf16.mxu0 %v2757_v0  ;;  %2608 = vmatpush1.bf16.msra.mxu1 %v2480_v10  ;;  %v484_v24 = vld [vmem:[#allocation7 + $0x2c8] sm:$0xff]  ;;  %v499_v38 = vld [vmem:[#allocation7 + $0x340] sm:$0xff]  ;;  %v113_v7 = vld [vmem:[#allocation2 + $0x138] sm:$0xff] }
  0x64   :  { %2601 = vmatprep.subr.bf16.mxu1 %v2482_v12  ;;  %v500_v32 = vld [vmem:[#allocation7 + $0x348] sm:$0xff]  ;;  %v86_v41 = vld [vmem:[#allocation2 + $0x60] sm:$0xff]  ;;  %v112_v8 = vld [vmem:[#allocation2 + $0x130] sm:$0xff] }
  0x65   :  { %v87_v35 = vld [vmem:[#allocation2 + $0x68] sm:$0xff]  ;;  %v507_v45 = vld [vmem:[#allocation7 + $0x380] sm:$0xff]  ;;  %v121_v16 = vld [vmem:[#allocation2 + $0x178] sm:$0xff] }
  0x66   :  { %2442 = vmatpush1.bf16.msra.mxu0 %v2441_v22  ;;  %v467_v22 = vld [vmem:[#allocation7 + $0x240] sm:$0xff]  ;;  %v508_v39 = vld [vmem:[#allocation7 + $0x388] sm:$0xff] }
  0x67   :  { %2443 = vmatprep.subr.bf16.mxu0 %v2757_v0  ;;  %2609 = vmatpush1.bf16.msra.mxu1 %v2484_v18  ;;  %v2488_v26 = vpack.c.bf16 %v467_v22, %v459_v21  ;;  %v95_v53 = vld [vmem:[#allocation2 + $0xa8] sm:$0xff]  ;;  %v102_v62 = vld [vmem:[#allocation2 + $0xe0] sm:$0xff]  ;;  %v124_v21 = vld [vmem:[#allocation2 + $0x190] sm:$0xff] }
  0x68   :  { %2602 = vmatprep.subr.bf16.mxu1 %v2486_v20  ;;  %v99_v57 = vld [vmem:[#allocation2 + $0xc8] sm:$0xff]  ;;  %v110_v6 = vld [vmem:[#allocation2 + $0x120] sm:$0xff] }
  0x69   :  { %v103_v61 = vld [vmem:[#allocation2 + $0xe8] sm:$0xff]  ;;  %v118_v15 = vld [vmem:[#allocation2 + $0x160] sm:$0xff] }
  0x6a   :  { %2445 = vmatpush1.bf16.msra.mxu0 %v2444_v25  ;;  %v82_v25 = vld [vmem:[#allocation2 + $0x40] sm:$0xff]  ;;  %v111_v5 = vld [vmem:[#allocation2 + $0x128] sm:$0xff] }
  0x6b   :  { %2446 = vmatprep.subr.bf16.mxu0 %v2757_v0  ;;  %2610 = vmatpush1.bf16.msra.mxu1 %v2488_v26  ;;  %v119_v13 = vld [vmem:[#allocation2 + $0x168] sm:$0xff] }
  0x6c   :  { %v400_v22 = vld [vmem:[#allocation7 + $0x28] sm:$0xff] }
  0x6e   :  { %2448 = vmatpush1.bf16.msra.mxu0 %v2447_v28  ;;  %v2490_v28 = vpack.c.bf16 %v484_v24, %v476_v23  ;;  %v408_v23 = vld [vmem:[#allocation7 + $0x68] sm:$0xff] }
  0x6f   :  { %2449 = vmatprep.subr.bf16.mxu0 %v2757_v0  ;;  %v127_v24 = vld [vmem:[#allocation2 + $0x1a8] sm:$0xff] }
  0x70   :  { %2603 = vmatprep.subr.bf16.mxu1 %v2490_v28 }
  0x72   :  { %2451 = vmatpush1.bf16.msra.mxu0 %v2450_v31  ;;  %v492_v31 = vld [vmem:[#allocation7 + $0x308] sm:$0xff] }
  0x73   :  { %2452 = vmatprep.subr.bf16.mxu0 %v2757_v0  ;;  %v2494_v36 = vpack.c.bf16 %v500_v32, %v492_v31  ;;  %v133_v31 = vld [vmem:[#allocation2 + $0x1d8] sm:$0xff]  ;;  %v132_v32 = vld [vmem:[#allocation2 + $0x1d0] sm:$0xff] }
  0x76   :  { %2454 = vmatpush1.bf16.msra.mxu0 %v2453_v34  ;;  %v2492_v34 = vpack.c.bf16 %v483_v30, %v475_v29  ;;  %v131_v29 = vld [vmem:[#allocation2 + $0x1c8] sm:$0xff]  ;;  %v130_v30 = vld [vmem:[#allocation2 + $0x1c0] sm:$0xff] }
  0x77   :  { %2455 = vmatprep.subr.bf16.mxu0 %v2757_v0 }
  0x78   :  { %2611 = vmatpush1.bf16.msra.mxu1 %v2492_v34 }
  0x79   :  { %2604 = vmatprep.subr.bf16.mxu1 %v2494_v36 }
  0x7a   :  { %2457 = vmatpush1.bf16.msra.mxu0 %v2456_v37  ;;  %v491_v37 = vld [vmem:[#allocation7 + $0x300] sm:$0xff] }
  0x7b   :  { %2458 = vmatprep.subr.bf16.mxu0 %v2757_v0  ;;  %v2496_v42 = vpack.c.bf16 %v499_v38, %v491_v37  ;;  %v398_v37 = vld [vmem:[#allocation7 + $0x18] sm:$0xff] }
  0x7c   :  { %v406_v38 = vld [vmem:[#allocation7 + $0x58] sm:$0xff] }
  0x7d   :  { %2612 = vmatpush1.bf16.msra.mxu1 %v2496_v42 }
  0x7e   :  { %2460 = vmatpush1.bf16.msra.mxu0 %v2459_v40  ;;  %v516_v40 = vld [vmem:[#allocation7 + $0x3c8] sm:$0xff] }
  0x7f   :  { %2461 = vmatprep.subr.bf16.mxu0 %v2757_v0  ;;  %v2498_v44 = vpack.c.bf16 %v516_v40, %v508_v39  ;;  %v2502_v39 = vpack.c.bf16 %v406_v38, %v398_v37  ;;  %v399_v40 = vld [vmem:[#allocation7 + $0x20] sm:$0xff] }
  0x81   :  { %2605 = vmatprep.subr.bf16.mxu1 %v2498_v44 }
  0x82   :  { %2463 = vmatpush1.bf16.msra.mxu0 %v2462_v43  ;;  %v89_v43 = vld [vmem:[#allocation2 + $0x78] sm:$0xff] }
  0x83   :  { %2464 = vmatprep.subr.bf16.mxu0 %v2757_v0 }
  0x86   :  { %2466 = vmatpush1.bf16.msra.mxu0 %v2465_v46  ;;  %v515_v46 = vld [vmem:[#allocation7 + $0x3c0] sm:$0xff] }
  0x87   :  { %2467 = vmatprep.subr.bf16.mxu0 %v2757_v0  ;;  %v76_v0 = vld [vmem:[#allocation2 + $0x10] sm:$0xff]  ;;  %v2500_v48 = vpack.c.bf16 %v515_v46, %v507_v45  ;;  %v415_v46 = vld [vmem:[#allocation7 + $0xa0] sm:$0xff] }
  0x89   :  { %2613 = vmatpush1.bf16.msra.mxu1 %v2500_v48 }
  0x8a   :  { %2469 = vmatpush1.bf16.msra.mxu0 %v2468_v49  ;;  %v91_v49 = vld [vmem:[#allocation2 + $0x88] sm:$0xff]  ;;  %2503 = vmatprep.subr.bf16.mxu1 %v2502_v39 }
  0x8b   :  { %2471 = vmatprep.subr.bf16.mxu0 %v2470_v54  ;;  %v94_v54 = vld [vmem:[#allocation2 + $0xa0] sm:$0xff] }
  0x8d   :  { %235 = vmatmul.mubr.f32.vlgmr.msra.gmra.mrb[0].mxu0 %v74_v50  ;;  %v90_v50 = vld [vmem:[#allocation2 + $0x80] sm:$0xff] }
  0x8e   :  { %239 = vmatprep.mubr.f32.mxu0 %v77_v58  ;;  %2473 = vmatpush1.bf16.msra.mxu0 %v2472_v59  ;;  %v98_v58 = vld [vmem:[#allocation2 + $0xc0] sm:$0xff]  ;;  %v101_v59 = vld [vmem:[#allocation2 + $0xd8] sm:$0xff] }
  0x8f   :  { %2475 = vmatprep.subr.bf16.mxu0 %v2474_v60  ;;  %v100_v60 = vld [vmem:[#allocation2 + $0xd0] sm:$0xff] }
  0x91   :  { %240 = vmatmul.mubr.f32.gmra.mrb[2].mxu0 %v76_v0  ;;  %v107_v0 = vld [vmem:[#allocation2 + $0x108] sm:$0xff] }
  0x92   :  { %244 = vmatprep.mubr.f32.mxu0 %v79_v3  ;;  %2477 = vmatpush1.bf16.msra.mxu0 %v2476_v2  ;;  %v106_v2 = vld [vmem:[#allocation2 + $0x100] sm:$0xff]  ;;  %v109_v3 = vld [vmem:[#allocation2 + $0x118] sm:$0xff] }
  0x93   :  { %2479 = vmatprep.subr.bf16.mxu0 %v2478_v4  ;;  %v108_v4 = vld [vmem:[#allocation2 + $0x110] sm:$0xff] }
  0x95   :  { %245 = vmatmul.mubr.f32.gmra.mrb[4].mxu0 %v78_v9  ;;  %v115_v9 = vld [vmem:[#allocation2 + $0x148] sm:$0xff] }
  0x96   :  { %249 = vmatprep.mubr.f32.mxu0 %v81_v11  ;;  %2481 = vmatpush1.bf16.msra.mxu0 %v2480_v10  ;;  %v114_v10 = vld [vmem:[#allocation2 + $0x140] sm:$0xff]  ;;  %v117_v11 = vld [vmem:[#allocation2 + $0x158] sm:$0xff] }
  0x97   :  { %2483 = vmatprep.subr.bf16.mxu0 %v2482_v12  ;;  %v116_v12 = vld [vmem:[#allocation2 + $0x150] sm:$0xff] }
  0x99   :  { %250 = vmatmul.mubr.f32.gmra.mrb[6].mxu0 %v80_v17  ;;  %v120_v17 = vld [vmem:[#allocation2 + $0x170] sm:$0xff] }
  0x9a   :  { %254 = vmatprep.mubr.f32.mxu0 %v83_v19  ;;  %2485 = vmatpush1.bf16.msra.mxu0 %v2484_v18  ;;  %v123_v18 = vld [vmem:[#allocation2 + $0x188] sm:$0xff]  ;;  %v122_v19 = vld [vmem:[#allocation2 + $0x180] sm:$0xff] }
  0x9b   :  { %2487 = vmatprep.subr.bf16.mxu0 %v2486_v20  ;;  %v125_v20 = vld [vmem:[#allocation2 + $0x198] sm:$0xff] }
  0x9d   :  { %255 = vmatmul.mubr.f32.gmra.mrb[8].mxu0 %v82_v25  ;;  %v2534_v25 = vpack.c.bf16 %v408_v23, %v400_v22  ;;  %v495_v23 = vld [vmem:[#allocation7 + $0x320] sm:$0xff] }
  0x9e   :  { %259 = vmatprep.mubr.f32.mxu0 %v85_v27  ;;  %2489 = vmatpush1.bf16.msra.mxu0 %v2488_v26  ;;  %v126_v26 = vld [vmem:[#allocation2 + $0x1a0] sm:$0xff]  ;;  %v129_v27 = vld [vmem:[#allocation2 + $0x1b8] sm:$0xff] }
  0x9f   :  { %2491 = vmatprep.subr.bf16.mxu0 %v2490_v28  ;;  %v128_v28 = vld [vmem:[#allocation2 + $0x1b0] sm:$0xff] }
  0xa1   :  { %260 = vmatmul.mubr.f32.gmra.mrb[10].mxu0 %v84_v33  ;;  %v135_v33 = vld [vmem:[#allocation2 + $0x1e8] sm:$0xff] }
  0xa2   :  { %264 = vmatprep.mubr.f32.mxu0 %v87_v35  ;;  %2493 = vmatpush1.bf16.msra.mxu0 %v2492_v34  ;;  %v134_v34 = vld [vmem:[#allocation2 + $0x1e0] sm:$0xff]  ;;  %v137_v35 = vld [vmem:[#allocation2 + $0x1f8] sm:$0xff] }
  0xa3   :  { %2495 = vmatprep.subr.bf16.mxu0 %v2494_v36  ;;  %v136_v36 = vld [vmem:[#allocation2 + $0x1f0] sm:$0xff] }
  0xa5   :  { %265 = vmatmul.mubr.f32.gmra.mrb[12].mxu0 %v86_v41  ;;  %v407_v41 = vld [vmem:[#allocation7 + $0x60] sm:$0xff] }
  0xa6   :  { %269 = vmatprep.mubr.f32.mxu0 %v89_v43  ;;  %2497 = vmatpush1.bf16.msra.mxu0 %v2496_v42  ;;  %v416_v42 = vld [vmem:[#allocation7 + $0xa8] sm:$0xff] }
  0xa7   :  { %2499 = vmatprep.subr.bf16.mxu0 %v2498_v44  ;;  %v424_v43 = vld [vmem:[#allocation7 + $0xe8] sm:$0xff]  ;;  %v2536_v44 = vpack.c.bf16 %v407_v41, %v399_v40 }
  0xa8   :  { %v2538_v45 = vpack.c.bf16 %v424_v43, %v416_v42 }
  0xa9   :  { %270 = vmatmul.mubr.f32.gmra.mrb[14].mxu0 %v88_v47  ;;  %v423_v47 = vld [vmem:[#allocation7 + $0xe0] sm:$0xff] }
  0xaa   :  { %274 = vmatprep.mubr.f32.mxu0 %v91_v49  ;;  %2501 = vmatpush1.bf16.msra.mxu0 %v2500_v48  ;;  %v432_v49 = vld [vmem:[#allocation7 + $0x128] sm:$0xff] }
  0xab   :  { %2535 = vmatprep.subr.bf16.mxu0 %v2534_v25 }
  0xad   :  { %275 = vmatmul.mubr.f32.gmra.mrb[16].mxu0 %v90_v50  ;;  %v440_v50 = vld [vmem:[#allocation7 + $0x168] sm:$0xff] }
  0xae   :  { %279 = vmatprep.mubr.f32.mxu0 %v93_v51 }
  0xb1   :  { %280 = vmatmul.mubr.f32.gmra.mrb[18].mxu0 %v92_v52  ;;  %v2540_v52 = vpack.c.bf16 %v423_v47, %v415_v46  ;;  %v414_v47 = vld [vmem:[#allocation7 + $0x98] sm:$0xff] }
  0xb2   :  { %284 = vmatprep.mubr.f32.mxu0 %v95_v53  ;;  %v2542_v53 = vpack.c.bf16 %v440_v50, %v432_v49  ;;  %v422_v49 = vld [vmem:[#allocation7 + $0xd8] sm:$0xff] }
  0xb5   :  { %285 = vmatmul.mubr.f32.gmra.mrb[20].mxu0 %v94_v54  ;;  %v431_v54 = vld [vmem:[#allocation7 + $0x120] sm:$0xff] }
  0xb6   :  { %289 = vmatprep.mubr.f32.mxu0 %v97_v55  ;;  %v439_v55 = vld [vmem:[#allocation7 + $0x160] sm:$0xff] }
  0xb9   :  { %290 = vmatmul.mubr.f32.gmra.mrb[22].mxu0 %v96_v56 }
  0xba   :  { %294 = vmatprep.mubr.f32.mxu0 %v99_v57  ;;  %v448_v57 = vld [vmem:[#allocation7 + $0x1a8] sm:$0xff] }
  0xbd   :  { %295 = vmatmul.mubr.f32.gmra.mrb[24].mxu0 %v98_v58  ;;  %v456_v58 = vld [vmem:[#allocation7 + $0x1e8] sm:$0xff] }
  0xbe   :  { %299 = vmatprep.mubr.f32.mxu0 %v101_v59 }
  0xc1   :  { %300 = vmatmul.mubr.f32.gmra.mrb[26].mxu0 %v100_v60  ;;  %v2544_v60 = vpack.c.bf16 %v439_v55, %v431_v54  ;;  %v413_v54 = vld [vmem:[#allocation7 + $0x90] sm:$0xff] }
  0xc2   :  { %304 = vmatprep.mubr.f32.mxu0 %v103_v61  ;;  %v2546_v61 = vpack.c.bf16 %v456_v58, %v448_v57  ;;  %v421_v55 = vld [vmem:[#allocation7 + $0xd0] sm:$0xff]  ;;  %v430_v58 = vld [vmem:[#allocation7 + $0x118] sm:$0xff] }
  0xc5   :  { %305 = vmatmul.mubr.f32.gmra.mrb[28].mxu0 %v102_v62  ;;  %v447_v62 = vld [vmem:[#allocation7 + $0x1a0] sm:$0xff] }
  0xc6   :  { %309 = vmatprep.mubr.f32.mxu0 %v105_v63  ;;  %v455_v63 = vld [vmem:[#allocation7 + $0x1e0] sm:$0xff] }
  0xc9   :  { %310 = vmatmul.mubr.f32.gmra.mrb[30].mxu0 %v104_v1 }
  0xca   :  { %314 = vmatprep.mubr.f32.mxu0 %v107_v0  ;;  %v464_v0 = vld [vmem:[#allocation7 + $0x228] sm:$0xff] }
  0xcd   :  { %315 = vmatmul.mubr.f32.gmra.mrb[32].mxu0 %v106_v2  ;;  %v472_v2 = vld [vmem:[#allocation7 + $0x268] sm:$0xff] }
  0xce   :  { %319 = vmatprep.mubr.f32.mxu0 %v109_v3 }
  0xd1   :  { %320 = vmatmul.mubr.f32.gmra.mrb[34].mxu0 %v108_v4  ;;  %v2548_v4 = vpack.c.bf16 %v455_v63, %v447_v62  ;;  %v429_v63 = vld [vmem:[#allocation7 + $0x110] sm:$0xff] }
  0xd2   :  { %324 = vmatprep.mubr.f32.mxu0 %v111_v5  ;;  %v2550_v5 = vpack.c.bf16 %v472_v2, %v464_v0  ;;  %v437_v0 = vld [vmem:[#allocation7 + $0x150] sm:$0xff] }
  0xd5   :  { %325 = vmatmul.mubr.f32.gmra.mrb[36].mxu0 %v110_v6  ;;  %v463_v6 = vld [vmem:[#allocation7 + $0x220] sm:$0xff] }
  0xd6   :  { %329 = vmatprep.mubr.f32.mxu0 %v113_v7  ;;  %v471_v7 = vld [vmem:[#allocation7 + $0x260] sm:$0xff] }
  0xd9   :  { %330 = vmatmul.mubr.f32.gmra.mrb[38].mxu0 %v112_v8 }
  0xda   :  { %334 = vmatprep.mubr.f32.mxu0 %v115_v9  ;;  %v480_v9 = vld [vmem:[#allocation7 + $0x2a8] sm:$0xff] }
  0xdd   :  { %335 = vmatmul.mubr.f32.gmra.mrb[40].mxu0 %v114_v10  ;;  %v488_v10 = vld [vmem:[#allocation7 + $0x2e8] sm:$0xff] }
  0xde   :  { %339 = vmatprep.mubr.f32.mxu0 %v117_v11 }
  0xe1   :  { %340 = vmatmul.mubr.f32.gmra.mrb[42].mxu0 %v116_v12  ;;  %v2552_v12 = vpack.c.bf16 %v471_v7, %v463_v6 }
  0xe2   :  { %344 = vmatprep.mubr.f32.mxu0 %v119_v13  ;;  %v2554_v13 = vpack.c.bf16 %v488_v10, %v480_v9  ;;  %v445_v9 = vld [vmem:[#allocation7 + $0x190] sm:$0xff] }
  0xe3   :  { %v453_v10 = vld [vmem:[#allocation7 + $0x1d0] sm:$0xff] }
  0xe5   :  { %345 = vmatmul.mubr.f32.gmra.mrb[44].mxu0 %v118_v15  ;;  %v479_v15 = vld [vmem:[#allocation7 + $0x2a0] sm:$0xff] }
  0xe6   :  { %349 = vmatprep.mubr.f32.mxu0 %v121_v16  ;;  %v487_v16 = vld [vmem:[#allocation7 + $0x2e0] sm:$0xff] }
  0xe9   :  { %350 = vmatmul.mubr.f32.gmra.mrb[46].mxu0 %v120_v17 }
  0xea   :  { %354 = vmatprep.mubr.f32.mxu0 %v123_v18  ;;  %v496_v18 = vld [vmem:[#allocation7 + $0x328] sm:$0xff] }
  0xed   :  { %355 = vmatmul.mubr.f32.gmra.mrb[48].mxu0 %v122_v19  ;;  %v504_v19 = vld [vmem:[#allocation7 + $0x368] sm:$0xff] }
  0xee   :  { %359 = vmatprep.mubr.f32.mxu0 %v125_v20  ;;  %v2558_v22 = vpack.c.bf16 %v504_v19, %v496_v18  ;;  %v461_v19 = vld [vmem:[#allocation7 + $0x210] sm:$0xff] }
  0xf1   :  { %360 = vmatmul.mubr.f32.gmra.mrb[50].mxu0 %v124_v21  ;;  %v2556_v21 = vpack.c.bf16 %v487_v16, %v479_v15  ;;  %v2516_v15 = vpack.c.bf16 %v453_v10, %v445_v9 }
  0xf2   :  { %364 = vmatprep.mubr.f32.mxu0 %v127_v24  ;;  %v503_v24 = vld [vmem:[#allocation7 + $0x360] sm:$0xff] }
  0xf5   :  { %365 = vmatmul.mubr.f32.gmra.mrb[52].mxu0 %v126_v26  ;;  %v512_v26 = vld [vmem:[#allocation7 + $0x3a8] sm:$0xff] }
  0xf6   :  { %369 = vmatprep.mubr.f32.mxu0 %v129_v27  ;;  %v520_v27 = vld [vmem:[#allocation7 + $0x3e8] sm:$0xff] }
  0xf9   :  { %370 = vmatmul.mubr.f32.gmra.mrb[54].mxu0 %v128_v28 }
  0xfa   :  { %374 = vmatprep.mubr.f32.mxu0 %v131_v29  ;;  %v2560_v29 = vpack.c.bf16 %v503_v24, %v495_v23  ;;  %v486_v23 = vld [vmem:[#allocation7 + $0x2d8] sm:$0xff] }
  0xfd   :  { %375 = vmatmul.mubr.f32.gmra.mrb[56].mxu0 %v130_v30  ;;  %v2562_v30 = vpack.c.bf16 %v520_v27, %v512_v26 }
  0xfe   :  { %379 = vmatprep.mubr.f32.mxu0 %v133_v31  ;;  %v511_v31 = vld [vmem:[#allocation7 + $0x3a0] sm:$0xff] }
 0x101   :  { %380 = vmatmul.mubr.f32.gmra.mrb[58].mxu0 %v132_v32  ;;  %v519_v32 = vld [vmem:[#allocation7 + $0x3e0] sm:$0xff] }
 0x102   :  { %384 = vmatprep.mubr.f32.mxu0 %v135_v33 }
 0x105   :  { %385 = vmatmul.mubr.f32.gmra.mrb[60].mxu0 %v134_v34 }
 0x106   :  { %389 = vmatprep.mubr.f32.mxu0 %v137_v35  ;;  %v2564_v35 = vpack.c.bf16 %v519_v32, %v511_v31  ;;  %v494_v31 = vld [vmem:[#allocation7 + $0x318] sm:$0xff] }
 0x107   :  { %v502_v32 = vld [vmem:[#allocation7 + $0x358] sm:$0xff] }
 0x109   :  { %390 = vmatmul.mubr.f32.gmra.mrb[62].mxu0 %v136_v36 }
 0x10a   :  { %587 = vmatprep.mubr.f32.mxu0 %v2758_v14 }
 0x160   :  { %v2859_v48 = vpop.f32.mrb[0].mxu0 }
 0x161   :  { %v238_v51 = vpop.f32.mrb[1].mxu0  ;;  %588 = vmatmul.mubr.f32.vlgmr.msra.gmra.mrb[64].mxu0 %v2859_v48 }
 0x162   :  { %593 = vmatprep.mubr.f32.mxu0 %v2758_v14  ;;  %2537 = vmatpush1.bf16.msra.mxu0 %v2536_v44  ;;  %v397_v44 = vld [vmem:[#allocation7 + $0x10] sm:$0xff] }
 0x163   :  { %2539 = vmatprep.subr.bf16.mxu0 %v2538_v45  ;;  %v405_v45 = vld [vmem:[#allocation7 + $0x50] sm:$0xff] }
 0x164   :  { %v2863_v56 = vpop.f32.mrb[2].mxu0  ;;  %v2504_v51 = vpack.c.bf16 %v405_v45, %v397_v44  ;;  %v510_v44 = vld [vmem:[#allocation7 + $0x398] sm:$0xff] }
 0x165   :  { %v243_v59 = vpop.f32.mrb[3].mxu0  ;;  %594 = vmatmul.mubr.f32.gmra.mrb[66].mxu0 %v2863_v56  ;;  %v518_v45 = vld [vmem:[#allocation7 + $0x3d8] sm:$0xff] }
 0x166   :  { %599 = vmatprep.mubr.f32.mxu0 %v2758_v14  ;;  %2541 = vmatpush1.bf16.msra.mxu0 %v2540_v52  ;;  %v2506_v52 = vpack.c.bf16 %v422_v49, %v414_v47  ;;  %v438_v59 = vld [vmem:[#allocation7 + $0x158] sm:$0xff] }
 0x167   :  { %2543 = vmatprep.subr.bf16.mxu0 %v2542_v53  ;;  %v2510_v62 = vpack.c.bf16 %v438_v59, %v430_v58 }
 0x168   :  { %v2867_v1 = vpop.f32.mrb[4].mxu0 }
 0x169   :  { %v248_v3 = vpop.f32.mrb[5].mxu0  ;;  %600 = vmatmul.mubr.f32.gmra.mrb[68].mxu0 %v2867_v1 }
 0x16a   :  { %605 = vmatprep.mubr.f32.mxu0 %v2758_v14  ;;  %2545 = vmatpush1.bf16.msra.mxu0 %v2544_v60  ;;  %v2508_v60 = vpack.c.bf16 %v421_v55, %v413_v54  ;;  %v446_v3 = vld [vmem:[#allocation7 + $0x198] sm:$0xff] }
 0x16b   :  { %2547 = vmatprep.subr.bf16.mxu0 %v2546_v61  ;;  %v402_v55 = vld [vmem:[#allocation7 + $0x38] sm:$0xff] }
 0x16c   :  { %v2871_v8 = vpop.f32.mrb[6].mxu0 }
 0x16d   :  { %v253_v11 = vpop.f32.mrb[7].mxu0  ;;  %606 = vmatmul.mubr.f32.gmra.mrb[70].mxu0 %v2871_v8 }
 0x16e   :  { %611 = vmatprep.mubr.f32.mxu0 %v2758_v14  ;;  %2549 = vmatpush1.bf16.msra.mxu0 %v2548_v4  ;;  %v454_v4 = vld [vmem:[#allocation7 + $0x1d8] sm:$0xff] }
 0x16f   :  { %2551 = vmatprep.subr.bf16.mxu0 %v2550_v5  ;;  %v2512_v5 = vpack.c.bf16 %v437_v0, %v429_v63  ;;  %v2514_v7 = vpack.c.bf16 %v454_v4, %v446_v3 }
 0x170   :  { %v2875_v17 = vpop.f32.mrb[8].mxu0 }
 0x171   :  { %v258_v20 = vpop.f32.mrb[9].mxu0  ;;  %612 = vmatmul.mubr.f32.gmra.mrb[72].mxu0 %v2875_v17 }
 0x172   :  { %617 = vmatprep.mubr.f32.mxu0 %v2758_v14  ;;  %2553 = vmatpush1.bf16.msra.mxu0 %v2552_v12  ;;  %v462_v12 = vld [vmem:[#allocation7 + $0x218] sm:$0xff]  ;;  %v469_v20 = vld [vmem:[#allocation7 + $0x250] sm:$0xff] }
 0x173   :  { %2555 = vmatprep.subr.bf16.mxu0 %v2554_v13  ;;  %v470_v13 = vld [vmem:[#allocation7 + $0x258] sm:$0xff]  ;;  %v2520_v24 = vpack.c.bf16 %v469_v20, %v461_v19 }
 0x174   :  { %v2879_v25 = vpop.f32.mrb[10].mxu0  ;;  %v2518_v18 = vpack.c.bf16 %v470_v13, %v462_v12 }
 0x175   :  { %v263_v28 = vpop.f32.mrb[11].mxu0  ;;  %618 = vmatmul.mubr.f32.gmra.mrb[74].mxu0 %v2879_v25 }
 0x176   :  { %623 = vmatprep.mubr.f32.mxu0 %v2758_v14  ;;  %2557 = vmatpush1.bf16.msra.mxu0 %v2556_v21  ;;  %v477_v28 = vld [vmem:[#allocation7 + $0x290] sm:$0xff] }
 0x177   :  { %2559 = vmatprep.subr.bf16.mxu0 %v2558_v22  ;;  %v478_v22 = vld [vmem:[#allocation7 + $0x298] sm:$0xff] }
 0x178   :  { %v2883_v33 = vpop.f32.mrb[12].mxu0  ;;  %v2522_v27 = vpack.c.bf16 %v486_v23, %v478_v22 }
 0x179   :  { %v268_v34 = vpop.f32.mrb[13].mxu0  ;;  %624 = vmatmul.mubr.f32.gmra.mrb[76].mxu0 %v2883_v33 }
 0x17a   :  { %629 = vmatprep.mubr.f32.mxu0 %v2758_v14  ;;  %2561 = vmatpush1.bf16.msra.mxu0 %v2560_v29  ;;  %v485_v29 = vld [vmem:[#allocation7 + $0x2d0] sm:$0xff] }
 0x17b   :  { %2563 = vmatprep.subr.bf16.mxu0 %v2562_v30  ;;  %v2524_v34 = vpack.c.bf16 %v485_v29, %v477_v28  ;;  %v401_v29 = vld [vmem:[#allocation7 + $0x30] sm:$0xff] }
 0x17c   :  { %v2887_v36 = vpop.f32.mrb[14].mxu0 }
 0x17d   :  { %v273_v37 = vpop.f32.mrb[15].mxu0  ;;  %630 = vmatmul.mubr.f32.gmra.mrb[78].mxu0 %v2887_v36 }
 0x17e   :  { %635 = vmatprep.mubr.f32.mxu0 %v2758_v14  ;;  %2565 = vmatpush1.bf16.msra.mxu0 %v2564_v35  ;;  %v2526_v37 = vpack.c.bf16 %v502_v32, %v494_v31  ;;  %v418_v32 = vld [vmem:[#allocation7 + $0xb8] sm:$0xff] }
 0x180   :  { %v2891_v38 = vpop.f32.mrb[16].mxu0 }
 0x181   :  { %v278_v39 = vpop.f32.mrb[17].mxu0  ;;  %636 = vmatmul.mubr.f32.gmra.mrb[80].mxu0 %v2891_v38 }
 0x182   :  { %641 = vmatprep.mubr.f32.mxu0 %v2758_v14  ;;  %v493_v39 = vld [vmem:[#allocation7 + $0x310] sm:$0xff] }
 0x184   :  { %v2895_v40 = vpop.f32.mrb[18].mxu0 }
 0x185   :  { %v283_v41 = vpop.f32.mrb[19].mxu0  ;;  %642 = vmatmul.mubr.f32.gmra.mrb[82].mxu0 %v2895_v40 }
 0x186   :  { %647 = vmatprep.mubr.f32.mxu0 %v2758_v14  ;;  %v501_v41 = vld [vmem:[#allocation7 + $0x350] sm:$0xff] }
 0x187   :  { %v2528_v47 = vpack.c.bf16 %v501_v41, %v493_v39 }
 0x188   :  { %v2899_v42 = vpop.f32.mrb[20].mxu0 }
 0x189   :  { %v288_v43 = vpop.f32.mrb[21].mxu0  ;;  %648 = vmatmul.mubr.f32.gmra.mrb[84].mxu0 %v2899_v42 }
 0x18a   :  { %653 = vmatprep.mubr.f32.mxu0 %v2758_v14 }
 0x18c   :  { %v2903_v46 = vpop.f32.mrb[22].mxu0 }
 0x18d   :  { %v293_v50 = vpop.f32.mrb[23].mxu0  ;;  %654 = vmatmul.mubr.f32.gmra.mrb[86].mxu0 %v2903_v46 }
 0x18e   :  { %1101 = vmatprep.mubr.f32.mxu0 %v2758_v14  ;;  %v2530_v50 = vpack.c.bf16 %v518_v45, %v510_v44  ;;  %v425_v44 = vld [vmem:[#allocation7 + $0xf0] sm:$0xff]  ;;  %v434_v45 = vld [vmem:[#allocation7 + $0x138] sm:$0xff] }
 0x190   :  { %v2907_v53 = vpop.f32.mrb[24].mxu0 }
 0x191   :  { %v298_v57 = vpop.f32.mrb[25].mxu0  ;;  %660 = vmatmul.mubr.f32.vlgmr.msra.gmra.mrb[0].mxu1 %v2907_v53  ;;  %1102 = vmatmul.mubr.f32.vlgmr.msra.gmra.mrb[88].mxu0 %v2859_v48 }
 0x192   :  { %2505 = vmatpush1.bf16.msra.mxu1 %v2504_v51  ;;  %665 = vmatprep.mubr.f32.mxu1 %v2758_v14  ;;  %v509_v51 = vld [vmem:[#allocation7 + $0x390] sm:$0xff]  ;;  %v410_v57 = vld [vmem:[#allocation7 + $0x78] sm:$0xff] }
 0x193   :  { %1107 = vmatprep.mubr.f32.mxu0 %v2758_v14  ;;  %2507 = vmatprep.subr.bf16.mxu1 %v2506_v52  ;;  %v517_v52 = vld [vmem:[#allocation7 + $0x3d0] sm:$0xff] }
 0x194   :  { %v2913_v61 = vpop.f32.mrb[26].mxu0  ;;  %v2532_v58 = vpack.c.bf16 %v517_v52, %v509_v51  ;;  %v433_v52 = vld [vmem:[#allocation7 + $0x130] sm:$0xff] }
 0x195   :  { %v303_v2 = vpop.f32.mrb[27].mxu0  ;;  %666 = vmatmul.mubr.f32.gmra.mrb[2].mxu1 %v2913_v61  ;;  %1108 = vmatmul.mubr.f32.gmra.mrb[90].mxu0 %v2863_v56 }
 0x196   :  { %671 = vmatprep.mubr.f32.mxu1 %v2758_v14  ;;  %1113 = vmatprep.mubr.f32.mxu0 %v2758_v14 }
 0x197   :  { %2509 = vmatpush1.bf16.msra.mxu1 %v2508_v60  ;;  %v2566_v60 = vpack.c.bf16 %v410_v57, %v402_v55  ;;  %v450_v55 = vld [vmem:[#allocation7 + $0x1b8] sm:$0xff] }
 0x198   :  { %v2919_v6 = vpop.f32.mrb[28].mxu0  ;;  %2511 = vmatprep.subr.bf16.mxu1 %v2510_v62  ;;  %v458_v57 = vld [vmem:[#allocation7 + $0x1f8] sm:$0xff] }
 0x199   :  { %v308_v11 = vpop.f32.mrb[29].mxu0  ;;  %672 = vmatmul.mubr.f32.gmra.mrb[4].mxu1 %v2919_v6  ;;  %1114 = vmatmul.mubr.f32.gmra.mrb[92].mxu0 %v2867_v1 }
 0x19a   :  { %677 = vmatprep.mubr.f32.mxu1 %v2758_v14  ;;  %1119 = vmatprep.mubr.f32.mxu0 %v2758_v14 }
 0x19b   :  { %2513 = vmatpush1.bf16.msra.mxu1 %v2512_v5 }
 0x19c   :  { %v2925_v16 = vpop.f32.mrb[30].mxu0  ;;  %2515 = vmatprep.subr.bf16.mxu1 %v2514_v7 }
 0x19d   :  { %v313_v21 = vpop.f32.mrb[31].mxu0  ;;  %678 = vmatmul.mubr.f32.gmra.mrb[6].mxu1 %v2925_v16  ;;  %1120 = vmatmul.mubr.f32.gmra.mrb[94].mxu0 %v2871_v8 }
 0x19e   :  { %683 = vmatprep.mubr.f32.mxu1 %v2758_v14  ;;  %1125 = vmatprep.mubr.f32.mxu0 %v2758_v14 }
 0x19f   :  { %2517 = vmatpush1.bf16.msra.mxu1 %v2516_v15 }
 0x1a0   :  { %v2931_v26 = vpop.f32.mrb[32].mxu0  ;;  %2519 = vmatprep.subr.bf16.mxu1 %v2518_v18 }
 0x1a1   :  { %v318_v30 = vpop.f32.mrb[33].mxu0  ;;  %684 = vmatmul.mubr.f32.gmra.mrb[8].mxu1 %v2931_v26  ;;  %1126 = vmatmul.mubr.f32.gmra.mrb[96].mxu0 %v2875_v17 }
 0x1a2   :  { %689 = vmatprep.mubr.f32.mxu1 %v2758_v14  ;;  %1131 = vmatprep.mubr.f32.mxu0 %v2758_v14  ;;  %v409_v30 = vld [vmem:[#allocation7 + $0x70] sm:$0xff] }
 0x1a3   :  { %2521 = vmatpush1.bf16.msra.mxu1 %v2520_v24  ;;  %v2568_v39 = vpack.c.bf16 %v409_v30, %v401_v29  ;;  %v481_v29 = vld [vmem:[#allocation7 + $0x2b0] sm:$0xff] }
 0x1a4   :  { %v2937_v35 = vpop.f32.mrb[34].mxu0  ;;  %2523 = vmatprep.subr.bf16.mxu1 %v2522_v27  ;;  %v489_v30 = vld [vmem:[#allocation7 + $0x2f0] sm:$0xff] }
 0x1a5   :  { %v323_v43 = vpop.f32.mrb[35].mxu0  ;;  %690 = vmatmul.mubr.f32.gmra.mrb[10].mxu1 %v2937_v35  ;;  %1132 = vmatmul.mubr.f32.gmra.mrb[98].mxu0 %v2879_v25 }
 0x1a6   :  { %695 = vmatprep.mubr.f32.mxu1 %v2758_v14  ;;  %1137 = vmatprep.mubr.f32.mxu0 %v2758_v14  ;;  %v417_v43 = vld [vmem:[#allocation7 + $0xb0] sm:$0xff] }
 0x1a7   :  { %2525 = vmatpush1.bf16.msra.mxu1 %v2524_v34  ;;  %v426_v34 = vld [vmem:[#allocation7 + $0xf8] sm:$0xff] }
 0x1a8   :  { %v2943_v49 = vpop.f32.mrb[36].mxu0  ;;  %2527 = vmatprep.subr.bf16.mxu1 %v2526_v37  ;;  %v2570_v41 = vpack.c.bf16 %v426_v34, %v418_v32  ;;  %v498_v32 = vld [vmem:[#allocation7 + $0x338] sm:$0xff] }
 0x1a9   :  { %v328_v54 = vpop.f32.mrb[37].mxu0  ;;  %696 = vmatmul.mubr.f32.gmra.mrb[12].mxu1 %v2943_v49  ;;  %1138 = vmatmul.mubr.f32.gmra.mrb[100].mxu0 %v2883_v33  ;;  %v506_v34 = vld [vmem:[#allocation7 + $0x378] sm:$0xff] }
 0x1aa   :  { %701 = vmatprep.mubr.f32.mxu1 %v2758_v14  ;;  %1143 = vmatprep.mubr.f32.mxu0 %v2758_v14  ;;  %v441_v54 = vld [vmem:[#allocation7 + $0x170] sm:$0xff] }
 0x1ab   :  { %2529 = vmatpush1.bf16.msra.mxu1 %v2528_v47  ;;  %v442_v47 = vld [vmem:[#allocation7 + $0x178] sm:$0xff] }
 0x1ac   :  { %v2949_v59 = vpop.f32.mrb[38].mxu0  ;;  %2531 = vmatprep.subr.bf16.mxu1 %v2530_v50  ;;  %v2572_v50 = vpack.c.bf16 %v425_v44, %v417_v43  ;;  %v2574_v51 = vpack.c.bf16 %v442_v47, %v434_v45  ;;  %v505_v43 = vld [vmem:[#allocation7 + $0x370] sm:$0xff]  ;;  %v514_v44 = vld [vmem:[#allocation7 + $0x3b8] sm:$0xff] }
 0x1ad   :  { %v333_v62 = vpop.f32.mrb[39].mxu0  ;;  %702 = vmatmul.mubr.f32.gmra.mrb[14].mxu1 %v2949_v59  ;;  %1144 = vmatmul.mubr.f32.gmra.mrb[102].mxu0 %v2887_v36  ;;  %v522_v45 = vld [vmem:[#allocation7 + $0x3f8] sm:$0xff] }
 0x1ae   :  { %707 = vmatprep.mubr.f32.mxu1 %v2758_v14  ;;  %1149 = vmatprep.mubr.f32.mxu0 %v2758_v14  ;;  %v449_v62 = vld [vmem:[#allocation7 + $0x1b0] sm:$0xff] }
 0x1af   :  { %2533 = vmatpush1.bf16.msra.mxu1 %v2532_v58  ;;  %v2576_v58 = vpack.c.bf16 %v441_v54, %v433_v52  ;;  %v521_v52 = vld [vmem:[#allocation7 + $0x3f0] sm:$0xff] }
 0x1b0   :  { %v2955_v63 = vpop.f32.mrb[40].mxu0  ;;  %2567 = vmatprep.subr.bf16.mxu1 %v2566_v60  ;;  %v2578_v60 = vpack.c.bf16 %v458_v57, %v450_v55  ;;  %v1553_v55 = vlaneseq }
 0x1b1   :  { %v338_v0 = vpop.f32.mrb[41].mxu0  ;;  %708 = vmatmul.mubr.f32.gmra.mrb[16].mxu1 %v2955_v63  ;;  %1150 = vmatmul.mubr.f32.gmra.mrb[104].mxu0 %v2891_v38 }
 0x1b2   :  { %713 = vmatprep.mubr.f32.mxu1 %v2758_v14  ;;  %1155 = vmatprep.mubr.f32.mxu0 %v2758_v14  ;;  %v457_v0 = vld [vmem:[#allocation7 + $0x1f0] sm:$0xff]  ;;  %v3087_v57 = vshrl.u32 %v1553_v55, 7 }
 0x1b4   :  { %v2961_v2 = vpop.f32.mrb[42].mxu0 }
 0x1b5   :  { %v343_v3 = vpop.f32.mrb[43].mxu0  ;;  %714 = vmatmul.mubr.f32.gmra.mrb[18].mxu1 %v2961_v2  ;;  %1156 = vmatmul.mubr.f32.gmra.mrb[106].mxu0 %v2895_v40 }
 0x1b6   :  { %719 = vmatprep.mubr.f32.mxu1 %v2758_v14  ;;  %1161 = vmatprep.mubr.f32.mxu0 %v2758_v14  ;;  %v466_v3 = vld [vmem:[#allocation7 + $0x238] sm:$0xff] }
 0x1b8   :  { %v2967_v4 = vpop.f32.mrb[44].mxu0 }
 0x1b9   :  { %v348_v5 = vpop.f32.mrb[45].mxu0  ;;  %720 = vmatmul.mubr.f32.gmra.mrb[20].mxu1 %v2967_v4  ;;  %1162 = vmatmul.mubr.f32.gmra.mrb[108].mxu0 %v2899_v42 }
 0x1ba   :  { %725 = vmatprep.mubr.f32.mxu1 %v2758_v14  ;;  %1167 = vmatprep.mubr.f32.mxu0 %v2758_v14  ;;  %v474_v5 = vld [vmem:[#allocation7 + $0x278] sm:$0xff] }
 0x1bc   :  { %v2973_v7 = vpop.f32.mrb[46].mxu0 }
 0x1bd   :  { %v353_v9 = vpop.f32.mrb[47].mxu0  ;;  %726 = vmatmul.mubr.f32.gmra.mrb[22].mxu1 %v2973_v7  ;;  %1168 = vmatmul.mubr.f32.gmra.mrb[110].mxu0 %v2903_v46 }
 0x1be   :  { %731 = vmatprep.mubr.f32.mxu1 %v2758_v14  ;;  %1173 = vmatprep.mubr.f32.mxu0 %v2758_v14  ;;  %v2580_v9 = vpack.c.bf16 %v457_v0, %v449_v62  ;;  %v1559_v62 = vsub.s32 1, %v3087_v57  ;;  %v3099_v0 = vld [vmem:[#allocation8] sm:$0xff] }
 0x1c0   :  { %v2979_v10 = vpop.f32.mrb[48].mxu0 }
 0x1c1   :  { %v358_v11 = vpop.f32.mrb[49].mxu0  ;;  %732 = vmatmul.mubr.f32.gmra.mrb[24].mxu1 %v2979_v10  ;;  %1174 = vmatmul.mubr.f32.gmra.mrb[112].mxu0 %v2907_v53 }
 0x1c2   :  { %737 = vmatprep.mubr.f32.mxu1 %v2758_v14  ;;  %1179 = vmatprep.mubr.f32.mxu0 %v2758_v14  ;;  %v2582_v11 = vpack.c.bf16 %v474_v5, %v466_v3 }
 0x1c4   :  { %v2985_v12 = vpop.f32.mrb[50].mxu0 }
 0x1c5   :  { %v363_v13 = vpop.f32.mrb[51].mxu0  ;;  %738 = vmatmul.mubr.f32.gmra.mrb[26].mxu1 %v2985_v12  ;;  %1180 = vmatmul.mubr.f32.gmra.mrb[114].mxu0 %v2913_v61 }
 0x1c6   :  { %743 = vmatprep.mubr.f32.mxu1 %v2758_v14  ;;  %1185 = vmatprep.mubr.f32.mxu0 %v2758_v14  ;;  %v465_v13 = vld [vmem:[#allocation7 + $0x230] sm:$0xff] }
 0x1c8   :  { %v2991_v15 = vpop.f32.mrb[52].mxu0 }
 0x1c9   :  { %v368_v18 = vpop.f32.mrb[53].mxu0  ;;  %744 = vmatmul.mubr.f32.gmra.mrb[28].mxu1 %v2991_v15  ;;  %1186 = vmatmul.mubr.f32.gmra.mrb[116].mxu0 %v2919_v6 }
 0x1ca   :  { %749 = vmatprep.mubr.f32.mxu1 %v2758_v14  ;;  %1191 = vmatprep.mubr.f32.mxu0 %v2758_v14  ;;  %v473_v18 = vld [vmem:[#allocation7 + $0x270] sm:$0xff] }
 0x1cc   :  { %v2997_v19 = vpop.f32.mrb[54].mxu0 }
 0x1cd   :  { %v373_v20 = vpop.f32.mrb[55].mxu0  ;;  %750 = vmatmul.mubr.f32.gmra.mrb[30].mxu1 %v2997_v19  ;;  %1192 = vmatmul.mubr.f32.gmra.mrb[118].mxu0 %v2925_v16 }
 0x1ce   :  { %755 = vmatprep.mubr.f32.mxu1 %v2758_v14  ;;  %1197 = vmatprep.mubr.f32.mxu0 %v2758_v14  ;;  %v482_v20 = vld [vmem:[#allocation7 + $0x2b8] sm:$0xff] }
 0x1d0   :  { %v3003_v21 = vpop.f32.mrb[56].mxu0 }
 0x1d1   :  { %v378_v22 = vpop.f32.mrb[57].mxu0  ;;  %756 = vmatmul.mubr.f32.gmra.mrb[32].mxu1 %v3003_v21  ;;  %1198 = vmatmul.mubr.f32.gmra.mrb[120].mxu0 %v2931_v26 }
 0x1d2   :  { %761 = vmatprep.mubr.f32.mxu1 %v2758_v14  ;;  %1203 = vmatprep.mubr.f32.mxu0 %v2758_v14  ;;  %v490_v22 = vld [vmem:[#allocation7 + $0x2f8] sm:$0xff] }
 0x1d4   :  { %v3009_v23 = vpop.f32.mrb[58].mxu0 }
 0x1d5   :  { %v383_v24 = vpop.f32.mrb[59].mxu0  ;;  %762 = vmatmul.mubr.f32.gmra.mrb[34].mxu1 %v3009_v23  ;;  %1204 = vmatmul.mubr.f32.gmra.mrb[122].mxu0 %v2937_v35 }
 0x1d6   :  { %767 = vmatprep.mubr.f32.mxu1 %v2758_v14  ;;  %1209 = vmatprep.mubr.f32.mxu0 %v2758_v14  ;;  %v2584_v24 = vpack.c.bf16 %v473_v18, %v465_v13  ;;  %v3113_v13 = vrot.slane %v3099_v0, %v1559_v62 }
 0x1d8   :  { %v3015_v27 = vpop.f32.mrb[60].mxu0 }
 0x1d9   :  { %v388_v28 = vpop.f32.mrb[61].mxu0  ;;  %768 = vmatmul.mubr.f32.gmra.mrb[36].mxu1 %v3015_v27  ;;  %1210 = vmatmul.mubr.f32.gmra.mrb[124].mxu0 %v2943_v49 }
 0x1da   :  { %773 = vmatprep.mubr.f32.mxu1 %v2758_v14  ;;  %1215 = vmatprep.mubr.f32.mxu0 %v2758_v14  ;;  %v2586_v28 = vpack.c.bf16 %v490_v22, %v482_v20 }
 0x1dc   :  { %v3021_v31 = vpop.f32.mrb[62].mxu0 }
 0x1dd   :  { %v393_v37 = vpop.f32.mrb[63].mxu0  ;;  %774 = vmatmul.mubr.f32.gmra.mrb[38].mxu1 %v3021_v31  ;;  %1216 = vmatmul.mubr.f32.gmra.mrb[126].mxu0 %v2949_v59 }
 0x1de   :  { %844 = vmatprep.mubr.f32.mxu1 %v2758_v14  ;;  %1221 = vmatprep.mubr.f32.mxu0 %v2758_v14  ;;  %v2588_v37 = vpack.c.bf16 %v489_v30, %v481_v29 }
 0x1e1   :  { %845 = vmatmul.mubr.f32.vlgmr.msra.gmra.mrb[40].mxu1 %v2859_v48  ;;  %1222 = vmatmul.mubr.f32.gmra.mrb[128].mxu0 %v2955_v63 }
 0x1e2   :  { %2569 = vmatpush1.bf16.msra.mxu1 %v2568_v39  ;;  %850 = vmatprep.mubr.f32.mxu1 %v2758_v14  ;;  %v2590_v39 = vpack.c.bf16 %v506_v34, %v498_v32 }
 0x1e3   :  { %1227 = vmatprep.mubr.f32.mxu0 %v2758_v14  ;;  %2571 = vmatprep.subr.bf16.mxu1 %v2570_v41  ;;  %v497_v41 = vld [vmem:[#allocation7 + $0x330] sm:$0xff] }
 0x1e4   :  { %v2592_v47 = vpack.c.bf16 %v505_v43, %v497_v41 }
 0x1e5   :  { %851 = vmatmul.mubr.f32.gmra.mrb[42].mxu1 %v2863_v56  ;;  %1228 = vmatmul.mubr.f32.gmra.mrb[130].mxu0 %v2961_v2 }
 0x1e6   :  { %856 = vmatprep.mubr.f32.mxu1 %v2758_v14  ;;  %1233 = vmatprep.mubr.f32.mxu0 %v2758_v14 }
 0x1e7   :  { %2573 = vmatpush1.bf16.msra.mxu1 %v2572_v50  ;;  %v2594_v50 = vpack.c.bf16 %v522_v45, %v514_v44 }
 0x1e8   :  { %2575 = vmatprep.subr.bf16.mxu1 %v2574_v51  ;;  %v513_v51 = vld [vmem:[#allocation7 + $0x3b0] sm:$0xff] }
 0x1e9   :  { %857 = vmatmul.mubr.f32.gmra.mrb[44].mxu1 %v2867_v1  ;;  %1234 = vmatmul.mubr.f32.gmra.mrb[132].mxu0 %v2967_v4  ;;  %v2596_v54 = vpack.c.bf16 %v521_v52, %v513_v51 }
 0x1ea   :  { %862 = vmatprep.mubr.f32.mxu1 %v2758_v14  ;;  %1239 = vmatprep.mubr.f32.mxu0 %v2758_v14 }
 0x1eb   :  { %2577 = vmatpush1.bf16.msra.mxu1 %v2576_v58  ;;  %v1555_v58 = vsub.s32 0, %v3087_v57 }
 0x1ec   :  { %2579 = vmatprep.subr.bf16.mxu1 %v2578_v60  ;;  %v3096_v60 = vld [vmem:[%s3771_s3] sm:$0xff] }
 0x1ed   :  { %863 = vmatmul.mubr.f32.gmra.mrb[46].mxu1 %v2871_v8  ;;  %1240 = vmatmul.mubr.f32.gmra.mrb[134].mxu0 %v2973_v7  ;;  %v3103_v3 = vrot.slane %v3096_v60, %v1555_v58  ;;  %v3107_v5 = vrot.slane %v3096_v60, %v1559_v62 }
 0x1ee   :  { %868 = vmatprep.mubr.f32.mxu1 %v2758_v14  ;;  %1245 = vmatprep.mubr.f32.mxu0 %v2758_v14 }
 0x1ef   :  { %2581 = vmatpush1.bf16.msra.mxu1 %v2580_v9  ;;  %v3110_v9 = vrot.slane %v3099_v0, %v1555_v58 }
 0x1f0   :  { %2583 = vmatprep.subr.bf16.mxu1 %v2582_v11 }
 0x1f1   :  { %869 = vmatmul.mubr.f32.gmra.mrb[48].mxu1 %v2875_v17  ;;  %1246 = vmatmul.mubr.f32.gmra.mrb[136].mxu0 %v2979_v10 }
 0x1f2   :  { %874 = vmatprep.mubr.f32.mxu1 %v2758_v14  ;;  %1251 = vmatprep.mubr.f32.mxu0 %v2758_v14 }
 0x1f3   :  { %2585 = vmatpush1.bf16.msra.mxu1 %v2584_v24 }
 0x1f4   :  { %2587 = vmatprep.subr.bf16.mxu1 %v2586_v28 }
 0x1f5   :  { %875 = vmatmul.mubr.f32.gmra.mrb[50].mxu1 %v2879_v25  ;;  %1252 = vmatmul.mubr.f32.gmra.mrb[138].mxu0 %v2985_v12 }
 0x1f6   :  { %880 = vmatprep.mubr.f32.mxu1 %v2758_v14  ;;  %1257 = vmatprep.mubr.f32.mxu0 %v2758_v14 }
 0x1f7   :  { %2589 = vmatpush1.bf16.msra.mxu1 %v2588_v37 }
 0x1f8   :  { %2591 = vmatprep.subr.bf16.mxu1 %v2590_v39 }
 0x1f9   :  { %881 = vmatmul.mubr.f32.gmra.mrb[52].mxu1 %v2883_v33  ;;  %1258 = vmatmul.mubr.f32.gmra.mrb[140].mxu0 %v2991_v15 }
 0x1fa   :  { %886 = vmatprep.mubr.f32.mxu1 %v2758_v14  ;;  %1263 = vmatprep.mubr.f32.mxu0 %v2758_v14 }
 0x1fb   :  { %2593 = vmatpush1.bf16.msra.mxu1 %v2592_v47 }
 0x1fc   :  { %2595 = vmatprep.subr.bf16.mxu1 %v2594_v50 }
 0x1fd   :  { %887 = vmatmul.mubr.f32.gmra.mrb[54].mxu1 %v2887_v36  ;;  %1264 = vmatmul.mubr.f32.gmra.mrb[142].mxu0 %v2997_v19 }
 0x1fe   :  { %892 = vmatprep.mubr.f32.mxu1 %v2758_v14  ;;  %1269 = vmatprep.mubr.f32.mxu0 %v2758_v14 }
 0x1ff   :  { %2597 = vmatpush1.bf16.msra.mxu1 %v2596_v54 }
 0x201   :  { %893 = vmatmul.mubr.f32.gmra.mrb[56].mxu1 %v2891_v38  ;;  %1270 = vmatmul.mubr.f32.gmra.mrb[144].mxu0 %v3003_v21 }
 0x202   :  { %898 = vmatprep.mubr.f32.mxu1 %v2758_v14  ;;  %1275 = vmatprep.mubr.f32.mxu0 %v2758_v14 }
 0x205   :  { %899 = vmatmul.mubr.f32.gmra.mrb[58].mxu1 %v2895_v40  ;;  %1276 = vmatmul.mubr.f32.gmra.mrb[146].mxu0 %v3009_v23 }
 0x206   :  { %904 = vmatprep.mubr.f32.mxu1 %v2758_v14  ;;  %1281 = vmatprep.mubr.f32.mxu0 %v2758_v14 }
 0x209   :  { %905 = vmatmul.mubr.f32.gmra.mrb[60].mxu1 %v2899_v42  ;;  %1282 = vmatmul.mubr.f32.gmra.mrb[148].mxu0 %v3015_v27 }
 0x20a   :  { %910 = vmatprep.mubr.f32.mxu1 %v2758_v14  ;;  %1287 = vmatprep.mubr.f32.mxu0 %v2758_v14 }
 0x20d   :  { %911 = vmatmul.mubr.f32.gmra.mrb[62].mxu1 %v2903_v46  ;;  %1288 = vmatmul.mubr.f32.gmra.mrb[150].mxu0 %v3021_v31 }
 0x20e   :  { %916 = vmatprep.mubr.f32.mxu1 %v2758_v14 }
 0x211   :  { %917 = vmatmul.mubr.f32.gmra.mrb[64].mxu1 %v2907_v53 }
 0x212   :  { %922 = vmatprep.mubr.f32.mxu1 %v2758_v14 }
 0x215   :  { %923 = vmatmul.mubr.f32.gmra.mrb[66].mxu1 %v2913_v61 }
 0x216   :  { %928 = vmatprep.mubr.f32.mxu1 %v2758_v14 }
 0x219   :  { %929 = vmatmul.mubr.f32.gmra.mrb[68].mxu1 %v2919_v6 }
 0x21a   :  { %934 = vmatprep.mubr.f32.mxu1 %v2758_v14 }
 0x21d   :  { %935 = vmatmul.mubr.f32.gmra.mrb[70].mxu1 %v2925_v16 }
 0x21e   :  { %940 = vmatprep.mubr.f32.mxu1 %v2758_v14 }
 0x221   :  { %941 = vmatmul.mubr.f32.gmra.mrb[72].mxu1 %v2931_v26 }
 0x222   :  { %946 = vmatprep.mubr.f32.mxu1 %v2758_v14 }
 0x225   :  { %947 = vmatmul.mubr.f32.gmra.mrb[74].mxu1 %v2937_v35 }
 0x226   :  { %952 = vmatprep.mubr.f32.mxu1 %v2758_v14 }
 0x229   :  { %953 = vmatmul.mubr.f32.gmra.mrb[76].mxu1 %v2943_v49 }
 0x22a   :  { %958 = vmatprep.mubr.f32.mxu1 %v2758_v14 }
 0x22d   :  { %959 = vmatmul.mubr.f32.gmra.mrb[78].mxu1 %v2949_v59 }
 0x22e   :  { %964 = vmatprep.mubr.f32.mxu1 %v2758_v14 }
 0x231   :  { %965 = vmatmul.mubr.f32.gmra.mrb[80].mxu1 %v2955_v63 }
 0x232   :  { %970 = vmatprep.mubr.f32.mxu1 %v2758_v14 }
 0x234   :  { %v589_v11 = vpop.f32.mrb[64].mxu0 }
 0x235   :  { %v1593_v18 = vmul.f32 %v3103_v3, %v589_v11  ;;  %v591_v20 = vpop.f32.mrb[65].mxu0  ;;  %971 = vmatmul.mubr.f32.gmra.mrb[82].mxu1 %v2961_v2 }
 0x236   :  { %v1594_v22 = vmul.f32 %v3107_v5, %v591_v20  ;;  %976 = vmatprep.mubr.f32.mxu1 %v2758_v14 }
 0x237   :  { %v1891_v24 = vadd.f32 %v3110_v9, %v1593_v18 }
 0x238   :  { %v1892_v28 = vadd.f32 %v3113_v13, %v1594_v22  ;;  %v595_v29 = vpop.f32.mrb[66].mxu0 }
 0x239   :  { %2147 = vst [vmem:[#allocation10] sm:$0xff] %v1891_v24  ;;  %v1601_v30 = vmul.f32 %v3103_v3, %v595_v29  ;;  %v597_v32 = vpop.f32.mrb[67].mxu0  ;;  %977 = vmatmul.mubr.f32.gmra.mrb[84].mxu1 %v2967_v4 }
 0x23a   :  { %2148 = vst [vmem:[#allocation10 + $0x8] sm:$0xff] %v1892_v28  ;;  %v1602_v34 = vmul.f32 %v3107_v5, %v597_v32  ;;  %982 = vmatprep.mubr.f32.mxu1 %v2758_v14 }
 0x23b   :  { %v1899_v37 = vadd.f32 %v3110_v9, %v1601_v30 }
 0x23c   :  { %v1900_v39 = vadd.f32 %v3113_v13, %v1602_v34  ;;  %v601_v41 = vpop.f32.mrb[68].mxu0 }
 0x23d   :  { %2155 = vst [vmem:[#allocation10 + $0x40] sm:$0xff] %v1899_v37  ;;  %v1609_v43 = vmul.f32 %v3103_v3, %v601_v41  ;;  %v603_v44 = vpop.f32.mrb[69].mxu0  ;;  %983 = vmatmul.mubr.f32.gmra.mrb[86].mxu1 %v2973_v7 }
 0x23e   :  { %2156 = vst [vmem:[#allocation10 + $0x48] sm:$0xff] %v1900_v39  ;;  %v1610_v45 = vmul.f32 %v3107_v5, %v603_v44  ;;  %988 = vmatprep.mubr.f32.mxu1 %v2758_v14 }
 0x23f   :  { %v1907_v47 = vadd.f32 %v3110_v9, %v1609_v43 }
 0x240   :  { %v1908_v50 = vadd.f32 %v3113_v13, %v1610_v45  ;;  %v607_v51 = vpop.f32.mrb[70].mxu0 }
 0x241   :  { %2163 = vst [vmem:[#allocation10 + $0x80] sm:$0xff] %v1907_v47  ;;  %v1617_v52 = vmul.f32 %v3103_v3, %v607_v51  ;;  %v609_v54 = vpop.f32.mrb[71].mxu0  ;;  %989 = vmatmul.mubr.f32.gmra.mrb[88].mxu1 %v2979_v10 }
 0x242   :  { %2164 = vst [vmem:[#allocation10 + $0x88] sm:$0xff] %v1908_v50  ;;  %v1618_v55 = vmul.f32 %v3107_v5, %v609_v54  ;;  %994 = vmatprep.mubr.f32.mxu1 %v2758_v14 }
 0x243   :  { %v1915_v58 = vadd.f32 %v3110_v9, %v1617_v52 }
 0x244   :  { %v1916_v62 = vadd.f32 %v3113_v13, %v1618_v55  ;;  %v613_v11 = vpop.f32.mrb[72].mxu0 }
 0x245   :  { %2171 = vst [vmem:[#allocation10 + $0xc0] sm:$0xff] %v1915_v58  ;;  %v1625_v18 = vmul.f32 %v3103_v3, %v613_v11  ;;  %v615_v20 = vpop.f32.mrb[73].mxu0  ;;  %995 = vmatmul.mubr.f32.gmra.mrb[90].mxu1 %v2985_v12 }
 0x246   :  { %2172 = vst [vmem:[#allocation10 + $0xc8] sm:$0xff] %v1916_v62  ;;  %v1626_v22 = vmul.f32 %v3107_v5, %v615_v20  ;;  %1000 = vmatprep.mubr.f32.mxu1 %v2758_v14 }
 0x247   :  { %v1923_v24 = vadd.f32 %v3110_v9, %v1625_v18 }
 0x248   :  { %v1924_v28 = vadd.f32 %v3113_v13, %v1626_v22  ;;  %v619_v29 = vpop.f32.mrb[74].mxu0 }
 0x249   :  { %2179 = vst [vmem:[#allocation10 + $0x100] sm:$0xff] %v1923_v24  ;;  %v1633_v30 = vmul.f32 %v3103_v3, %v619_v29  ;;  %v621_v32 = vpop.f32.mrb[75].mxu0  ;;  %1001 = vmatmul.mubr.f32.gmra.mrb[92].mxu1 %v2991_v15 }
 0x24a   :  { %2180 = vst [vmem:[#allocation10 + $0x108] sm:$0xff] %v1924_v28  ;;  %v1634_v34 = vmul.f32 %v3107_v5, %v621_v32  ;;  %1006 = vmatprep.mubr.f32.mxu1 %v2758_v14 }
 0x24b   :  { %v1931_v37 = vadd.f32 %v3110_v9, %v1633_v30 }
 0x24c   :  { %v1932_v39 = vadd.f32 %v3113_v13, %v1634_v34  ;;  %v625_v41 = vpop.f32.mrb[76].mxu0 }
 0x24d   :  { %2187 = vst [vmem:[#allocation10 + $0x140] sm:$0xff] %v1931_v37  ;;  %v1641_v43 = vmul.f32 %v3103_v3, %v625_v41  ;;  %v627_v44 = vpop.f32.mrb[77].mxu0  ;;  %1007 = vmatmul.mubr.f32.gmra.mrb[94].mxu1 %v2997_v19 }
 0x24e   :  { %2188 = vst [vmem:[#allocation10 + $0x148] sm:$0xff] %v1932_v39  ;;  %v1642_v45 = vmul.f32 %v3107_v5, %v627_v44  ;;  %1012 = vmatprep.mubr.f32.mxu1 %v2758_v14 }
 0x24f   :  { %v1939_v47 = vadd.f32 %v3110_v9, %v1641_v43 }
 0x250   :  { %v1940_v50 = vadd.f32 %v3113_v13, %v1642_v45  ;;  %v631_v51 = vpop.f32.mrb[78].mxu0  ;;  %v1571_v45 = vsub.s32 4, %v3087_v57 }
 0x251   :  { %2195 = vst [vmem:[#allocation10 + $0x180] sm:$0xff] %v1939_v47  ;;  %v1649_v52 = vmul.f32 %v3103_v3, %v631_v51  ;;  %v633_v54 = vpop.f32.mrb[79].mxu0  ;;  %1013 = vmatmul.mubr.f32.gmra.mrb[96].mxu1 %v3003_v21 }
 0x252   :  { %2196 = vst [vmem:[#allocation10 + $0x188] sm:$0xff] %v1940_v50  ;;  %v1650_v55 = vmul.f32 %v3107_v5, %v633_v54  ;;  %1018 = vmatprep.mubr.f32.mxu1 %v2758_v14  ;;  %v1575_v50 = vsub.s32 5, %v3087_v57 }
 0x253   :  { %v1947_v58 = vadd.f32 %v3110_v9, %v1649_v52 }
 0x254   :  { %v1948_v62 = vadd.f32 %v3113_v13, %v1650_v55  ;;  %v637_v11 = vpop.f32.mrb[80].mxu0 }
 0x255   :  { %2203 = vst [vmem:[#allocation10 + $0x1c0] sm:$0xff] %v1947_v58  ;;  %v1657_v18 = vmul.f32 %v3103_v3, %v637_v11  ;;  %v639_v20 = vpop.f32.mrb[81].mxu0  ;;  %1019 = vmatmul.mubr.f32.gmra.mrb[98].mxu1 %v3009_v23 }
 0x256   :  { %2204 = vst [vmem:[#allocation10 + $0x1c8] sm:$0xff] %v1948_v62  ;;  %v1658_v22 = vmul.f32 %v3107_v5, %v639_v20  ;;  %1024 = vmatprep.mubr.f32.mxu1 %v2758_v14  ;;  %v3186_v62 = vrot.slane %v3096_v60, %v1571_v45 }
 0x257   :  { %v1955_v24 = vadd.f32 %v3110_v9, %v1657_v18  ;;  %v3191_v18 = vrot.slane %v3096_v60, %v1575_v50 }
 0x258   :  { %v1956_v28 = vadd.f32 %v3113_v13, %v1658_v22  ;;  %v643_v29 = vpop.f32.mrb[82].mxu0  ;;  %v3195_v22 = vrot.slane %v3099_v0, %v1571_v45 }
 0x259   :  { %2211 = vst [vmem:[#allocation10 + $0x200] sm:$0xff] %v1955_v24  ;;  %v1665_v30 = vmul.f32 %v3103_v3, %v643_v29  ;;  %v645_v32 = vpop.f32.mrb[83].mxu0  ;;  %1025 = vmatmul.mubr.f32.gmra.mrb[100].mxu1 %v3015_v27  ;;  %v3199_v29 = vrot.slane %v3099_v0, %v1575_v50 }
 0x25a   :  { %2212 = vst [vmem:[#allocation10 + $0x208] sm:$0xff] %v1956_v28  ;;  %v1666_v34 = vmul.f32 %v3107_v5, %v645_v32  ;;  %1030 = vmatprep.mubr.f32.mxu1 %v2758_v14 }
 0x25b   :  { %v1963_v37 = vadd.f32 %v3110_v9, %v1665_v30 }
 0x25c   :  { %v1964_v39 = vadd.f32 %v3113_v13, %v1666_v34  ;;  %v649_v41 = vpop.f32.mrb[84].mxu0 }
 0x25d   :  { %2219 = vst [vmem:[#allocation10 + $0x240] sm:$0xff] %v1963_v37  ;;  %v1673_v43 = vmul.f32 %v3103_v3, %v649_v41  ;;  %v651_v44 = vpop.f32.mrb[85].mxu0  ;;  %1031 = vmatmul.mubr.f32.gmra.mrb[102].mxu1 %v3021_v31 }
 0x25e   :  { %2220 = vst [vmem:[#allocation10 + $0x248] sm:$0xff] %v1964_v39  ;;  %v1674_v47 = vmul.f32 %v3107_v5, %v651_v44  ;;  %1358 = vmatprep.mubr.f32.mxu1 %v2758_v14 }
 0x25f   :  { %v1971_v51 = vadd.f32 %v3110_v9, %v1673_v43 }
 0x260   :  { %v1972_v52 = vadd.f32 %v3113_v13, %v1674_v47  ;;  %v655_v54 = vpop.f32.mrb[86].mxu0 }
 0x261   :  { %2227 = vst [vmem:[#allocation10 + $0x280] sm:$0xff] %v1971_v51  ;;  %v1681_v55 = vmul.f32 %v3103_v3, %v655_v54  ;;  %v657_v58 = vpop.f32.mrb[87].mxu0  ;;  %1359 = vmatmul.mubr.f32.vlgmr.msra.gmra.mrb[104].mxu1 %v2859_v48 }
 0x262   :  { %2228 = vst [vmem:[#allocation10 + $0x288] sm:$0xff] %v1972_v52  ;;  %v1682_v11 = vmul.f32 %v3107_v5, %v657_v58  ;;  %1364 = vmatprep.mubr.f32.mxu1 %v2758_v14 }
 0x263   :  { %v1979_v20 = vadd.f32 %v3110_v9, %v1681_v55 }
 0x264   :  { %v1980_v24 = vadd.f32 %v3113_v13, %v1682_v11  ;;  %v661_v28 = vpop.f32.mrb[0].mxu1  ;;  %v1103_v48 = vpop.f32.mrb[88].mxu0 }
 0x265   :  { %2235 = vst [vmem:[#allocation10 + $0x2c0] sm:$0xff] %v1979_v20  ;;  %v1689_v30 = vmul.f32 %v3103_v3, %v661_v28  ;;  %v1597_v32 = vmul.f32 %v3186_v62, %v1103_v48  ;;  %v663_v34 = vpop.f32.mrb[1].mxu1  ;;  %v1105_v37 = vpop.f32.mrb[89].mxu0  ;;  %1365 = vmatmul.mubr.f32.gmra.mrb[106].mxu1 %v2863_v56 }
 0x266   :  { %2236 = vst [vmem:[#allocation10 + $0x2c8] sm:$0xff] %v1980_v24  ;;  %v1690_v39 = vmul.f32 %v3107_v5, %v663_v34  ;;  %v1598_v41 = vmul.f32 %v3191_v18, %v1105_v37  ;;  %1370 = vmatprep.mubr.f32.mxu1 %v2758_v14 }
 0x267   :  { %v1987_v43 = vadd.f32 %v3110_v9, %v1689_v30  ;;  %v1895_v44 = vadd.f32 %v3195_v22, %v1597_v32 }
 0x268   :  { %v1988_v45 = vadd.f32 %v3113_v13, %v1690_v39  ;;  %v1896_v47 = vadd.f32 %v3199_v29, %v1598_v41  ;;  %v667_v50 = vpop.f32.mrb[2].mxu1  ;;  %v1109_v51 = vpop.f32.mrb[90].mxu0 }
 0x269   :  { %2243 = vst [vmem:[#allocation10 + $0x300] sm:$0xff] %v1987_v43  ;;  %2151 = vst [vmem:[#allocation10 + $0x20] sm:$0xff] %v1895_v44  ;;  %v1697_v56 = vmul.f32 %v3103_v3, %v667_v50  ;;  %v1605_v52 = vmul.f32 %v3186_v62, %v1109_v51  ;;  %v669_v54 = vpop.f32.mrb[3].mxu1  ;;  %v1111_v55 = vpop.f32.mrb[91].mxu0  ;;  %1371 = vmatmul.mubr.f32.gmra.mrb[108].mxu1 %v2867_v1 }
 0x26a   :  { %2244 = vst [vmem:[#allocation10 + $0x308] sm:$0xff] %v1988_v45  ;;  %2152 = vst [vmem:[#allocation10 + $0x28] sm:$0xff] %v1896_v47  ;;  %v1698_v58 = vmul.f32 %v3107_v5, %v669_v54  ;;  %v1606_v11 = vmul.f32 %v3191_v18, %v1111_v55  ;;  %1376 = vmatprep.mubr.f32.mxu1 %v2758_v14 }
 0x26b   :  { %v1995_v20 = vadd.f32 %v3110_v9, %v1697_v56  ;;  %v1903_v24 = vadd.f32 %v3195_v22, %v1605_v52 }
 0x26c   :  { %v1996_v28 = vadd.f32 %v3113_v13, %v1698_v58  ;;  %v1904_v48 = vadd.f32 %v3199_v29, %v1606_v11  ;;  %v673_v30 = vpop.f32.mrb[4].mxu1  ;;  %v1115_v32 = vpop.f32.mrb[92].mxu0 }
 0x26d   :  { %2251 = vst [vmem:[#allocation10 + $0x340] sm:$0xff] %v1995_v20  ;;  %2159 = vst [vmem:[#allocation10 + $0x60] sm:$0xff] %v1903_v24  ;;  %v1705_v1 = vmul.f32 %v3103_v3, %v673_v30  ;;  %v1613_v34 = vmul.f32 %v3186_v62, %v1115_v32  ;;  %v675_v37 = vpop.f32.mrb[5].mxu1  ;;  %v1117_v39 = vpop.f32.mrb[93].mxu0  ;;  %1377 = vmatmul.mubr.f32.gmra.mrb[110].mxu1 %v2871_v8 }
 0x26e   :  { %2252 = vst [vmem:[#allocation10 + $0x348] sm:$0xff] %v1996_v28  ;;  %2160 = vst [vmem:[#allocation10 + $0x68] sm:$0xff] %v1904_v48  ;;  %v1706_v41 = vmul.f32 %v3107_v5, %v675_v37  ;;  %v1614_v43 = vmul.f32 %v3191_v18, %v1117_v39  ;;  %1382 = vmatprep.mubr.f32.mxu1 %v2758_v14 }
 0x26f   :  { %v2003_v44 = vadd.f32 %v3110_v9, %v1705_v1  ;;  %v1911_v45 = vadd.f32 %v3195_v22, %v1613_v34 }
 0x270   :  { %v2004_v47 = vadd.f32 %v3113_v13, %v1706_v41  ;;  %v1912_v50 = vadd.f32 %v3199_v29, %v1614_v43  ;;  %v679_v51 = vpop.f32.mrb[6].mxu1  ;;  %v1121_v56 = vpop.f32.mrb[94].mxu0 }
 0x271   :  { %2259 = vst [vmem:[#allocation10 + $0x380] sm:$0xff] %v2003_v44  ;;  %2167 = vst [vmem:[#allocation10 + $0xa0] sm:$0xff] %v1911_v45  ;;  %v1713_v8 = vmul.f32 %v3103_v3, %v679_v51  ;;  %v1621_v52 = vmul.f32 %v3186_v62, %v1121_v56  ;;  %v681_v54 = vpop.f32.mrb[7].mxu1  ;;  %v1123_v55 = vpop.f32.mrb[95].mxu0  ;;  %1383 = vmatmul.mubr.f32.gmra.mrb[112].mxu1 %v2875_v17 }
 0x272   :  { %2260 = vst [vmem:[#allocation10 + $0x388] sm:$0xff] %v2004_v47  ;;  %2168 = vst [vmem:[#allocation10 + $0xa8] sm:$0xff] %v1912_v50  ;;  %v1714_v58 = vmul.f32 %v3107_v5, %v681_v54  ;;  %v1622_v11 = vmul.f32 %v3191_v18, %v1123_v55  ;;  %1388 = vmatprep.mubr.f32.mxu1 %v2758_v14 }
 0x273   :  { %v2011_v20 = vadd.f32 %v3110_v9, %v1713_v8  ;;  %v1919_v24 = vadd.f32 %v3195_v22, %v1621_v52 }
 0x274   :  { %v2012_v28 = vadd.f32 %v3113_v13, %v1714_v58  ;;  %v1920_v48 = vadd.f32 %v3199_v29, %v1622_v11  ;;  %v685_v30 = vpop.f32.mrb[8].mxu1  ;;  %v1127_v32 = vpop.f32.mrb[96].mxu0 }
 0x275   :  { %2267 = vst [vmem:[#allocation10 + $0x3c0] sm:$0xff] %v2011_v20  ;;  %2175 = vst [vmem:[#allocation10 + $0xe0] sm:$0xff] %v1919_v24  ;;  %v1721_v17 = vmul.f32 %v3103_v3, %v685_v30  ;;  %v1629_v1 = vmul.f32 %v3186_v62, %v1127_v32  ;;  %v687_v34 = vpop.f32.mrb[9].mxu1  ;;  %v1129_v37 = vpop.f32.mrb[97].mxu0  ;;  %1389 = vmatmul.mubr.f32.gmra.mrb[114].mxu1 %v2879_v25 }
 0x276   :  { %2268 = vst [vmem:[#allocation10 + $0x3c8] sm:$0xff] %v2012_v28  ;;  %2176 = vst [vmem:[#allocation10 + $0xe8] sm:$0xff] %v1920_v48  ;;  %v1722_v39 = vmul.f32 %v3107_v5, %v687_v34  ;;  %v1630_v41 = vmul.f32 %v3191_v18, %v1129_v37  ;;  %1394 = vmatprep.mubr.f32.mxu1 %v2758_v14 }
 0x277   :  { %v2019_v43 = vadd.f32 %v3110_v9, %v1721_v17  ;;  %v1927_v44 = vadd.f32 %v3195_v22, %v1629_v1 }
 0x278   :  { %v2020_v45 = vadd.f32 %v3113_v13, %v1722_v39  ;;  %v1928_v47 = vadd.f32 %v3199_v29, %v1630_v41  ;;  %v691_v50 = vpop.f32.mrb[10].mxu1  ;;  %v1133_v51 = vpop.f32.mrb[98].mxu0 }
 0x279   :  { %2275 = vst [vmem:[#allocation10 + $0x400] sm:$0xff] %v2019_v43  ;;  %2183 = vst [vmem:[#allocation10 + $0x120] sm:$0xff] %v1927_v44  ;;  %v1729_v25 = vmul.f32 %v3103_v3, %v691_v50  ;;  %v1637_v56 = vmul.f32 %v3186_v62, %v1133_v51  ;;  %v693_v8 = vpop.f32.mrb[11].mxu1  ;;  %v1135_v52 = vpop.f32.mrb[99].mxu0  ;;  %1395 = vmatmul.mubr.f32.gmra.mrb[116].mxu1 %v2883_v33 }
 0x27a   :  { %2276 = vst [vmem:[#allocation10 + $0x408] sm:$0xff] %v2020_v45  ;;  %2184 = vst [vmem:[#allocation10 + $0x128] sm:$0xff] %v1928_v47  ;;  %v1730_v54 = vmul.f32 %v3107_v5, %v693_v8  ;;  %v1638_v55 = vmul.f32 %v3191_v18, %v1135_v52  ;;  %1400 = vmatprep.mubr.f32.mxu1 %v2758_v14 }
 0x27b   :  { %v2027_v58 = vadd.f32 %v3110_v9, %v1729_v25  ;;  %v1935_v11 = vadd.f32 %v3195_v22, %v1637_v56 }
 0x27c   :  { %v2028_v20 = vadd.f32 %v3113_v13, %v1730_v54  ;;  %v1936_v24 = vadd.f32 %v3199_v29, %v1638_v55  ;;  %v697_v28 = vpop.f32.mrb[12].mxu1  ;;  %v1139_v48 = vpop.f32.mrb[100].mxu0 }
 0x27d   :  { %2283 = vst [vmem:[#allocation10 + $0x440] sm:$0xff] %v2027_v58  ;;  %2191 = vst [vmem:[#allocation10 + $0x160] sm:$0xff] %v1935_v11  ;;  %v1737_v33 = vmul.f32 %v3103_v3, %v697_v28  ;;  %v1645_v30 = vmul.f32 %v3186_v62, %v1139_v48  ;;  %v699_v32 = vpop.f32.mrb[13].mxu1  ;;  %v1141_v17 = vpop.f32.mrb[101].mxu0  ;;  %1401 = vmatmul.mubr.f32.gmra.mrb[118].mxu1 %v2887_v36 }
 0x27e   :  { %2284 = vst [vmem:[#allocation10 + $0x448] sm:$0xff] %v2028_v20  ;;  %2192 = vst [vmem:[#allocation10 + $0x168] sm:$0xff] %v1936_v24  ;;  %v1738_v1 = vmul.f32 %v3107_v5, %v699_v32  ;;  %v1646_v34 = vmul.f32 %v3191_v18, %v1141_v17  ;;  %1406 = vmatprep.mubr.f32.mxu1 %v2758_v14 }
 0x27f   :  { %v2035_v37 = vadd.f32 %v3110_v9, %v1737_v33  ;;  %v1943_v39 = vadd.f32 %v3195_v22, %v1645_v30 }
 0x280   :  { %v2036_v41 = vadd.f32 %v3113_v13, %v1738_v1  ;;  %v1944_v43 = vadd.f32 %v3199_v29, %v1646_v34  ;;  %v703_v44 = vpop.f32.mrb[14].mxu1  ;;  %v1145_v45 = vpop.f32.mrb[102].mxu0 }
 0x281   :  { %2291 = vst [vmem:[#allocation10 + $0x480] sm:$0xff] %v2035_v37  ;;  %2199 = vst [vmem:[#allocation10 + $0x1a0] sm:$0xff] %v1943_v39  ;;  %v1745_v36 = vmul.f32 %v3103_v3, %v703_v44  ;;  %v1653_v47 = vmul.f32 %v3186_v62, %v1145_v45  ;;  %v705_v50 = vpop.f32.mrb[15].mxu1  ;;  %v1147_v51 = vpop.f32.mrb[103].mxu0  ;;  %1407 = vmatmul.mubr.f32.gmra.mrb[120].mxu1 %v2891_v38 }
 0x282   :  { %2292 = vst [vmem:[#allocation10 + $0x488] sm:$0xff] %v2036_v41  ;;  %2200 = vst [vmem:[#allocation10 + $0x1a8] sm:$0xff] %v1944_v43  ;;  %v1746_v25 = vmul.f32 %v3107_v5, %v705_v50  ;;  %v1654_v56 = vmul.f32 %v3191_v18, %v1147_v51  ;;  %1412 = vmatprep.mubr.f32.mxu1 %v2758_v14 }
 0x283   :  { %v2043_v8 = vadd.f32 %v3110_v9, %v1745_v36  ;;  %v1951_v52 = vadd.f32 %v3195_v22, %v1653_v47 }
 0x284   :  { %v2044_v54 = vadd.f32 %v3113_v13, %v1746_v25  ;;  %v1952_v55 = vadd.f32 %v3199_v29, %v1654_v56  ;;  %v709_v58 = vpop.f32.mrb[16].mxu1  ;;  %v1151_v11 = vpop.f32.mrb[104].mxu0 }
 0x285   :  { %2299 = vst [vmem:[#allocation10 + $0x4c0] sm:$0xff] %v2043_v8  ;;  %2207 = vst [vmem:[#allocation10 + $0x1e0] sm:$0xff] %v1951_v52  ;;  %v1753_v38 = vmul.f32 %v3103_v3, %v709_v58  ;;  %v1661_v20 = vmul.f32 %v3186_v62, %v1151_v11  ;;  %v711_v24 = vpop.f32.mrb[17].mxu1  ;;  %v1153_v28 = vpop.f32.mrb[105].mxu0  ;;  %1413 = vmatmul.mubr.f32.gmra.mrb[122].mxu1 %v2895_v40 }
 0x286   :  { %2300 = vst [vmem:[#allocation10 + $0x4c8] sm:$0xff] %v2044_v54  ;;  %2208 = vst [vmem:[#allocation10 + $0x1e8] sm:$0xff] %v1952_v55  ;;  %v1754_v48 = vmul.f32 %v3107_v5, %v711_v24  ;;  %v1662_v33 = vmul.f32 %v3191_v18, %v1153_v28  ;;  %1418 = vmatprep.mubr.f32.mxu1 %v2758_v14 }
 0x287   :  { %v2051_v30 = vadd.f32 %v3110_v9, %v1753_v38  ;;  %v1959_v32 = vadd.f32 %v3195_v22, %v1661_v20 }
 0x288   :  { %v2052_v17 = vadd.f32 %v3113_v13, %v1754_v48  ;;  %v1960_v1 = vadd.f32 %v3199_v29, %v1662_v33  ;;  %v715_v34 = vpop.f32.mrb[18].mxu1  ;;  %v1157_v37 = vpop.f32.mrb[106].mxu0 }
 0x289   :  { %2307 = vst [vmem:[#allocation10 + $0x500] sm:$0xff] %v2051_v30  ;;  %2215 = vst [vmem:[#allocation10 + $0x220] sm:$0xff] %v1959_v32  ;;  %v1761_v40 = vmul.f32 %v3103_v3, %v715_v34  ;;  %v1669_v39 = vmul.f32 %v3186_v62, %v1157_v37  ;;  %v717_v41 = vpop.f32.mrb[19].mxu1  ;;  %v1159_v43 = vpop.f32.mrb[107].mxu0  ;;  %1419 = vmatmul.mubr.f32.gmra.mrb[124].mxu1 %v2899_v42 }
 0x28a   :  { %2308 = vst [vmem:[#allocation10 + $0x508] sm:$0xff] %v2052_v17  ;;  %2216 = vst [vmem:[#allocation10 + $0x228] sm:$0xff] %v1960_v1  ;;  %v1762_v44 = vmul.f32 %v3107_v5, %v717_v41  ;;  %v1670_v45 = vmul.f32 %v3191_v18, %v1159_v43  ;;  %1424 = vmatprep.mubr.f32.mxu1 %v2758_v14 }
 0x28b   :  { %v2059_v36 = vadd.f32 %v3110_v9, %v1761_v40  ;;  %v1967_v47 = vadd.f32 %v3195_v22, %v1669_v39 }
 0x28c   :  { %v2060_v50 = vadd.f32 %v3113_v13, %v1762_v44  ;;  %v1968_v51 = vadd.f32 %v3199_v29, %v1670_v45  ;;  %v721_v25 = vpop.f32.mrb[20].mxu1  ;;  %v1163_v56 = vpop.f32.mrb[108].mxu0 }
 0x28d   :  { %2315 = vst [vmem:[#allocation10 + $0x540] sm:$0xff] %v2059_v36  ;;  %2223 = vst [vmem:[#allocation10 + $0x260] sm:$0xff] %v1967_v47  ;;  %v1769_v42 = vmul.f32 %v3103_v3, %v721_v25  ;;  %v1677_v8 = vmul.f32 %v3186_v62, %v1163_v56  ;;  %v723_v52 = vpop.f32.mrb[21].mxu1  ;;  %v1165_v54 = vpop.f32.mrb[109].mxu0  ;;  %1425 = vmatmul.mubr.f32.gmra.mrb[126].mxu1 %v2903_v46 }
 0x28e   :  { %2316 = vst [vmem:[#allocation10 + $0x548] sm:$0xff] %v2060_v50  ;;  %2224 = vst [vmem:[#allocation10 + $0x268] sm:$0xff] %v1968_v51  ;;  %v1770_v55 = vmul.f32 %v3107_v5, %v723_v52  ;;  %v1678_v58 = vmul.f32 %v3191_v18, %v1165_v54  ;;  %1430 = vmatprep.mubr.f32.mxu1 %v2758_v14 }
 0x28f   :  { %v2067_v11 = vadd.f32 %v3110_v9, %v1769_v42  ;;  %v1975_v38 = vadd.f32 %v3195_v22, %v1677_v8 }
 0x290   :  { %v2068_v20 = vadd.f32 %v3113_v13, %v1770_v55  ;;  %v1976_v24 = vadd.f32 %v3199_v29, %v1678_v58  ;;  %v727_v28 = vpop.f32.mrb[22].mxu1  ;;  %v1169_v48 = vpop.f32.mrb[110].mxu0 }
 0x291   :  { %2323 = vst [vmem:[#allocation10 + $0x580] sm:$0xff] %v2067_v11  ;;  %2231 = vst [vmem:[#allocation10 + $0x2a0] sm:$0xff] %v1975_v38  ;;  %v1777_v46 = vmul.f32 %v3103_v3, %v727_v28  ;;  %v1685_v33 = vmul.f32 %v3186_v62, %v1169_v48  ;;  %v729_v30 = vpop.f32.mrb[23].mxu1  ;;  %v1171_v32 = vpop.f32.mrb[111].mxu0  ;;  %1431 = vmatmul.mubr.f32.gmra.mrb[128].mxu1 %v2907_v53 }
 0x292   :  { %2324 = vst [vmem:[#allocation10 + $0x588] sm:$0xff] %v2068_v20  ;;  %2232 = vst [vmem:[#allocation10 + $0x2a8] sm:$0xff] %v1976_v24  ;;  %v1778_v17 = vmul.f32 %v3107_v5, %v729_v30  ;;  %v1686_v1 = vmul.f32 %v3191_v18, %v1171_v32  ;;  %1436 = vmatprep.mubr.f32.mxu1 %v2758_v14 }
 0x293   :  { %v2075_v34 = vadd.f32 %v3110_v9, %v1777_v46  ;;  %v1983_v37 = vadd.f32 %v3195_v22, %v1685_v33 }
 0x294   :  { %v2076_v40 = vadd.f32 %v3113_v13, %v1778_v17  ;;  %v1984_v39 = vadd.f32 %v3199_v29, %v1686_v1  ;;  %v733_v41 = vpop.f32.mrb[24].mxu1  ;;  %v1175_v43 = vpop.f32.mrb[112].mxu0 }
 0x295   :  { %2331 = vst [vmem:[#allocation10 + $0x5c0] sm:$0xff] %v2075_v34  ;;  %2239 = vst [vmem:[#allocation10 + $0x2e0] sm:$0xff] %v1983_v37  ;;  %v1785_v53 = vmul.f32 %v3103_v3, %v733_v41  ;;  %v1693_v44 = vmul.f32 %v3186_v62, %v1175_v43  ;;  %v735_v45 = vpop.f32.mrb[25].mxu1  ;;  %v1177_v36 = vpop.f32.mrb[113].mxu0  ;;  %1437 = vmatmul.mubr.f32.gmra.mrb[130].mxu1 %v2913_v61 }
 0x296   :  { %2332 = vst [vmem:[#allocation10 + $0x5c8] sm:$0xff] %v2076_v40  ;;  %2240 = vst [vmem:[#allocation10 + $0x2e8] sm:$0xff] %v1984_v39  ;;  %v1786_v47 = vmul.f32 %v3107_v5, %v735_v45  ;;  %v1694_v50 = vmul.f32 %v3191_v18, %v1177_v36  ;;  %1442 = vmatprep.mubr.f32.mxu1 %v2758_v14 }
 0x297   :  { %v2083_v51 = vadd.f32 %v3110_v9, %v1785_v53  ;;  %v1991_v25 = vadd.f32 %v3195_v22, %v1693_v44 }
 0x298   :  { %v2084_v56 = vadd.f32 %v3113_v13, %v1786_v47  ;;  %v1992_v42 = vadd.f32 %v3199_v29, %v1694_v50  ;;  %v739_v8 = vpop.f32.mrb[26].mxu1  ;;  %v1181_v52 = vpop.f32.mrb[114].mxu0 }
 0x299   :  { %2339 = vst [vmem:[#allocation10 + $0x600] sm:$0xff] %v2083_v51  ;;  %2247 = vst [vmem:[#allocation10 + $0x320] sm:$0xff] %v1991_v25  ;;  %v1793_v61 = vmul.f32 %v3103_v3, %v739_v8  ;;  %v1701_v54 = vmul.f32 %v3186_v62, %v1181_v52  ;;  %v741_v55 = vpop.f32.mrb[27].mxu1  ;;  %v1183_v58 = vpop.f32.mrb[115].mxu0  ;;  %1443 = vmatmul.mubr.f32.gmra.mrb[132].mxu1 %v2919_v6 }
 0x29a   :  { %2340 = vst [vmem:[#allocation10 + $0x608] sm:$0xff] %v2084_v56  ;;  %2248 = vst [vmem:[#allocation10 + $0x328] sm:$0xff] %v1992_v42  ;;  %v1794_v11 = vmul.f32 %v3107_v5, %v741_v55  ;;  %v1702_v38 = vmul.f32 %v3191_v18, %v1183_v58  ;;  %1448 = vmatprep.mubr.f32.mxu1 %v2758_v14 }
 0x29b   :  { %v2091_v20 = vadd.f32 %v3110_v9, %v1793_v61  ;;  %v1999_v24 = vadd.f32 %v3195_v22, %v1701_v54 }
 0x29c   :  { %v2092_v28 = vadd.f32 %v3113_v13, %v1794_v11  ;;  %v2000_v48 = vadd.f32 %v3199_v29, %v1702_v38  ;;  %v745_v46 = vpop.f32.mrb[28].mxu1  ;;  %v1187_v33 = vpop.f32.mrb[116].mxu0 }
 0x29d   :  { %2347 = vst [vmem:[#allocation10 + $0x640] sm:$0xff] %v2091_v20  ;;  %2255 = vst [vmem:[#allocation10 + $0x360] sm:$0xff] %v1999_v24  ;;  %v1801_v6 = vmul.f32 %v3103_v3, %v745_v46  ;;  %v1709_v30 = vmul.f32 %v3186_v62, %v1187_v33  ;;  %v747_v32 = vpop.f32.mrb[29].mxu1  ;;  %v1189_v17 = vpop.f32.mrb[117].mxu0  ;;  %1449 = vmatmul.mubr.f32.gmra.mrb[134].mxu1 %v2925_v16 }
 0x29e   :  { %2348 = vst [vmem:[#allocation10 + $0x648] sm:$0xff] %v2092_v28  ;;  %2256 = vst [vmem:[#allocation10 + $0x368] sm:$0xff] %v2000_v48  ;;  %v1802_v1 = vmul.f32 %v3107_v5, %v747_v32  ;;  %v1710_v34 = vmul.f32 %v3191_v18, %v1189_v17  ;;  %1454 = vmatprep.mubr.f32.mxu1 %v2758_v14 }
 0x29f   :  { %v2099_v37 = vadd.f32 %v3110_v9, %v1801_v6  ;;  %v2007_v40 = vadd.f32 %v3195_v22, %v1709_v30 }
 0x2a0   :  { %v2100_v39 = vadd.f32 %v3113_v13, %v1802_v1  ;;  %v2008_v41 = vadd.f32 %v3199_v29, %v1710_v34  ;;  %v751_v43 = vpop.f32.mrb[30].mxu1  ;;  %v1193_v53 = vpop.f32.mrb[118].mxu0 }
 0x2a1   :  { %2355 = vst [vmem:[#allocation10 + $0x680] sm:$0xff] %v2099_v37  ;;  %2263 = vst [vmem:[#allocation10 + $0x3a0] sm:$0xff] %v2007_v40  ;;  %v1809_v16 = vmul.f32 %v3103_v3, %v751_v43  ;;  %v1717_v44 = vmul.f32 %v3186_v62, %v1193_v53  ;;  %v753_v45 = vpop.f32.mrb[31].mxu1  ;;  %v1195_v36 = vpop.f32.mrb[119].mxu0  ;;  %1455 = vmatmul.mubr.f32.gmra.mrb[136].mxu1 %v2931_v26 }
 0x2a2   :  { %2356 = vst [vmem:[#allocation10 + $0x688] sm:$0xff] %v2100_v39  ;;  %2264 = vst [vmem:[#allocation10 + $0x3a8] sm:$0xff] %v2008_v41  ;;  %v1810_v47 = vmul.f32 %v3107_v5, %v753_v45  ;;  %v1718_v50 = vmul.f32 %v3191_v18, %v1195_v36  ;;  %1460 = vmatprep.mubr.f32.mxu1 %v2758_v14 }
 0x2a3   :  { %v2107_v51 = vadd.f32 %v3110_v9, %v1809_v16  ;;  %v2015_v25 = vadd.f32 %v3195_v22, %v1717_v44  ;;  %v1563_v44 = vsub.s32 2, %v3087_v57 }
 0x2a4   :  { %v2108_v56 = vadd.f32 %v3113_v13, %v1810_v47  ;;  %v2016_v42 = vadd.f32 %v3199_v29, %v1718_v50  ;;  %v757_v8 = vpop.f32.mrb[32].mxu1  ;;  %v1199_v52 = vpop.f32.mrb[120].mxu0  ;;  %v1567_v47 = vsub.s32 3, %v3087_v57 }
 0x2a5   :  { %2363 = vst [vmem:[#allocation10 + $0x6c0] sm:$0xff] %v2107_v51  ;;  %2271 = vst [vmem:[#allocation10 + $0x3e0] sm:$0xff] %v2015_v25  ;;  %v1817_v26 = vmul.f32 %v3103_v3, %v757_v8  ;;  %v1725_v61 = vmul.f32 %v3186_v62, %v1199_v52  ;;  %v759_v54 = vpop.f32.mrb[33].mxu1  ;;  %v1201_v55 = vpop.f32.mrb[121].mxu0  ;;  %1461 = vmatmul.mubr.f32.gmra.mrb[138].mxu1 %v2937_v35 }
 0x2a6   :  { %2364 = vst [vmem:[#allocation10 + $0x6c8] sm:$0xff] %v2108_v56  ;;  %2272 = vst [vmem:[#allocation10 + $0x3e8] sm:$0xff] %v2016_v42  ;;  %v1818_v58 = vmul.f32 %v3107_v5, %v759_v54  ;;  %v1726_v11 = vmul.f32 %v3191_v18, %v1201_v55  ;;  %1466 = vmatprep.mubr.f32.mxu1 %v2758_v14  ;;  %v3397_v54 = vrot.slane %v3096_v60, %v1563_v44 }
 0x2a7   :  { %v2115_v38 = vadd.f32 %v3110_v9, %v1817_v26  ;;  %v2023_v20 = vadd.f32 %v3195_v22, %v1725_v61 }
 0x2a8   :  { %v2116_v24 = vadd.f32 %v3113_v13, %v1818_v58  ;;  %v2024_v28 = vadd.f32 %v3199_v29, %v1726_v11  ;;  %v763_v48 = vpop.f32.mrb[34].mxu1  ;;  %v1205_v46 = vpop.f32.mrb[122].mxu0  ;;  %v3403_v11 = vrot.slane %v3096_v60, %v1567_v47 }
 0x2a9   :  { %2371 = vst [vmem:[#allocation10 + $0x700] sm:$0xff] %v2115_v38  ;;  %2279 = vst [vmem:[#allocation10 + $0x420] sm:$0xff] %v2023_v20  ;;  %v1825_v35 = vmul.f32 %v3103_v3, %v763_v48  ;;  %v1733_v33 = vmul.f32 %v3186_v62, %v1205_v46  ;;  %v765_v6 = vpop.f32.mrb[35].mxu1  ;;  %v1207_v30 = vpop.f32.mrb[123].mxu0  ;;  %1467 = vmatmul.mubr.f32.gmra.mrb[140].mxu1 %v2943_v49  ;;  %v3413_v48 = vrot.slane %v3099_v0, %v1567_v47 }
 0x2aa   :  { %2372 = vst [vmem:[#allocation10 + $0x708] sm:$0xff] %v2116_v24  ;;  %2280 = vst [vmem:[#allocation10 + $0x428] sm:$0xff] %v2024_v28  ;;  %v1826_v32 = vmul.f32 %v3107_v5, %v765_v6  ;;  %v1734_v17 = vmul.f32 %v3191_v18, %v1207_v30  ;;  %1472 = vmatprep.mubr.f32.mxu1 %v2758_v14 }
 0x2ab   :  { %v2123_v1 = vadd.f32 %v3110_v9, %v1825_v35  ;;  %v2031_v34 = vadd.f32 %v3195_v22, %v1733_v33 }
 0x2ac   :  { %v2124_v37 = vadd.f32 %v3113_v13, %v1826_v32  ;;  %v2032_v40 = vadd.f32 %v3199_v29, %v1734_v17  ;;  %v769_v39 = vpop.f32.mrb[36].mxu1  ;;  %v1211_v41 = vpop.f32.mrb[124].mxu0 }
 0x2ad   :  { %2379 = vst [vmem:[#allocation10 + $0x740] sm:$0xff] %v2123_v1  ;;  %2287 = vst [vmem:[#allocation10 + $0x460] sm:$0xff] %v2031_v34  ;;  %v1833_v49 = vmul.f32 %v3103_v3, %v769_v39  ;;  %v1741_v43 = vmul.f32 %v3186_v62, %v1211_v41  ;;  %v771_v53 = vpop.f32.mrb[37].mxu1  ;;  %v1213_v16 = vpop.f32.mrb[125].mxu0  ;;  %1473 = vmatmul.mubr.f32.gmra.mrb[142].mxu1 %v2949_v59 }
 0x2ae   :  { %2380 = vst [vmem:[#allocation10 + $0x748] sm:$0xff] %v2124_v37  ;;  %2288 = vst [vmem:[#allocation10 + $0x468] sm:$0xff] %v2032_v40  ;;  %v1834_v45 = vmul.f32 %v3107_v5, %v771_v53  ;;  %v1742_v36 = vmul.f32 %v3191_v18, %v1213_v16  ;;  %1478 = vmatprep.mubr.f32.mxu1 %v2758_v14 }
 0x2af   :  { %v2131_v50 = vadd.f32 %v3110_v9, %v1833_v49  ;;  %v2039_v51 = vadd.f32 %v3195_v22, %v1741_v43 }
 0x2b0   :  { %v2132_v25 = vadd.f32 %v3113_v13, %v1834_v45  ;;  %v2040_v59 = vadd.f32 %v3199_v29, %v1742_v36  ;;  %v775_v56 = vpop.f32.mrb[38].mxu1  ;;  %v1217_v42 = vpop.f32.mrb[126].mxu0 }
 0x2b1   :  { %2387 = vst [vmem:[#allocation10 + $0x780] sm:$0xff] %v2131_v50  ;;  %2295 = vst [vmem:[#allocation10 + $0x4a0] sm:$0xff] %v2039_v51  ;;  %v1841_v8 = vmul.f32 %v3103_v3, %v775_v56  ;;  %v1749_v52 = vmul.f32 %v3186_v62, %v1217_v42  ;;  %v777_v26 = vpop.f32.mrb[39].mxu1  ;;  %v1219_v61 = vpop.f32.mrb[127].mxu0  ;;  %1479 = vmatmul.mubr.f32.gmra.mrb[144].mxu1 %v2955_v63  ;;  %v3408_v63 = vrot.slane %v3099_v0, %v1563_v44 }
 0x2b2   :  { %2388 = vst [vmem:[#allocation10 + $0x788] sm:$0xff] %v2132_v25  ;;  %2296 = vst [vmem:[#allocation10 + $0x4a8] sm:$0xff] %v2040_v59  ;;  %v1842_v55 = vmul.f32 %v3107_v5, %v777_v26  ;;  %v1750_v58 = vmul.f32 %v3191_v18, %v1219_v61  ;;  %1484 = vmatprep.mubr.f32.mxu1 %v2758_v14 }
 0x2b3   :  { %v2139_v3 = vadd.f32 %v3110_v9, %v1841_v8  ;;  %v2047_v38 = vadd.f32 %v3195_v22, %v1749_v52 }
 0x2b4   :  { %v2140_v20 = vadd.f32 %v3113_v13, %v1842_v55  ;;  %v2048_v24 = vadd.f32 %v3199_v29, %v1750_v58  ;;  %v846_v28 = vpop.f32.mrb[40].mxu1  ;;  %v1223_v5 = vpop.f32.mrb[128].mxu0 }
 0x2b5   :  { %2395 = vst [vmem:[#allocation10 + $0x7c0] sm:$0xff] %v2139_v3  ;;  %2303 = vst [vmem:[#allocation10 + $0x4e0] sm:$0xff] %v2047_v38  ;;  %v1595_v60 = vmul.f32 %v3397_v54, %v846_v28  ;;  %v1757_v9 = vmul.f32 %v3186_v62, %v1223_v5  ;;  %v848_v46 = vpop.f32.mrb[41].mxu1  ;;  %v1225_v35 = vpop.f32.mrb[129].mxu0  ;;  %1485 = vmatmul.mubr.f32.gmra.mrb[146].mxu1 %v2961_v2 }
 0x2b6   :  { %2396 = vst [vmem:[#allocation10 + $0x7c8] sm:$0xff] %v2140_v20  ;;  %2304 = vst [vmem:[#allocation10 + $0x4e8] sm:$0xff] %v2048_v24  ;;  %v1596_v13 = vmul.f32 %v3403_v11, %v848_v46  ;;  %v1758_v33 = vmul.f32 %v3191_v18, %v1225_v35  ;;  %1490 = vmatprep.mubr.f32.mxu1 %v2758_v14 }
 0x2b7   :  { %v1893_v0 = vadd.f32 %v3408_v63, %v1595_v60  ;;  %v2055_v6 = vadd.f32 %v3195_v22, %v1757_v9 }
 0x2b8   :  { %v1894_v30 = vadd.f32 %v3413_v48, %v1596_v13  ;;  %v2056_v32 = vadd.f32 %v3199_v29, %v1758_v33  ;;  %v852_v17 = vpop.f32.mrb[42].mxu1  ;;  %v1229_v1 = vpop.f32.mrb[130].mxu0 }
 0x2b9   :  { %2149 = vst [vmem:[#allocation10 + $0x10] sm:$0xff] %v1893_v0  ;;  %2311 = vst [vmem:[#allocation10 + $0x520] sm:$0xff] %v2055_v6  ;;  %v1603_v2 = vmul.f32 %v3397_v54, %v852_v17  ;;  %v1765_v34 = vmul.f32 %v3186_v62, %v1229_v1  ;;  %v854_v37 = vpop.f32.mrb[43].mxu1  ;;  %v1231_v40 = vpop.f32.mrb[131].mxu0  ;;  %1491 = vmatmul.mubr.f32.gmra.mrb[148].mxu1 %v2967_v4 }
 0x2ba   :  { %2150 = vst [vmem:[#allocation10 + $0x18] sm:$0xff] %v1894_v30  ;;  %2312 = vst [vmem:[#allocation10 + $0x528] sm:$0xff] %v2056_v32  ;;  %v1604_v39 = vmul.f32 %v3403_v11, %v854_v37  ;;  %v1766_v41 = vmul.f32 %v3191_v18, %v1231_v40  ;;  %1496 = vmatprep.mubr.f32.mxu1 %v2758_v14 }
 0x2bb   :  { %v1901_v49 = vadd.f32 %v3408_v63, %v1603_v2  ;;  %v2063_v43 = vadd.f32 %v3195_v22, %v1765_v34 }
 0x2bc   :  { %v1902_v53 = vadd.f32 %v3413_v48, %v1604_v39  ;;  %v2064_v16 = vadd.f32 %v3199_v29, %v1766_v41  ;;  %v858_v44 = vpop.f32.mrb[44].mxu1  ;;  %v1235_v45 = vpop.f32.mrb[132].mxu0 }
 0x2bd   :  { %2157 = vst [vmem:[#allocation10 + $0x50] sm:$0xff] %v1901_v49  ;;  %2319 = vst [vmem:[#allocation10 + $0x560] sm:$0xff] %v2063_v43  ;;  %v1611_v4 = vmul.f32 %v3397_v54, %v858_v44  ;;  %v1773_v36 = vmul.f32 %v3186_v62, %v1235_v45  ;;  %v860_v47 = vpop.f32.mrb[45].mxu1  ;;  %v1237_v50 = vpop.f32.mrb[133].mxu0  ;;  %1497 = vmatmul.mubr.f32.gmra.mrb[150].mxu1 %v2973_v7 }
 0x2be   :  { %2158 = vst [vmem:[#allocation10 + $0x58] sm:$0xff] %v1902_v53  ;;  %2320 = vst [vmem:[#allocation10 + $0x568] sm:$0xff] %v2064_v16  ;;  %v1612_v51 = vmul.f32 %v3403_v11, %v860_v47  ;;  %v1774_v25 = vmul.f32 %v3191_v18, %v1237_v50  ;;  %1502 = vmatprep.mubr.f32.mxu1 %v2758_v14 }
 0x2bf   :  { %v1909_v59 = vadd.f32 %v3408_v63, %v1611_v4  ;;  %v2071_v56 = vadd.f32 %v3195_v22, %v1773_v36 }
 0x2c0   :  { %v1910_v42 = vadd.f32 %v3413_v48, %v1612_v51  ;;  %v2072_v8 = vadd.f32 %v3199_v29, %v1774_v25  ;;  %v864_v52 = vpop.f32.mrb[46].mxu1  ;;  %v1241_v26 = vpop.f32.mrb[134].mxu0 }
 0x2c1   :  { %2165 = vst [vmem:[#allocation10 + $0x90] sm:$0xff] %v1909_v59  ;;  %2327 = vst [vmem:[#allocation10 + $0x5a0] sm:$0xff] %v2071_v56  ;;  %v1619_v7 = vmul.f32 %v3397_v54, %v864_v52  ;;  %v1781_v61 = vmul.f32 %v3186_v62, %v1241_v26  ;;  %v866_v55 = vpop.f32.mrb[47].mxu1  ;;  %v1243_v58 = vpop.f32.mrb[135].mxu0  ;;  %1503 = vmatmul.mubr.f32.gmra.mrb[152].mxu1 %v2979_v10 }
 0x2c2   :  { %2166 = vst [vmem:[#allocation10 + $0x98] sm:$0xff] %v1910_v42  ;;  %2328 = vst [vmem:[#allocation10 + $0x5a8] sm:$0xff] %v2072_v8  ;;  %v1620_v3 = vmul.f32 %v3403_v11, %v866_v55  ;;  %v1782_v38 = vmul.f32 %v3191_v18, %v1243_v58  ;;  %1508 = vmatprep.mubr.f32.mxu1 %v2758_v14 }
 0x2c3   :  { %v1917_v20 = vadd.f32 %v3408_v63, %v1619_v7  ;;  %v2079_v24 = vadd.f32 %v3195_v22, %v1781_v61 }
 0x2c4   :  { %v1918_v28 = vadd.f32 %v3413_v48, %v1620_v3  ;;  %v2080_v5 = vadd.f32 %v3199_v29, %v1782_v38  ;;  %v870_v60 = vpop.f32.mrb[48].mxu1  ;;  %v1247_v9 = vpop.f32.mrb[136].mxu0 }
 0x2c5   :  { %2173 = vst [vmem:[#allocation10 + $0xd0] sm:$0xff] %v1917_v20  ;;  %2335 = vst [vmem:[#allocation10 + $0x5e0] sm:$0xff] %v2079_v24  ;;  %v1627_v10 = vmul.f32 %v3397_v54, %v870_v60  ;;  %v1789_v46 = vmul.f32 %v3186_v62, %v1247_v9  ;;  %v872_v35 = vpop.f32.mrb[49].mxu1  ;;  %v1249_v13 = vpop.f32.mrb[137].mxu0  ;;  %1509 = vmatmul.mubr.f32.gmra.mrb[154].mxu1 %v2985_v12 }
 0x2c6   :  { %2174 = vst [vmem:[#allocation10 + $0xd8] sm:$0xff] %v1918_v28  ;;  %2336 = vst [vmem:[#allocation10 + $0x5e8] sm:$0xff] %v2080_v5  ;;  %v1628_v33 = vmul.f32 %v3403_v11, %v872_v35  ;;  %v1790_v0 = vmul.f32 %v3191_v18, %v1249_v13  ;;  %1514 = vmatprep.mubr.f32.mxu1 %v2758_v14 }
 0x2c7   :  { %v1925_v6 = vadd.f32 %v3408_v63, %v1627_v10  ;;  %v2087_v30 = vadd.f32 %v3195_v22, %v1789_v46 }
 0x2c8   :  { %v1926_v32 = vadd.f32 %v3413_v48, %v1628_v33  ;;  %v2088_v17 = vadd.f32 %v3199_v29, %v1790_v0  ;;  %v876_v1 = vpop.f32.mrb[50].mxu1  ;;  %v1253_v2 = vpop.f32.mrb[138].mxu0 }
 0x2c9   :  { %2181 = vst [vmem:[#allocation10 + $0x110] sm:$0xff] %v1925_v6  ;;  %2343 = vst [vmem:[#allocation10 + $0x620] sm:$0xff] %v2087_v30  ;;  %v1635_v12 = vmul.f32 %v3397_v54, %v876_v1  ;;  %v1797_v34 = vmul.f32 %v3186_v62, %v1253_v2  ;;  %v878_v37 = vpop.f32.mrb[51].mxu1  ;;  %v1255_v40 = vpop.f32.mrb[139].mxu0  ;;  %1515 = vmatmul.mubr.f32.gmra.mrb[156].mxu1 %v2991_v15 }
 0x2ca   :  { %2182 = vst [vmem:[#allocation10 + $0x118] sm:$0xff] %v1926_v32  ;;  %2344 = vst [vmem:[#allocation10 + $0x628] sm:$0xff] %v2088_v17  ;;  %v1636_v39 = vmul.f32 %v3403_v11, %v878_v37  ;;  %v1798_v41 = vmul.f32 %v3191_v18, %v1255_v40  ;;  %1520 = vmatprep.mubr.f32.mxu1 %v2758_v14 }
 0x2cb   :  { %v1933_v49 = vadd.f32 %v3408_v63, %v1635_v12  ;;  %v2095_v43 = vadd.f32 %v3195_v22, %v1797_v34 }
 0x2cc   :  { %v1934_v53 = vadd.f32 %v3413_v48, %v1636_v39  ;;  %v2096_v16 = vadd.f32 %v3199_v29, %v1798_v41  ;;  %v882_v44 = vpop.f32.mrb[52].mxu1  ;;  %v1259_v45 = vpop.f32.mrb[140].mxu0 }
 0x2cd   :  { %2189 = vst [vmem:[#allocation10 + $0x150] sm:$0xff] %v1933_v49  ;;  %2351 = vst [vmem:[#allocation10 + $0x660] sm:$0xff] %v2095_v43  ;;  %v1643_v15 = vmul.f32 %v3397_v54, %v882_v44  ;;  %v1805_v4 = vmul.f32 %v3186_v62, %v1259_v45  ;;  %v884_v36 = vpop.f32.mrb[53].mxu1  ;;  %v1261_v47 = vpop.f32.mrb[141].mxu0  ;;  %1521 = vmatmul.mubr.f32.gmra.mrb[158].mxu1 %v2997_v19 }
 0x2ce   :  { %2190 = vst [vmem:[#allocation10 + $0x158] sm:$0xff] %v1934_v53  ;;  %2352 = vst [vmem:[#allocation10 + $0x668] sm:$0xff] %v2096_v16  ;;  %v1644_v50 = vmul.f32 %v3403_v11, %v884_v36  ;;  %v1806_v51 = vmul.f32 %v3191_v18, %v1261_v47  ;;  %1526 = vmatprep.mubr.f32.mxu1 %v2758_v14 }
 0x2cf   :  { %v1941_v25 = vadd.f32 %v3408_v63, %v1643_v15  ;;  %v2103_v59 = vadd.f32 %v3195_v22, %v1805_v4 }
 0x2d0   :  { %v1942_v56 = vadd.f32 %v3413_v48, %v1644_v50  ;;  %v2104_v42 = vadd.f32 %v3199_v29, %v1806_v51  ;;  %v888_v8 = vpop.f32.mrb[54].mxu1  ;;  %v1265_v52 = vpop.f32.mrb[142].mxu0 }
 0x2d1   :  { %2197 = vst [vmem:[#allocation10 + $0x190] sm:$0xff] %v1941_v25  ;;  %2359 = vst [vmem:[#allocation10 + $0x6a0] sm:$0xff] %v2103_v59  ;;  %v1651_v19 = vmul.f32 %v3397_v54, %v888_v8  ;;  %v1813_v26 = vmul.f32 %v3186_v62, %v1265_v52  ;;  %v890_v7 = vpop.f32.mrb[55].mxu1  ;;  %v1267_v61 = vpop.f32.mrb[143].mxu0  ;;  %1527 = vmatmul.mubr.f32.gmra.mrb[160].mxu1 %v3003_v21 }
 0x2d2   :  { %2198 = vst [vmem:[#allocation10 + $0x198] sm:$0xff] %v1942_v56  ;;  %2360 = vst [vmem:[#allocation10 + $0x6a8] sm:$0xff] %v2104_v42  ;;  %v1652_v55 = vmul.f32 %v3403_v11, %v890_v7  ;;  %v1814_v58 = vmul.f32 %v3191_v18, %v1267_v61  ;;  %1532 = vmatprep.mubr.f32.mxu1 %v2758_v14 }
 0x2d3   :  { %v1949_v3 = vadd.f32 %v3408_v63, %v1651_v19  ;;  %v2111_v38 = vadd.f32 %v3195_v22, %v1813_v26 }
 0x2d4   :  { %v1950_v20 = vadd.f32 %v3413_v48, %v1652_v55  ;;  %v2112_v24 = vadd.f32 %v3199_v29, %v1814_v58  ;;  %v894_v28 = vpop.f32.mrb[56].mxu1  ;;  %v1271_v5 = vpop.f32.mrb[144].mxu0 }
 0x2d5   :  { %2205 = vst [vmem:[#allocation10 + $0x1d0] sm:$0xff] %v1949_v3  ;;  %2367 = vst [vmem:[#allocation10 + $0x6e0] sm:$0xff] %v2111_v38  ;;  %v1659_v21 = vmul.f32 %v3397_v54, %v894_v28  ;;  %v1821_v60 = vmul.f32 %v3186_v62, %v1271_v5  ;;  %v896_v9 = vpop.f32.mrb[57].mxu1  ;;  %v1273_v10 = vpop.f32.mrb[145].mxu0  ;;  %1533 = vmatmul.mubr.f32.gmra.mrb[162].mxu1 %v3009_v23 }
 0x2d6   :  { %2206 = vst [vmem:[#allocation10 + $0x1d8] sm:$0xff] %v1950_v20  ;;  %2368 = vst [vmem:[#allocation10 + $0x6e8] sm:$0xff] %v2112_v24  ;;  %v1660_v46 = vmul.f32 %v3403_v11, %v896_v9  ;;  %v1822_v35 = vmul.f32 %v3191_v18, %v1273_v10  ;;  %1538 = vmatprep.mubr.f32.mxu1 %v2758_v14 }
 0x2d7   :  { %v1957_v13 = vadd.f32 %v3408_v63, %v1659_v21  ;;  %v2119_v33 = vadd.f32 %v3195_v22, %v1821_v60 }
 0x2d8   :  { %v1958_v0 = vadd.f32 %v3413_v48, %v1660_v46  ;;  %v2120_v6 = vadd.f32 %v3199_v29, %v1822_v35  ;;  %v900_v30 = vpop.f32.mrb[58].mxu1  ;;  %v1277_v32 = vpop.f32.mrb[146].mxu0 }
 0x2d9   :  { %2213 = vst [vmem:[#allocation10 + $0x210] sm:$0xff] %v1957_v13  ;;  %2375 = vst [vmem:[#allocation10 + $0x720] sm:$0xff] %v2119_v33  ;;  %v1667_v23 = vmul.f32 %v3397_v54, %v900_v30  ;;  %v1829_v17 = vmul.f32 %v3186_v62, %v1277_v32  ;;  %v902_v1 = vpop.f32.mrb[59].mxu1  ;;  %v1279_v2 = vpop.f32.mrb[147].mxu0  ;;  %1539 = vmatmul.mubr.f32.gmra.mrb[164].mxu1 %v3015_v27 }
 0x2da   :  { %2214 = vst [vmem:[#allocation10 + $0x218] sm:$0xff] %v1958_v0  ;;  %2376 = vst [vmem:[#allocation10 + $0x728] sm:$0xff] %v2120_v6  ;;  %v1668_v12 = vmul.f32 %v3403_v11, %v902_v1  ;;  %v1830_v34 = vmul.f32 %v3191_v18, %v1279_v2  ;;  %1544 = vmatprep.mubr.f32.mxu1 %v2758_v14 }
 0x2db   :  { %v1965_v37 = vadd.f32 %v3408_v63, %v1667_v23  ;;  %v2127_v40 = vadd.f32 %v3195_v22, %v1829_v17 }
 0x2dc   :  { %v1966_v39 = vadd.f32 %v3413_v48, %v1668_v12  ;;  %v2128_v41 = vadd.f32 %v3199_v29, %v1830_v34  ;;  %v906_v49 = vpop.f32.mrb[60].mxu1  ;;  %v1283_v43 = vpop.f32.mrb[148].mxu0 }
 0x2dd   :  { %2221 = vst [vmem:[#allocation10 + $0x250] sm:$0xff] %v1965_v37  ;;  %2383 = vst [vmem:[#allocation10 + $0x760] sm:$0xff] %v2127_v40  ;;  %v1675_v27 = vmul.f32 %v3397_v54, %v906_v49  ;;  %v1837_v53 = vmul.f32 %v3186_v62, %v1283_v43  ;;  %v908_v16 = vpop.f32.mrb[61].mxu1  ;;  %v1285_v44 = vpop.f32.mrb[149].mxu0  ;;  %1545 = vmatmul.mubr.f32.gmra.mrb[166].mxu1 %v3021_v31 }
 0x2de   :  { %2222 = vst [vmem:[#allocation10 + $0x258] sm:$0xff] %v1966_v39  ;;  %2384 = vst [vmem:[#allocation10 + $0x768] sm:$0xff] %v2128_v41  ;;  %v1676_v14 = vmul.f32 %v3403_v11, %v908_v16  ;;  %v1838_v45 = vmul.f32 %v3191_v18, %v1285_v44 }
 0x2df   :  { %v1973_v15 = vadd.f32 %v3408_v63, %v1675_v27  ;;  %v2135_v4 = vadd.f32 %v3195_v22, %v1837_v53 }
 0x2e0   :  { %v1974_v36 = vadd.f32 %v3413_v48, %v1676_v14  ;;  %v2136_v47 = vadd.f32 %v3199_v29, %v1838_v45  ;;  %v912_v50 = vpop.f32.mrb[62].mxu1  ;;  %v1289_v51 = vpop.f32.mrb[150].mxu0 }
 0x2e1   :  { %2229 = vst [vmem:[#allocation10 + $0x290] sm:$0xff] %v1973_v15  ;;  %2391 = vst [vmem:[#allocation10 + $0x7a0] sm:$0xff] %v2135_v4  ;;  %v1683_v31 = vmul.f32 %v3397_v54, %v912_v50  ;;  %v1845_v25 = vmul.f32 %v3186_v62, %v1289_v51  ;;  %v914_v59 = vpop.f32.mrb[63].mxu1  ;;  %v1291_v56 = vpop.f32.mrb[151].mxu0 }
 0x2e2   :  { %2230 = vst [vmem:[#allocation10 + $0x298] sm:$0xff] %v1974_v36  ;;  %2392 = vst [vmem:[#allocation10 + $0x7a8] sm:$0xff] %v2136_v47  ;;  %v1684_v42 = vmul.f32 %v3403_v11, %v914_v59  ;;  %v1846_v8 = vmul.f32 %v3191_v18, %v1291_v56 }
 0x2e3   :  { %v1981_v52 = vadd.f32 %v3408_v63, %v1683_v31  ;;  %v2143_v19 = vadd.f32 %v3195_v22, %v1845_v25 }
 0x2e4   :  { %v1982_v26 = vadd.f32 %v3413_v48, %v1684_v42  ;;  %v2144_v7 = vadd.f32 %v3199_v29, %v1846_v8  ;;  %v918_v61 = vpop.f32.mrb[64].mxu1 }
 0x2e5   :  { %2237 = vst [vmem:[#allocation10 + $0x2d0] sm:$0xff] %v1981_v52  ;;  %2399 = vst [vmem:[#allocation10 + $0x7e0] sm:$0xff] %v2143_v19  ;;  %v1691_v62 = vmul.f32 %v3397_v54, %v918_v61  ;;  %v920_v55 = vpop.f32.mrb[65].mxu1 }
 0x2e6   :  { %2238 = vst [vmem:[#allocation10 + $0x2d8] sm:$0xff] %v1982_v26  ;;  %2400 = vst [vmem:[#allocation10 + $0x7e8] sm:$0xff] %v2144_v7  ;;  %v1692_v58 = vmul.f32 %v3403_v11, %v920_v55 }
 0x2e7   :  { %v1989_v18 = vadd.f32 %v3408_v63, %v1691_v62 }
 0x2e8   :  { %v1990_v3 = vadd.f32 %v3413_v48, %v1692_v58  ;;  %v924_v38 = vpop.f32.mrb[66].mxu1 }
 0x2e9   :  { %2245 = vst [vmem:[#allocation10 + $0x310] sm:$0xff] %v1989_v18  ;;  %v1699_v22 = vmul.f32 %v3397_v54, %v924_v38  ;;  %v926_v20 = vpop.f32.mrb[67].mxu1 }
 0x2ea   :  { %2246 = vst [vmem:[#allocation10 + $0x318] sm:$0xff] %v1990_v3  ;;  %v1700_v29 = vmul.f32 %v3403_v11, %v926_v20 }
 0x2eb   :  { %v1997_v24 = vadd.f32 %v3408_v63, %v1699_v22 }
 0x2ec   :  { %v1998_v28 = vadd.f32 %v3413_v48, %v1700_v29  ;;  %v930_v5 = vpop.f32.mrb[68].mxu1 }
 0x2ed   :  { %2253 = vst [vmem:[#allocation10 + $0x350] sm:$0xff] %v1997_v24  ;;  %v1707_v21 = vmul.f32 %v3397_v54, %v930_v5  ;;  %v932_v60 = vpop.f32.mrb[69].mxu1 }
 0x2ee   :  { %2254 = vst [vmem:[#allocation10 + $0x358] sm:$0xff] %v1998_v28  ;;  %v1708_v9 = vmul.f32 %v3403_v11, %v932_v60 }
 0x2ef   :  { %v2005_v10 = vadd.f32 %v3408_v63, %v1707_v21 }
 0x2f0   :  { %v2006_v46 = vadd.f32 %v3413_v48, %v1708_v9  ;;  %v936_v35 = vpop.f32.mrb[70].mxu1 }
 0x2f1   :  { %2261 = vst [vmem:[#allocation10 + $0x390] sm:$0xff] %v2005_v10  ;;  %v1715_v13 = vmul.f32 %v3397_v54, %v936_v35  ;;  %v938_v33 = vpop.f32.mrb[71].mxu1 }
 0x2f2   :  { %2262 = vst [vmem:[#allocation10 + $0x398] sm:$0xff] %v2006_v46  ;;  %v1716_v0 = vmul.f32 %v3403_v11, %v938_v33 }
 0x2f3   :  { %v2013_v6 = vadd.f32 %v3408_v63, %v1715_v13 }
 0x2f4   :  { %v2014_v30 = vadd.f32 %v3413_v48, %v1716_v0  ;;  %v942_v32 = vpop.f32.mrb[72].mxu1 }
 0x2f5   :  { %2269 = vst [vmem:[#allocation10 + $0x3d0] sm:$0xff] %v2013_v6  ;;  %v1723_v23 = vmul.f32 %v3397_v54, %v942_v32  ;;  %v944_v17 = vpop.f32.mrb[73].mxu1 }
 0x2f6   :  { %2270 = vst [vmem:[#allocation10 + $0x3d8] sm:$0xff] %v2014_v30  ;;  %v1724_v1 = vmul.f32 %v3403_v11, %v944_v17 }
 0x2f7   :  { %v2021_v2 = vadd.f32 %v3408_v63, %v1723_v23 }
 0x2f8   :  { %v2022_v12 = vadd.f32 %v3413_v48, %v1724_v1  ;;  %v948_v34 = vpop.f32.mrb[74].mxu1 }
 0x2f9   :  { %2277 = vst [vmem:[#allocation10 + $0x410] sm:$0xff] %v2021_v2  ;;  %v1731_v37 = vmul.f32 %v3397_v54, %v948_v34  ;;  %v950_v40 = vpop.f32.mrb[75].mxu1 }
 0x2fa   :  { %2278 = vst [vmem:[#allocation10 + $0x418] sm:$0xff] %v2022_v12  ;;  %v1732_v39 = vmul.f32 %v3403_v11, %v950_v40 }
 0x2fb   :  { %v2029_v41 = vadd.f32 %v3408_v63, %v1731_v37 }
 0x2fc   :  { %v2030_v49 = vadd.f32 %v3413_v48, %v1732_v39  ;;  %v954_v43 = vpop.f32.mrb[76].mxu1 }
 0x2fd   :  { %2285 = vst [vmem:[#allocation10 + $0x450] sm:$0xff] %v2029_v41  ;;  %v1739_v27 = vmul.f32 %v3397_v54, %v954_v43  ;;  %v956_v53 = vpop.f32.mrb[77].mxu1 }
 0x2fe   :  { %2286 = vst [vmem:[#allocation10 + $0x458] sm:$0xff] %v2030_v49  ;;  %v1740_v16 = vmul.f32 %v3403_v11, %v956_v53 }
 0x2ff   :  { %v2037_v44 = vadd.f32 %v3408_v63, %v1739_v27 }
 0x300   :  { %v2038_v14 = vadd.f32 %v3413_v48, %v1740_v16  ;;  %v960_v45 = vpop.f32.mrb[78].mxu1 }
 0x301   :  { %2293 = vst [vmem:[#allocation10 + $0x490] sm:$0xff] %v2037_v44  ;;  %v1747_v15 = vmul.f32 %v3397_v54, %v960_v45  ;;  %v962_v4 = vpop.f32.mrb[79].mxu1 }
 0x302   :  { %2294 = vst [vmem:[#allocation10 + $0x498] sm:$0xff] %v2038_v14  ;;  %v1748_v36 = vmul.f32 %v3403_v11, %v962_v4 }
 0x303   :  { %v2045_v47 = vadd.f32 %v3408_v63, %v1747_v15 }
 0x304   :  { %v2046_v50 = vadd.f32 %v3413_v48, %v1748_v36  ;;  %v966_v51 = vpop.f32.mrb[80].mxu1 }
 0x305   :  { %2301 = vst [vmem:[#allocation10 + $0x4d0] sm:$0xff] %v2045_v47  ;;  %v1755_v31 = vmul.f32 %v3397_v54, %v966_v51  ;;  %v968_v25 = vpop.f32.mrb[81].mxu1 }
 0x306   :  { %2302 = vst [vmem:[#allocation10 + $0x4d8] sm:$0xff] %v2046_v50  ;;  %v1756_v59 = vmul.f32 %v3403_v11, %v968_v25 }
 0x307   :  { %v2053_v56 = vadd.f32 %v3408_v63, %v1755_v31 }
 0x308   :  { %v2054_v42 = vadd.f32 %v3413_v48, %v1756_v59  ;;  %v972_v8 = vpop.f32.mrb[82].mxu1 }
 0x309   :  { %2309 = vst [vmem:[#allocation10 + $0x510] sm:$0xff] %v2053_v56  ;;  %v1763_v52 = vmul.f32 %v3397_v54, %v972_v8  ;;  %v974_v19 = vpop.f32.mrb[83].mxu1  ;;  %v1579_v56 = vsub.s32 6, %v3087_v57  ;;  %v1583_v8 = vsub.s32 7, %v3087_v57 }
 0x30a   :  { %2310 = vst [vmem:[#allocation10 + $0x518] sm:$0xff] %v2054_v42  ;;  %v1764_v26 = vmul.f32 %v3403_v11, %v974_v19 }
 0x30b   :  { %v2061_v7 = vadd.f32 %v3408_v63, %v1763_v52 }
 0x30c   :  { %v2062_v61 = vadd.f32 %v3413_v48, %v1764_v26  ;;  %v978_v62 = vpop.f32.mrb[84].mxu1 }
 0x30d   :  { %2317 = vst [vmem:[#allocation10 + $0x550] sm:$0xff] %v2061_v7  ;;  %v1771_v55 = vmul.f32 %v3397_v54, %v978_v62  ;;  %v980_v58 = vpop.f32.mrb[85].mxu1  ;;  %v2627_v62 = vld [vmem:[%s3771_s3] sm:$0xff]  ;;  %s2759_s3 = smov [#allocation10]  }
 0x30e   :  { %2318 = vst [vmem:[#allocation10 + $0x558] sm:$0xff] %v2062_v61  ;;  %v1772_v18 = vmul.f32 %v3403_v11, %v980_v58  ;;  %s2408_s21 = sshll.u32 %s2759_s3, 4  ;;  %s2409_s21 = int_to_ptr.vmem [resolvable:$true] %s2408_s21 }
 0x30f   :  { %v2069_v3 = vadd.f32 %v3408_v63, %v1771_v55  ;;  %v3614_v55 = vrot.slane %v2627_v62, %v1579_v56  ;;  %s2717_s22 = scalar_lea.vmem %s2409_s21, 32768  ;;  %p2722_p5 = scmp.lt.s32.totalorder %s2409_s21, %s2409_s21 }
 0x310   :  { %v2070_v38 = vadd.f32 %v3413_v48, %v1772_v18  ;;  %v984_v22 = vpop.f32.mrb[86].mxu1  ;;  %v3617_v18 = vrot.slane %v2627_v62, %v1583_v8  ;;  %p2718_p4 = scmp.ne.s32.totalorder %s2409_s21, %s2717_s22  ;;  %p2723_p6 = scmp.lt.s32.totalorder %s2717_s22, %s2717_s22 }
 0x311   :  { %2325 = vst [vmem:[#allocation10 + $0x590] sm:$0xff] %v2069_v3  ;;  %v1779_v20 = vmul.f32 %v3397_v54, %v984_v22  ;;  %v986_v29 = vpop.f32.mrb[87].mxu1  ;;  %v2628_v3 = vld [vmem:[#allocation8] sm:$0xff] }
 0x312   :  { %2326 = vst [vmem:[#allocation10 + $0x598] sm:$0xff] %v2070_v38  ;;  %v1780_v24 = vmul.f32 %v3403_v11, %v986_v29  ;;  %v3620_v38 = vrot.slane %v2628_v3, %v1579_v56  ;;  %p2724_p7 = por %p2723_p6, %p2722_p5 }
 0x313   :  { %v2077_v28 = vadd.f32 %v3408_v63, %v1779_v20  ;;  %v3623_v20 = vrot.slane %v2628_v3, %v1583_v8 }
 0x314   :  { %v2078_v5 = vadd.f32 %v3413_v48, %v1780_v24  ;;  %v990_v21 = vpop.f32.mrb[88].mxu1  ;;  %p2725_p8 = pnand %p2724_p7, %p2718_p4 }
 0x315   :  { %2333 = vst [vmem:[#allocation10 + $0x5d0] sm:$0xff] %v2077_v28  ;;  %v1787_v60 = vmul.f32 %v3397_v54, %v990_v21  ;;  %v992_v9 = vpop.f32.mrb[89].mxu1 }
 0x316   :  { %2334 = vst [vmem:[#allocation10 + $0x5d8] sm:$0xff] %v2078_v5  ;;  %v1788_v10 = vmul.f32 %v3403_v11, %v992_v9 }
 0x317   :  { %v2085_v46 = vadd.f32 %v3408_v63, %v1787_v60 }
 0x318   :  { %v2086_v35 = vadd.f32 %v3413_v48, %v1788_v10  ;;  %v996_v13 = vpop.f32.mrb[90].mxu1 }
 0x319   :  { %2341 = vst [vmem:[#allocation10 + $0x610] sm:$0xff] %v2085_v46  ;;  %v1795_v33 = vmul.f32 %v3397_v54, %v996_v13  ;;  %v998_v0 = vpop.f32.mrb[91].mxu1 }
 0x31a   :  { %2342 = vst [vmem:[#allocation10 + $0x618] sm:$0xff] %v2086_v35  ;;  %v1796_v6 = vmul.f32 %v3403_v11, %v998_v0 }
 0x31b   :  { %v2093_v30 = vadd.f32 %v3408_v63, %v1795_v33 }
 0x31c   :  { %v2094_v32 = vadd.f32 %v3413_v48, %v1796_v6  ;;  %v1002_v23 = vpop.f32.mrb[92].mxu1 }
 0x31d   :  { %2349 = vst [vmem:[#allocation10 + $0x650] sm:$0xff] %v2093_v30  ;;  %v1803_v17 = vmul.f32 %v3397_v54, %v1002_v23  ;;  %v1004_v1 = vpop.f32.mrb[93].mxu1 }
 0x31e   :  { %2350 = vst [vmem:[#allocation10 + $0x658] sm:$0xff] %v2094_v32  ;;  %v1804_v2 = vmul.f32 %v3403_v11, %v1004_v1 }
 0x31f   :  { %v2101_v12 = vadd.f32 %v3408_v63, %v1803_v17 }
 0x320   :  { %v2102_v34 = vadd.f32 %v3413_v48, %v1804_v2  ;;  %v1008_v37 = vpop.f32.mrb[94].mxu1 }
 0x321   :  { %2357 = vst [vmem:[#allocation10 + $0x690] sm:$0xff] %v2101_v12  ;;  %v1811_v40 = vmul.f32 %v3397_v54, %v1008_v37  ;;  %v1010_v39 = vpop.f32.mrb[95].mxu1 }
 0x322   :  { %2358 = vst [vmem:[#allocation10 + $0x698] sm:$0xff] %v2102_v34  ;;  %v1812_v41 = vmul.f32 %v3403_v11, %v1010_v39 }
 0x323   :  { %v2109_v49 = vadd.f32 %v3408_v63, %v1811_v40 }
 0x324   :  { %v2110_v43 = vadd.f32 %v3413_v48, %v1812_v41  ;;  %v1014_v27 = vpop.f32.mrb[96].mxu1 }
 0x325   :  { %2365 = vst [vmem:[#allocation10 + $0x6d0] sm:$0xff] %v2109_v49  ;;  %v1819_v53 = vmul.f32 %v3397_v54, %v1014_v27  ;;  %v1016_v16 = vpop.f32.mrb[97].mxu1 }
 0x326   :  { %2366 = vst [vmem:[#allocation10 + $0x6d8] sm:$0xff] %v2110_v43  ;;  %v1820_v44 = vmul.f32 %v3403_v11, %v1016_v16 }
 0x327   :  { %v2117_v14 = vadd.f32 %v3408_v63, %v1819_v53 }
 0x328   :  { %v2118_v45 = vadd.f32 %v3413_v48, %v1820_v44  ;;  %v1020_v15 = vpop.f32.mrb[98].mxu1 }
 0x329   :  { %2373 = vst [vmem:[#allocation10 + $0x710] sm:$0xff] %v2117_v14  ;;  %v1827_v4 = vmul.f32 %v3397_v54, %v1020_v15  ;;  %v1022_v36 = vpop.f32.mrb[99].mxu1 }
 0x32a   :  { %2374 = vst [vmem:[#allocation10 + $0x718] sm:$0xff] %v2118_v45  ;;  %v1828_v47 = vmul.f32 %v3403_v11, %v1022_v36 }
 0x32b   :  { %v2125_v50 = vadd.f32 %v3408_v63, %v1827_v4 }
 0x32c   :  { %v2126_v51 = vadd.f32 %v3413_v48, %v1828_v47  ;;  %v1026_v31 = vpop.f32.mrb[100].mxu1 }
 0x32d   :  { %2381 = vst [vmem:[#allocation10 + $0x750] sm:$0xff] %v2125_v50  ;;  %v1835_v25 = vmul.f32 %v3397_v54, %v1026_v31  ;;  %v1028_v59 = vpop.f32.mrb[101].mxu1 }
 0x32e   :  { %2382 = vst [vmem:[#allocation10 + $0x758] sm:$0xff] %v2126_v51  ;;  %v1836_v42 = vmul.f32 %v3403_v11, %v1028_v59 }
 0x32f   :  { %v2133_v52 = vadd.f32 %v3408_v63, %v1835_v25 }
 0x330   :  { %v2134_v19 = vadd.f32 %v3413_v48, %v1836_v42  ;;  %v1032_v26 = vpop.f32.mrb[102].mxu1 }
 0x331   :  { %2389 = vst [vmem:[#allocation10 + $0x790] sm:$0xff] %v2133_v52  ;;  %v1843_v7 = vmul.f32 %v3397_v54, %v1032_v26  ;;  %v1034_v61 = vpop.f32.mrb[103].mxu1 }
 0x332   :  { %2390 = vst [vmem:[#allocation10 + $0x798] sm:$0xff] %v2134_v19  ;;  %v1844_v58 = vmul.f32 %v3403_v11, %v1034_v61 }
 0x333   :  { %v2141_v57 = vadd.f32 %v3408_v63, %v1843_v7 }
 0x334   :  { %v2142_v22 = vadd.f32 %v3413_v48, %v1844_v58  ;;  %v1360_v54 = vpop.f32.mrb[104].mxu1 }
 0x335   :  { %2397 = vst [vmem:[#allocation10 + $0x7d0] sm:$0xff] %v2141_v57  ;;  %v1599_v29 = vmul.f32 %v3614_v55, %v1360_v54  ;;  %v1362_v24 = vpop.f32.mrb[105].mxu1 }
 0x336   :  { %2398 = vst [vmem:[#allocation10 + $0x7d8] sm:$0xff] %v2142_v22  ;;  %v1600_v28 = vmul.f32 %v3617_v18, %v1362_v24 }
 0x337   :  { %v1897_v11 = vadd.f32 %v3620_v38, %v1599_v29 }
 0x338   :  { %v1898_v5 = vadd.f32 %v3623_v20, %v1600_v28  ;;  %v1366_v63 = vpop.f32.mrb[106].mxu1 }
 0x339   :  { %2153 = vst [vmem:[#allocation10 + $0x30] sm:$0xff] %v1897_v11  ;;  %v1607_v21 = vmul.f32 %v3614_v55, %v1366_v63  ;;  %v1368_v60 = vpop.f32.mrb[107].mxu1 }
 0x33a   :  { %2154 = vst [vmem:[#allocation10 + $0x38] sm:$0xff] %v1898_v5  ;;  %v1608_v48 = vmul.f32 %v3617_v18, %v1368_v60 }
 0x33b   :  { %v1905_v9 = vadd.f32 %v3620_v38, %v1607_v21 }
 0x33c   :  { %v1906_v10 = vadd.f32 %v3623_v20, %v1608_v48  ;;  %v1372_v46 = vpop.f32.mrb[108].mxu1 }
 0x33d   :  { %2161 = vst [vmem:[#allocation10 + $0x70] sm:$0xff] %v1905_v9  ;;  %v1615_v35 = vmul.f32 %v3614_v55, %v1372_v46  ;;  %v1374_v13 = vpop.f32.mrb[109].mxu1 }
 0x33e   :  { %2162 = vst [vmem:[#allocation10 + $0x78] sm:$0xff] %v1906_v10  ;;  %v1616_v33 = vmul.f32 %v3617_v18, %v1374_v13 }
 0x33f   :  { %v1913_v0 = vadd.f32 %v3620_v38, %v1615_v35 }
 0x340   :  { %v1914_v6 = vadd.f32 %v3623_v20, %v1616_v33  ;;  %v1378_v30 = vpop.f32.mrb[110].mxu1 }
 0x341   :  { %2169 = vst [vmem:[#allocation10 + $0xb0] sm:$0xff] %v1913_v0  ;;  %v1623_v32 = vmul.f32 %v3614_v55, %v1378_v30  ;;  %v1380_v23 = vpop.f32.mrb[111].mxu1 }
 0x342   :  { %2170 = vst [vmem:[#allocation10 + $0xb8] sm:$0xff] %v1914_v6  ;;  %v1624_v17 = vmul.f32 %v3617_v18, %v1380_v23 }
 0x343   :  { %v1921_v1 = vadd.f32 %v3620_v38, %v1623_v32 }
 0x344   :  { %v1922_v2 = vadd.f32 %v3623_v20, %v1624_v17  ;;  %v1384_v12 = vpop.f32.mrb[112].mxu1 }
 0x345   :  { %2177 = vst [vmem:[#allocation10 + $0xf0] sm:$0xff] %v1921_v1  ;;  %v1631_v34 = vmul.f32 %v3614_v55, %v1384_v12  ;;  %v1386_v37 = vpop.f32.mrb[113].mxu1 }
 0x346   :  { %2178 = vst [vmem:[#allocation10 + $0xf8] sm:$0xff] %v1922_v2  ;;  %v1632_v40 = vmul.f32 %v3617_v18, %v1386_v37 }
 0x347   :  { %v1929_v39 = vadd.f32 %v3620_v38, %v1631_v34 }
 0x348   :  { %v1930_v41 = vadd.f32 %v3623_v20, %v1632_v40  ;;  %v1390_v49 = vpop.f32.mrb[114].mxu1 }
 0x349   :  { %2185 = vst [vmem:[#allocation10 + $0x130] sm:$0xff] %v1929_v39  ;;  %v1639_v43 = vmul.f32 %v3614_v55, %v1390_v49  ;;  %v1392_v27 = vpop.f32.mrb[115].mxu1 }
 0x34a   :  { %2186 = vst [vmem:[#allocation10 + $0x138] sm:$0xff] %v1930_v41  ;;  %v1640_v53 = vmul.f32 %v3617_v18, %v1392_v27 }
 0x34b   :  { %v1937_v16 = vadd.f32 %v3620_v38, %v1639_v43 }
 0x34c   :  { %v1938_v44 = vadd.f32 %v3623_v20, %v1640_v53  ;;  %v1396_v14 = vpop.f32.mrb[116].mxu1 }
 0x34d   :  { %2193 = vst [vmem:[#allocation10 + $0x170] sm:$0xff] %v1937_v16  ;;  %v1647_v45 = vmul.f32 %v3614_v55, %v1396_v14  ;;  %v1398_v15 = vpop.f32.mrb[117].mxu1 }
 0x34e   :  { %2194 = vst [vmem:[#allocation10 + $0x178] sm:$0xff] %v1938_v44  ;;  %v1648_v4 = vmul.f32 %v3617_v18, %v1398_v15 }
 0x34f   :  { %v1945_v36 = vadd.f32 %v3620_v38, %v1647_v45 }
 0x350   :  { %v1946_v47 = vadd.f32 %v3623_v20, %v1648_v4  ;;  %v1402_v50 = vpop.f32.mrb[118].mxu1 }
 0x351   :  { %2201 = vst [vmem:[#allocation10 + $0x1b0] sm:$0xff] %v1945_v36  ;;  %v1655_v51 = vmul.f32 %v3614_v55, %v1402_v50  ;;  %v1404_v31 = vpop.f32.mrb[119].mxu1 }
 0x352   :  { %2202 = vst [vmem:[#allocation10 + $0x1b8] sm:$0xff] %v1946_v47  ;;  %v1656_v25 = vmul.f32 %v3617_v18, %v1404_v31 }
 0x353   :  { %v1953_v59 = vadd.f32 %v3620_v38, %v1655_v51 }
 0x354   :  { %v1954_v56 = vadd.f32 %v3623_v20, %v1656_v25  ;;  %v1408_v42 = vpop.f32.mrb[120].mxu1 }
 0x355   :  { %2209 = vst [vmem:[#allocation10 + $0x1f0] sm:$0xff] %v1953_v59  ;;  %v1663_v8 = vmul.f32 %v3614_v55, %v1408_v42  ;;  %v1410_v52 = vpop.f32.mrb[121].mxu1 }
 0x356   :  { %2210 = vst [vmem:[#allocation10 + $0x1f8] sm:$0xff] %v1954_v56  ;;  %v1664_v19 = vmul.f32 %v3617_v18, %v1410_v52 }
 0x357   :  { %v1961_v26 = vadd.f32 %v3620_v38, %v1663_v8 }
 0x358   :  { %v1962_v7 = vadd.f32 %v3623_v20, %v1664_v19  ;;  %v1414_v61 = vpop.f32.mrb[122].mxu1 }
 0x359   :  { %2217 = vst [vmem:[#allocation10 + $0x230] sm:$0xff] %v1961_v26  ;;  %v1671_v62 = vmul.f32 %v3614_v55, %v1414_v61  ;;  %v1416_v58 = vpop.f32.mrb[123].mxu1 }
 0x35a   :  { %2218 = vst [vmem:[#allocation10 + $0x238] sm:$0xff] %v1962_v7  ;;  %v1672_v57 = vmul.f32 %v3617_v18, %v1416_v58 }
 0x35b   :  { %v1969_v3 = vadd.f32 %v3620_v38, %v1671_v62 }
 0x35c   :  { %v1970_v22 = vadd.f32 %v3623_v20, %v1672_v57  ;;  %v1420_v54 = vpop.f32.mrb[124].mxu1 }
 0x35d   :  { %2225 = vst [vmem:[#allocation10 + $0x270] sm:$0xff] %v1969_v3  ;;  %v1679_v29 = vmul.f32 %v3614_v55, %v1420_v54  ;;  %v1422_v24 = vpop.f32.mrb[125].mxu1 }
 0x35e   :  { %2226 = vst [vmem:[#allocation10 + $0x278] sm:$0xff] %v1970_v22  ;;  %v1680_v28 = vmul.f32 %v3617_v18, %v1422_v24 }
 0x35f   :  { %v1977_v11 = vadd.f32 %v3620_v38, %v1679_v29 }
 0x360   :  { %v1978_v5 = vadd.f32 %v3623_v20, %v1680_v28  ;;  %v1426_v63 = vpop.f32.mrb[126].mxu1 }
 0x361   :  { %2233 = vst [vmem:[#allocation10 + $0x2b0] sm:$0xff] %v1977_v11  ;;  %v1687_v21 = vmul.f32 %v3614_v55, %v1426_v63  ;;  %v1428_v60 = vpop.f32.mrb[127].mxu1 }
 0x362   :  { %2234 = vst [vmem:[#allocation10 + $0x2b8] sm:$0xff] %v1978_v5  ;;  %v1688_v48 = vmul.f32 %v3617_v18, %v1428_v60 }
 0x363   :  { %v1985_v9 = vadd.f32 %v3620_v38, %v1687_v21 }
 0x364   :  { %v1986_v10 = vadd.f32 %v3623_v20, %v1688_v48  ;;  %v1432_v46 = vpop.f32.mrb[128].mxu1 }
 0x365   :  { %2241 = vst [vmem:[#allocation10 + $0x2f0] sm:$0xff] %v1985_v9  ;;  %v1695_v35 = vmul.f32 %v3614_v55, %v1432_v46  ;;  %v1434_v13 = vpop.f32.mrb[129].mxu1 }
 0x366   :  { %2242 = vst [vmem:[#allocation10 + $0x2f8] sm:$0xff] %v1986_v10  ;;  %v1696_v33 = vmul.f32 %v3617_v18, %v1434_v13 }
 0x367   :  { %v1993_v0 = vadd.f32 %v3620_v38, %v1695_v35 }
 0x368   :  { %v1994_v6 = vadd.f32 %v3623_v20, %v1696_v33  ;;  %v1438_v30 = vpop.f32.mrb[130].mxu1 }
 0x369   :  { %2249 = vst [vmem:[#allocation10 + $0x330] sm:$0xff] %v1993_v0  ;;  %v1703_v32 = vmul.f32 %v3614_v55, %v1438_v30  ;;  %v1440_v23 = vpop.f32.mrb[131].mxu1 }
 0x36a   :  { %2250 = vst [vmem:[#allocation10 + $0x338] sm:$0xff] %v1994_v6  ;;  %v1704_v17 = vmul.f32 %v3617_v18, %v1440_v23 }
 0x36b   :  { %v2001_v1 = vadd.f32 %v3620_v38, %v1703_v32 }
 0x36c   :  { %v2002_v2 = vadd.f32 %v3623_v20, %v1704_v17  ;;  %v1444_v12 = vpop.f32.mrb[132].mxu1 }
 0x36d   :  { %2257 = vst [vmem:[#allocation10 + $0x370] sm:$0xff] %v2001_v1  ;;  %v1711_v34 = vmul.f32 %v3614_v55, %v1444_v12  ;;  %v1446_v37 = vpop.f32.mrb[133].mxu1 }
 0x36e   :  { %2258 = vst [vmem:[#allocation10 + $0x378] sm:$0xff] %v2002_v2  ;;  %v1712_v40 = vmul.f32 %v3617_v18, %v1446_v37 }
 0x36f   :  { %v2009_v39 = vadd.f32 %v3620_v38, %v1711_v34 }
 0x370   :  { %v2010_v41 = vadd.f32 %v3623_v20, %v1712_v40  ;;  %v1450_v49 = vpop.f32.mrb[134].mxu1 }
 0x371   :  { %2265 = vst [vmem:[#allocation10 + $0x3b0] sm:$0xff] %v2009_v39  ;;  %v1719_v43 = vmul.f32 %v3614_v55, %v1450_v49  ;;  %v1452_v27 = vpop.f32.mrb[135].mxu1 }
 0x372   :  { %2266 = vst [vmem:[#allocation10 + $0x3b8] sm:$0xff] %v2010_v41  ;;  %v1720_v53 = vmul.f32 %v3617_v18, %v1452_v27 }
 0x373   :  { %v2017_v16 = vadd.f32 %v3620_v38, %v1719_v43 }
 0x374   :  { %v2018_v44 = vadd.f32 %v3623_v20, %v1720_v53  ;;  %v1456_v14 = vpop.f32.mrb[136].mxu1 }
 0x375   :  { %2273 = vst [vmem:[#allocation10 + $0x3f0] sm:$0xff] %v2017_v16  ;;  %v1727_v45 = vmul.f32 %v3614_v55, %v1456_v14  ;;  %v1458_v15 = vpop.f32.mrb[137].mxu1 }
 0x376   :  { %2274 = vst [vmem:[#allocation10 + $0x3f8] sm:$0xff] %v2018_v44  ;;  %v1728_v4 = vmul.f32 %v3617_v18, %v1458_v15 }
 0x377   :  { %v2025_v36 = vadd.f32 %v3620_v38, %v1727_v45 }
 0x378   :  { %v2026_v47 = vadd.f32 %v3623_v20, %v1728_v4  ;;  %v1462_v50 = vpop.f32.mrb[138].mxu1 }
 0x379   :  { %2281 = vst [vmem:[#allocation10 + $0x430] sm:$0xff] %v2025_v36  ;;  %v1735_v51 = vmul.f32 %v3614_v55, %v1462_v50  ;;  %v1464_v31 = vpop.f32.mrb[139].mxu1 }
 0x37a   :  { %2282 = vst [vmem:[#allocation10 + $0x438] sm:$0xff] %v2026_v47  ;;  %v1736_v25 = vmul.f32 %v3617_v18, %v1464_v31 }
 0x37b   :  { %v2033_v59 = vadd.f32 %v3620_v38, %v1735_v51 }
 0x37c   :  { %v2034_v56 = vadd.f32 %v3623_v20, %v1736_v25  ;;  %v1468_v42 = vpop.f32.mrb[140].mxu1 }
 0x37d   :  { %2289 = vst [vmem:[#allocation10 + $0x470] sm:$0xff] %v2033_v59  ;;  %v1743_v8 = vmul.f32 %v3614_v55, %v1468_v42  ;;  %v1470_v52 = vpop.f32.mrb[141].mxu1 }
 0x37e   :  { %2290 = vst [vmem:[#allocation10 + $0x478] sm:$0xff] %v2034_v56  ;;  %v1744_v19 = vmul.f32 %v3617_v18, %v1470_v52 }
 0x37f   :  { %v2041_v26 = vadd.f32 %v3620_v38, %v1743_v8 }
 0x380   :  { %v2042_v7 = vadd.f32 %v3623_v20, %v1744_v19  ;;  %v1474_v61 = vpop.f32.mrb[142].mxu1 }
 0x381   :  { %2297 = vst [vmem:[#allocation10 + $0x4b0] sm:$0xff] %v2041_v26  ;;  %v1751_v62 = vmul.f32 %v3614_v55, %v1474_v61  ;;  %v1476_v58 = vpop.f32.mrb[143].mxu1 }
 0x382   :  { %2298 = vst [vmem:[#allocation10 + $0x4b8] sm:$0xff] %v2042_v7  ;;  %v1752_v57 = vmul.f32 %v3617_v18, %v1476_v58 }
 0x383   :  { %v2049_v3 = vadd.f32 %v3620_v38, %v1751_v62 }
 0x384   :  { %v2050_v22 = vadd.f32 %v3623_v20, %v1752_v57  ;;  %v1480_v54 = vpop.f32.mrb[144].mxu1 }
 0x385   :  { %2305 = vst [vmem:[#allocation10 + $0x4f0] sm:$0xff] %v2049_v3  ;;  %v1759_v29 = vmul.f32 %v3614_v55, %v1480_v54  ;;  %v1482_v24 = vpop.f32.mrb[145].mxu1 }
 0x386   :  { %2306 = vst [vmem:[#allocation10 + $0x4f8] sm:$0xff] %v2050_v22  ;;  %v1760_v28 = vmul.f32 %v3617_v18, %v1482_v24 }
 0x387   :  { %v2057_v11 = vadd.f32 %v3620_v38, %v1759_v29 }
 0x388   :  { %v2058_v5 = vadd.f32 %v3623_v20, %v1760_v28  ;;  %v1486_v63 = vpop.f32.mrb[146].mxu1 }
 0x389   :  { %2313 = vst [vmem:[#allocation10 + $0x530] sm:$0xff] %v2057_v11  ;;  %v1767_v21 = vmul.f32 %v3614_v55, %v1486_v63  ;;  %v1488_v60 = vpop.f32.mrb[147].mxu1 }
 0x38a   :  { %2314 = vst [vmem:[#allocation10 + $0x538] sm:$0xff] %v2058_v5  ;;  %v1768_v48 = vmul.f32 %v3617_v18, %v1488_v60 }
 0x38b   :  { %v2065_v9 = vadd.f32 %v3620_v38, %v1767_v21 }
 0x38c   :  { %v2066_v10 = vadd.f32 %v3623_v20, %v1768_v48  ;;  %v1492_v46 = vpop.f32.mrb[148].mxu1 }
 0x38d   :  { %2321 = vst [vmem:[#allocation10 + $0x570] sm:$0xff] %v2065_v9  ;;  %v1775_v35 = vmul.f32 %v3614_v55, %v1492_v46  ;;  %v1494_v13 = vpop.f32.mrb[149].mxu1 }
 0x38e   :  { %2322 = vst [vmem:[#allocation10 + $0x578] sm:$0xff] %v2066_v10  ;;  %v1776_v33 = vmul.f32 %v3617_v18, %v1494_v13 }
 0x38f   :  { %v2073_v0 = vadd.f32 %v3620_v38, %v1775_v35 }
 0x390   :  { %v2074_v6 = vadd.f32 %v3623_v20, %v1776_v33  ;;  %v1498_v30 = vpop.f32.mrb[150].mxu1 }
 0x391   :  { %2329 = vst [vmem:[#allocation10 + $0x5b0] sm:$0xff] %v2073_v0  ;;  %v1783_v32 = vmul.f32 %v3614_v55, %v1498_v30  ;;  %v1500_v23 = vpop.f32.mrb[151].mxu1 }
 0x392   :  { %2330 = vst [vmem:[#allocation10 + $0x5b8] sm:$0xff] %v2074_v6  ;;  %v1784_v17 = vmul.f32 %v3617_v18, %v1500_v23 }
 0x393   :  { %v2081_v1 = vadd.f32 %v3620_v38, %v1783_v32 }
 0x394   :  { %v2082_v2 = vadd.f32 %v3623_v20, %v1784_v17  ;;  %v1504_v12 = vpop.f32.mrb[152].mxu1 }
 0x395   :  { %2337 = vst [vmem:[#allocation10 + $0x5f0] sm:$0xff] %v2081_v1  ;;  %v1791_v34 = vmul.f32 %v3614_v55, %v1504_v12  ;;  %v1506_v37 = vpop.f32.mrb[153].mxu1 }
 0x396   :  { %2338 = vst [vmem:[#allocation10 + $0x5f8] sm:$0xff] %v2082_v2  ;;  %v1792_v40 = vmul.f32 %v3617_v18, %v1506_v37 }
 0x397   :  { %v2089_v39 = vadd.f32 %v3620_v38, %v1791_v34 }
 0x398   :  { %v2090_v41 = vadd.f32 %v3623_v20, %v1792_v40  ;;  %v1510_v49 = vpop.f32.mrb[154].mxu1 }
 0x399   :  { %2345 = vst [vmem:[#allocation10 + $0x630] sm:$0xff] %v2089_v39  ;;  %v1799_v43 = vmul.f32 %v3614_v55, %v1510_v49  ;;  %v1512_v27 = vpop.f32.mrb[155].mxu1 }
 0x39a   :  { %2346 = vst [vmem:[#allocation10 + $0x638] sm:$0xff] %v2090_v41  ;;  %v1800_v53 = vmul.f32 %v3617_v18, %v1512_v27 }
 0x39b   :  { %v2097_v16 = vadd.f32 %v3620_v38, %v1799_v43 }
 0x39c   :  { %v2098_v44 = vadd.f32 %v3623_v20, %v1800_v53  ;;  %v1516_v14 = vpop.f32.mrb[156].mxu1 }
 0x39d   :  { %2353 = vst [vmem:[#allocation10 + $0x670] sm:$0xff] %v2097_v16  ;;  %v1807_v45 = vmul.f32 %v3614_v55, %v1516_v14  ;;  %v1518_v15 = vpop.f32.mrb[157].mxu1 }
 0x39e   :  { %2354 = vst [vmem:[#allocation10 + $0x678] sm:$0xff] %v2098_v44  ;;  %v1808_v4 = vmul.f32 %v3617_v18, %v1518_v15 }
 0x39f   :  { %v2105_v36 = vadd.f32 %v3620_v38, %v1807_v45 }
 0x3a0   :  { %v2106_v47 = vadd.f32 %v3623_v20, %v1808_v4  ;;  %v1522_v50 = vpop.f32.mrb[158].mxu1 }
 0x3a1   :  { %2361 = vst [vmem:[#allocation10 + $0x6b0] sm:$0xff] %v2105_v36  ;;  %v1815_v51 = vmul.f32 %v3614_v55, %v1522_v50  ;;  %v1524_v31 = vpop.f32.mrb[159].mxu1 }
 0x3a2   :  { %2362 = vst [vmem:[#allocation10 + $0x6b8] sm:$0xff] %v2106_v47  ;;  %v1816_v25 = vmul.f32 %v3617_v18, %v1524_v31 }
 0x3a3   :  { %v2113_v59 = vadd.f32 %v3620_v38, %v1815_v51 }
 0x3a4   :  { %v2114_v56 = vadd.f32 %v3623_v20, %v1816_v25  ;;  %v1528_v42 = vpop.f32.mrb[160].mxu1 }
 0x3a5   :  { %2369 = vst [vmem:[#allocation10 + $0x6f0] sm:$0xff] %v2113_v59  ;;  %v1823_v8 = vmul.f32 %v3614_v55, %v1528_v42  ;;  %v1530_v52 = vpop.f32.mrb[161].mxu1 }
 0x3a6   :  { %2370 = vst [vmem:[#allocation10 + $0x6f8] sm:$0xff] %v2114_v56  ;;  %v1824_v19 = vmul.f32 %v3617_v18, %v1530_v52 }
 0x3a7   :  { %v2121_v26 = vadd.f32 %v3620_v38, %v1823_v8 }
 0x3a8   :  { %v2122_v7 = vadd.f32 %v3623_v20, %v1824_v19  ;;  %v1534_v61 = vpop.f32.mrb[162].mxu1 }
 0x3a9   :  { %2377 = vst [vmem:[#allocation10 + $0x730] sm:$0xff] %v2121_v26  ;;  %v1831_v62 = vmul.f32 %v3614_v55, %v1534_v61  ;;  %v1536_v58 = vpop.f32.mrb[163].mxu1 }
 0x3aa   :  { %2378 = vst [vmem:[#allocation10 + $0x738] sm:$0xff] %v2122_v7  ;;  %v1832_v57 = vmul.f32 %v3617_v18, %v1536_v58 }
 0x3ab   :  { %v2129_v3 = vadd.f32 %v3620_v38, %v1831_v62 }
 0x3ac   :  { %v2130_v22 = vadd.f32 %v3623_v20, %v1832_v57  ;;  %v1540_v54 = vpop.f32.mrb[164].mxu1 }
 0x3ad   :  { %2385 = vst [vmem:[#allocation10 + $0x770] sm:$0xff] %v2129_v3  ;;  %v1839_v29 = vmul.f32 %v3614_v55, %v1540_v54  ;;  %v1542_v24 = vpop.f32.mrb[165].mxu1 }
 0x3ae   :  { %2386 = vst [vmem:[#allocation10 + $0x778] sm:$0xff] %v2130_v22  ;;  %v1840_v28 = vmul.f32 %v3617_v18, %v1542_v24 }
 0x3af   :  { %v2137_v11 = vadd.f32 %v3620_v38, %v1839_v29 }
 0x3b0   :  { %v2138_v5 = vadd.f32 %v3623_v20, %v1840_v28  ;;  %v1546_v63 = vpop.f32.mrb[166].mxu1 }
 0x3b1   :  { %2393 = vst [vmem:[#allocation10 + $0x7b0] sm:$0xff] %v2137_v11  ;;  %v1847_v21 = vmul.f32 %v3614_v55, %v1546_v63  ;;  %v1548_v60 = vpop.f32.mrb[167].mxu1 }
 0x3b2   :  { %2394 = vst [vmem:[#allocation10 + $0x7b8] sm:$0xff] %v2138_v5  ;;  %v1848_v48 = vmul.f32 %v3617_v18, %v1548_v60 }
 0x3b3   :  { %v2145_v9 = vadd.f32 %v3620_v38, %v1847_v21 }
 0x3b4   :  { %v2146_v10 = vadd.f32 %v3623_v20, %v1848_v48 }
 0x3b5   :  { %2401 = vst [vmem:[#allocation10 + $0x7f0] sm:$0xff] %v2145_v9 }
 0x3b6   :  { %2402 = vst [vmem:[#allocation10 + $0x7f8] sm:$0xff] %v2146_v10 }
 0x3b7   :  { %2728 = shalt.err (!%p2725_p8)
}
 0x3b8   :  { %s2729_s25 = scalar_lea.hbm %s3773_s5, 32768 }
 0x3b9   :  { %p2730_p9 = scmp.ne.s32.totalorder %s3773_s5, %s2729_s25  ;;  %p2733_p10 = scmp.lt.u32.totalorder %s2729_s25, %s3773_s5 }
 0x3bb   :  { %p2735_p11 = pnand %p2733_p10, %p2730_p9 }
 0x3bd   :  { %2738 = shalt.err (!%p2735_p11)
}
 0x3be   :  { %2414 = dma.vmem_to_hbm [thread:$0]  %s2409_s21, 32768, %s3773_s5, [#allocation4], %s2754_s0, %s2754_s0, %s2755_s30  }
 0x3bf   :  { %2745 = dma.done.wait [#allocation4], 32768  }
 0x3c0   :  { %2746 = vsyncadd [#allocation4], 4294934528 }
 0x3c1   :  { %2418 = vsyncpa [#allocation3], 1 }
 0x3c2   :  { %2419 = vsyncpa [#allocation6], 1 }
 0x3c3   :  { %2420 = vsyncpa [#allocation9], 1 }
 0x3c4   :  { %2421 = vsyncpa [#allocation4], 1 }

</bundles_post_ra>
